<compile_context>
chip_gen: v7x
topology: tpu7x:2x2x1
jax: 0.10.0
libtpu: 0.0.40
codegen_flags: <defaults>
</compile_context>

<pallas_src>
import functools

import jax
import jax.numpy as jnp
import numpy as np
from jax import lax
from jax.experimental import pallas as pl
from jax.experimental.pallas import tpu as pltpu

EPS = 1e-5
PAD = 8                      # zero-guard rows at both ends of the halo-window scratch
MATMUL_DTYPE = jnp.bfloat16  # MXU operand dtype (accumulation stays f32)
ACT_DTYPE = jnp.bfloat16     # dtype of x / y1 activation slabs in HBM


# --------------------------------------------------------------------------------------
# in-kernel helpers
# --------------------------------------------------------------------------------------
def _edge_masks(tm, w_img, chunk_idx, n_chunks):
    """Masks selecting output pixels whose 3x3 taps fall on the conv zero padding."""
    t = lax.broadcasted_iota(jnp.int32, (tm, 1), 0)     # flat pixel index within chunk
    col = t % w_img
    top = jnp.logical_and(chunk_idx == 0, t < w_img)                     # image row 0
    bot = jnp.logical_and(chunk_idx == n_chunks - 1, t >= tm - w_img)    # image row H-1
    left = col == 0
    right = col == w_img - 1
    return top, bot, left, right


def _conv3x3_window(win_ref, w_ref, masks, tm, w_img, cin, cout):
    """3x3 / padding=1 conv of one pixel chunk as 9 shifted MXU matmuls.

    win_ref (f32 VMEM scratch) holds, flattened over pixels:
        [PAD zero rows | 1 halo image row | TM chunk rows | 1 halo image row | PAD zeros]
    Each (dy, dx) tap is a static slice of TM rows at offset (dy-1)*W + (dx-1); masks
    zero the taps that would read the conv zero padding or a neighbouring image.
    """
    top, bot, left, right = masks
    base = PAD + w_img
    acc = jnp.zeros((tm, cout), jnp.float32)
    for dy in range(3):
        for dx in range(3):
            start = base + (dy - 1) * w_img + (dx - 1)
            chunk = win_ref[start:start + tm, :]
            mask = None
            if dy == 0:
                mask = top
            elif dy == 2:
                mask = bot
            if dx == 0:
                mask = left if mask is None else jnp.logical_or(mask, left)
            elif dx == 2:
                mask = right if mask is None else jnp.logical_or(mask, right)
            if mask is not None:
                chunk = jnp.where(mask, 0.0, chunk)
            k = dy * 3 + dx
            acc += jnp.dot(chunk.astype(MATMUL_DTYPE),
                           w_ref[k * cin:(k + 1) * cin, :],
                           preferred_element_type=jnp.float32)
    return acc


def _sums(*arrs):
    """Per-channel [sum, sum_of_squares] rows for each array, stacked -> (2*len, C)."""
    rows = []
    for a in arrs:
        rows.append(jnp.sum(a, axis=0, keepdims=True))
        rows.append(jnp.sum(a * a, axis=0, keepdims=True))
    return jnp.concatenate(rows, axis=0)


def _bn_affine(s, ss, gamma, beta, count):
    """Fold training-mode BN into a single per-channel scale/shift (f32)."""
    mean = s / count
    var = ss / count - mean * mean           # biased variance, f32 accumulation
    scale = gamma.astype(jnp.float32) * lax.rsqrt(var + EPS)
    shift = beta.astype(jnp.float32) - scale * mean
    return scale.reshape(1, -1), shift.reshape(1, -1)


# --------------------------------------------------------------------------------------
# forward pass
# --------------------------------------------------------------------------------------
@functools.partial(jax.jit, static_argnames=("tile_rows",))
def resblock_forward(x_nchw, params, *, tile_rows=4):
    n, cin, h, w = x_nchw.shape
    cout = params["g1"].shape[0]
    assert h % tile_rows == 0, "tile_rows must divide H"
    assert w % 8 == 0, "image width must be a multiple of 8 (sublane tile)"
    n_chunks = h // tile_rows            # row-chunks per image (grid axis 1)
    tm = tile_rows * w                   # pixels per chunk; size tile_rows so tm~512-1024 in deployment
    m = n * h * w                        # total pixels
    win_rows = 2 * PAD + 2 * w + tm      # halo-window scratch rows

    # ---- layout plumbing (cheap, once, in HBM): NCHW -> lane-dense (M, C) slab ----
    x_flat = jnp.transpose(x_nchw, (0, 2, 3, 1)).reshape(m, cin).astype(ACT_DTYPE)
    w1 = params["w1"].reshape(9 * cin, cout).astype(MATMUL_DTYPE)   # rows ordered (dy, dx, ci)
    w2 = params["w2"].reshape(9 * cout, cout).astype(MATMUL_DTYPE)
    wd = params["wd"].astype(MATMUL_DTYPE)
    # NOTE: conv biases b1/b2 are intentionally unused: a constant per-channel bias is
    # exactly cancelled by training-mode BatchNorm ((y+b) - mean(y+b) == y - mean(y)).

    # ---- shared index maps (gn = image, gi = row-chunk) ----
    cur_map = lambda gn, gi: (gn * n_chunks + gi, 0)                                  # (tm, C) blocks
    above_map = lambda gn, gi: (jnp.maximum(gn * h + gi * tile_rows - 1, 0), 0)       # (w,  C) halo row
    below_map = lambda gn, gi: (jnp.minimum(gn * h + (gi + 1) * tile_rows, n * h - 1), 0)
    full_map = lambda gn, gi: (0, 0)
    stat_map = lambda gn, gi: (gn, gi, 0, 0)

    mosaic = lambda sem: pltpu.CompilerParams(
        dimension_semantics=sem, vmem_limit_bytes=32 * 1024 * 1024)

    # ======== pass A: y1 = conv3x3(x), yd = conv1x1(x), per-chunk BN partial stats ========
    def pass_a_kernel(xa_ref, xc_ref, xb_ref, w1_ref, wd_ref,
                      y1_ref, yd_ref, st_ref, win_ref):
        zeros = jnp.zeros((PAD, cin), jnp.float32)
        win_ref[0:PAD, :] = zeros
        win_ref[PAD:PAD + w, :] = xa_ref[...].astype(jnp.float32)
        xc = xc_ref[...]
        win_ref[PAD + w:PAD + w + tm, :] = xc.astype(jnp.float32)
        win_ref[PAD + w + tm:PAD + 2 * w + tm, :] = xb_ref[...].astype(jnp.float32)
        win_ref[PAD + 2 * w + tm:win_rows, :] = zeros

        masks = _edge_masks(tm, w, pl.program_id(1), pl.num_programs(1))
        acc = _conv3x3_window(win_ref, w1_ref, masks, tm, w, cin, cout)   # f32 (tm, cout)
        y1_ref[...] = acc.astype(y1_ref.dtype)

        zd = jnp.dot(xc.astype(MATMUL_DTYPE), wd_ref[...],
                     preferred_element_type=jnp.float32)                  # 1x1 downsample conv
        yd_ref[...] = zd
        st_ref[...] = _sums(acc, zd).reshape(st_ref.shape)

    y1, yd, st_a = pl.pallas_call(
        pass_a_kernel,
        grid=(n, n_chunks),
        in_specs=[
            pl.BlockSpec((w, cin), above_map),        # 1-image-row halo above
            pl.BlockSpec((tm, cin), cur_map),         # current chunk
            pl.BlockSpec((w, cin), below_map),        # 1-image-row halo below
            pl.BlockSpec((9 * cin, cout), full_map),  # conv1 weights
            pl.BlockSpec((cin, cout), full_map),      # downsample weights
        ],
        out_specs=(
            pl.BlockSpec((tm, cout), cur_map),
            pl.BlockSpec((tm, cout), cur_map),
            pl.BlockSpec((1, 1, 4, cout), stat_map),
        ),
        out_shape=(
            jax.ShapeDtypeStruct((m, cout), ACT_DTYPE),      # y1 (pre-BN conv1 output)
            jax.ShapeDtypeStruct((m, cout), jnp.float32),    # yd (pre-BN 1x1 output)
            jax.ShapeDtypeStruct((n, n_chunks, 4, cout), jnp.float32),
        ),
        scratch_shapes=[pltpu.VMEM((win_rows, cin), jnp.float32)],
        compiler_params=mosaic(("parallel", "parallel")),
    )(x_flat, x_flat, x_flat, w1, wd)

    # tiny cross-chunk reductions + affine folding (negligible XLA ops on (4, C))
    st_a = jnp.sum(st_a, axis=(0, 1))
    scale1, shift1 = _bn_affine(st_a[0], st_a[1], params["g1"], params["be1"], m)
    scale_d, shift_d = _bn_affine(st_a[2], st_a[3], params["gd"], params["bed"], m)

    # ======== pass B: h1 = ReLU(BN1(y1)), y2 = conv3x3(h1), per-chunk BN partial stats =====
    def pass_b_kernel(ya_ref, yc_ref, yb_ref, s1_ref, t1_ref, w2_ref,
                      y2_ref, st_ref, win_ref):
        s1 = s1_ref[...]
        t1 = t1_ref[...]
        act = lambda v: jnp.maximum(v.astype(jnp.float32) * s1 + t1, 0.0)
        zeros = jnp.zeros((PAD, cout), jnp.float32)
        win_ref[0:PAD, :] = zeros
        win_ref[PAD:PAD + w, :] = act(ya_ref[...])
        win_ref[PAD + w:PAD + w + tm, :] = act(yc_ref[...])
        win_ref[PAD + w + tm:PAD + 2 * w + tm, :] = act(yb_ref[...])
        win_ref[PAD + 2 * w + tm:win_rows, :] = zeros

        masks = _edge_masks(tm, w, pl.program_id(1), pl.num_programs(1))
        acc = _conv3x3_window(win_ref, w2_ref, masks, tm, w, cout, cout)
        y2_ref[...] = acc
        st_ref[...] = _sums(acc).reshape(st_ref.shape)

    y2, st_b = pl.pallas_call(
        pass_b_kernel,
        grid=(n, n_chunks),
        in_specs=[
            pl.BlockSpec((w, cout), above_map),
            pl.BlockSpec((tm, cout), cur_map),
            pl.BlockSpec((w, cout), below_map),
            pl.BlockSpec((1, cout), full_map),        # scale1
            pl.BlockSpec((1, cout), full_map),        # shift1
            pl.BlockSpec((9 * cout, cout), full_map),
        ],
        out_specs=(
            pl.BlockSpec((tm, cout), cur_map),
            pl.BlockSpec((1, 1, 2, cout), stat_map),
        ),
        out_shape=(
            jax.ShapeDtypeStruct((m, cout), jnp.float32),
            jax.ShapeDtypeStruct((n, n_chunks, 2, cout), jnp.float32),
        ),
        scratch_shapes=[pltpu.VMEM((win_rows, cout), jnp.float32)],
        compiler_params=mosaic(("parallel", "parallel")),
    )(y1, y1, y1, scale1, shift1, w2)

    st_b = jnp.sum(st_b, axis=(0, 1))
    scale2, shift2 = _bn_affine(st_b[0], st_b[1], params["g2"], params["be2"], m)

    # ======== pass C: out = ReLU(ReLU(BN2(y2)) + BNd(yd)) ==================================
    def pass_c_kernel(y2_ref, yd_ref, s2_ref, t2_ref, sd_ref, td_ref, o_ref):
        h2 = jnp.maximum(y2_ref[...] * s2_ref[...] + t2_ref[...], 0.0)
        ident = yd_ref[...] * sd_ref[...] + td_ref[...]
        o_ref[...] = jnp.maximum(h2 + ident, 0.0)

    row_map = lambda gi: (gi, 0)
    const_map = lambda gi: (0, 0)
    out_flat = pl.pallas_call(
        pass_c_kernel,
        grid=(m // tm,),
        in_specs=[
            pl.BlockSpec((tm, cout), row_map),
            pl.BlockSpec((tm, cout), row_map),
            pl.BlockSpec((1, cout), const_map),
            pl.BlockSpec((1, cout), const_map),
            pl.BlockSpec((1, cout), const_map),
            pl.BlockSpec((1, cout), const_map),
        ],
        out_specs=pl.BlockSpec((tm, cout), row_map),
        out_shape=jax.ShapeDtypeStruct((m, cout), jnp.float32),
        compiler_params=mosaic(("parallel",)),
    )(y2, yd, scale2, shift2, scale_d, shift_d)

    return jnp.transpose(out_flat.reshape(n, h, w, cout), (0, 3, 1, 2))


# --------------------------------------------------------------------------------------
# pure-JAX reference (mirrors PyTorch semantics, f32, biases included)
# --------------------------------------------------------------------------------------
def _bn_train(x_nhwc, gamma, beta):
    mean = jnp.mean(x_nhwc, axis=(0, 1, 2), keepdims=True)
    var = jnp.mean((x_nhwc - mean) ** 2, axis=(0, 1, 2), keepdims=True)
    return gamma * (x_nhwc - mean) / jnp.sqrt(var + EPS) + beta


def resblock_reference(x_nchw, params):
    x = jnp.transpose(x_nchw, (0, 2, 3, 1)).astype(jnp.float32)
    conv = lambda a, w_, pad: lax.conv_general_dilated(
        a, w_, (1, 1), pad, dimension_numbers=("NHWC", "HWIO", "NHWC"),
        precision=lax.Precision.HIGHEST)
    h = jnp.maximum(_bn_train(conv(x, params["w1"], ((1, 1), (1, 1))) + params["b1"],
                              params["g1"], params["be1"]), 0.0)
    h = jnp.maximum(_bn_train(conv(h, params["w2"], ((1, 1), (1, 1))) + params["b2"],
                              params["g2"], params["be2"]), 0.0)
    ident = _bn_train(conv(x, params["wd"][None, None], ((0, 0), (0, 0))),
                      params["gd"], params["bed"])
    out = jnp.maximum(h + ident, 0.0)
    return jnp.transpose(out, (0, 3, 1, 2))


if __name__ == "__main__":
    key = jax.random.PRNGKey(0)
    kx, *ks = jax.random.split(key, 12)
    # ResBlock(128, 128) -- the `res2` stage of ResUNet -- at a small spatial size.
    batch, chan, height, width = 2, 128, 16, 16

    x = jax.random.normal(kx, (batch, chan, height, width), jnp.float32)
    params = {
        # conv1 of double_conv: 3x3 (+ bias, unused by the kernel: cancelled by train-mode BN)
        "w1": 0.1 * jax.random.normal(ks[0], (3, 3, chan, chan), jnp.float32),
        "b1": 0.1 * jax.random.normal(ks[1], (chan,), jnp.float32),
        "g1": 1.0 + 0.1 * jax.random.normal(ks[2], (chan,), jnp.float32),
        "be1": 0.1 * jax.random.normal(ks[3], (chan,), jnp.float32),
        # conv2 of double_conv: 3x3 (+ bias)
        "w2": 0.1 * jax.random.normal(ks[4], (3, 3, chan, chan), jnp.float32),
        "b2": 0.1 * jax.random.normal(ks[5], (chan,), jnp.float32),
        "g2": 1.0 + 0.1 * jax.random.normal(ks[6], (chan,), jnp.float32),
        "be2": 0.1 * jax.random.normal(ks[7], (chan,), jnp.float32),
        # downsample branch: 1x1 conv (no bias) + BN
        "wd": 0.1 * jax.random.normal(ks[8], (chan, chan), jnp.float32),
        "gd": 1.0 + 0.1 * jax.random.normal(ks[9], (chan,), jnp.float32),
        "bed": 0.1 * jax.random.normal(ks[10], (chan,), jnp.float32),
    }

    out = jax.block_until_ready(resblock_forward(x, params, tile_rows=4))
    ref = jax.block_until_ready(resblock_reference(x, params))
    assert out.shape == (batch, chan, height, width)
    # Kernel uses bf16 MXU operands with f32 accumulation; compare against the pure-f32
    # reference with a bf16-appropriate tolerance.
    np.testing.assert_allclose(np.asarray(out), np.asarray(ref), atol=6e-2, rtol=6e-2)
    print("KERNEL_OK")
</pallas_src>

<mosaic_0001>
module attributes {stable_mosaic.version = 11 : i64} {
  func.func @pass_a_kernel(%arg0: i32, %arg1: i32, %arg2: memref<16x128xbf16, #tpu.memory_space<vmem>>, %arg3: memref<64x128xbf16, #tpu.memory_space<vmem>>, %arg4: memref<16x128xbf16, #tpu.memory_space<vmem>>, %arg5: memref<1152x128xbf16, #tpu.memory_space<vmem>>, %arg6: memref<128x128xbf16, #tpu.memory_space<vmem>>, %arg7: memref<64x128xbf16, #tpu.memory_space<vmem>>, %arg8: memref<64x128xf32, #tpu.memory_space<vmem>>, %arg9: memref<1x1x4x128xf32, #tpu.memory_space<vmem>>, %arg10: memref<112x128xf32, #tpu.memory_space<vmem>>) attributes {dimension_semantics = [#tpu.dimension_semantics<parallel>, #tpu.dimension_semantics<parallel>], iteration_bounds = array<i64: 2, 4>, scalar_prefetch = 0 : i64, scratch_operands = 1 : i64, tpu.core_type = #tpu.core_type<tc>, window_params = [{transform_indices = @transform_0, window_bounds = array<i64: 16, 128>}, {transform_indices = @transform_1, window_bounds = array<i64: 64, 128>}, {transform_indices = @transform_2, window_bounds = array<i64: 16, 128>}, {pipeline_mode = #tpu.pipeline_mode<synchronous>, transform_indices = @transform_3, window_bounds = array<i64: 1152, 128>}, {pipeline_mode = #tpu.pipeline_mode<synchronous>, transform_indices = @transform_4, window_bounds = array<i64: 128, 128>}, {transform_indices = @transform_5, window_bounds = array<i64: 64, 128>}, {transform_indices = @transform_6, window_bounds = array<i64: 64, 128>}, {transform_indices = @transform_7, window_bounds = array<i64: 1, 1, 4, 128>}]} {
    %cst = arith.constant 0.000000e+00 : f32
    %0 = vector.broadcast %cst : f32 to vector<8x128xf32>
    %c0 = arith.constant 0 : index
    %c0_0 = arith.constant 0 : index
    %1 = vector.load %arg10[%c0, %c0_0] : memref<112x128xf32, #tpu.memory_space<vmem>>, vector<8x128xf32>
    tpu.vector_store %arg10[%c0, %c0_0], %0 {strides = array<i32>} : memref<112x128xf32, #tpu.memory_space<vmem>>, vector<8x128xf32>,
    %c0_1 = arith.constant 0 : index
    %c0_2 = arith.constant 0 : index
    %2 = vector.load %arg2[%c0_1, %c0_2] : memref<16x128xbf16, #tpu.memory_space<vmem>>, vector<16x128xbf16>
    %3 = arith.extf %2 : vector<16x128xbf16> to vector<16x128xf32>
    %c8 = arith.constant 8 : index
    %c0_3 = arith.constant 0 : index
    %4 = vector.load %arg10[%c8, %c0_3] : memref<112x128xf32, #tpu.memory_space<vmem>>, vector<16x128xf32>
    tpu.vector_store %arg10[%c8, %c0_3], %3 {strides = array<i32>} : memref<112x128xf32, #tpu.memory_space<vmem>>, vector<16x128xf32>,
    %c0_4 = arith.constant 0 : index
    %c0_5 = arith.constant 0 : index
    %5 = vector.load %arg3[%c0_4, %c0_5] : memref<64x128xbf16, #tpu.memory_space<vmem>>, vector<64x128xbf16>
    %6 = arith.extf %5 : vector<64x128xbf16> to vector<64x128xf32>
    %c24 = arith.constant 24 : index
    %c0_6 = arith.constant 0 : index
    %7 = vector.load %arg10[%c24, %c0_6] : memref<112x128xf32, #tpu.memory_space<vmem>>, vector<64x128xf32>
    tpu.vector_store %arg10[%c24, %c0_6], %6 {strides = array<i32>} : memref<112x128xf32, #tpu.memory_space<vmem>>, vector<64x128xf32>,
    %c0_7 = arith.constant 0 : index
    %c0_8 = arith.constant 0 : index
    %8 = vector.load %arg4[%c0_7, %c0_8] : memref<16x128xbf16, #tpu.memory_space<vmem>>, vector<16x128xbf16>
    %9 = arith.extf %8 : vector<16x128xbf16> to vector<16x128xf32>
    %c88 = arith.constant 88 : index
    %c0_9 = arith.constant 0 : index
    %10 = vector.load %arg10[%c88, %c0_9] : memref<112x128xf32, #tpu.memory_space<vmem>>, vector<16x128xf32>
    tpu.vector_store %arg10[%c88, %c0_9], %9 {strides = array<i32>} : memref<112x128xf32, #tpu.memory_space<vmem>>, vector<16x128xf32>,
    %c104 = arith.constant 104 : index
    %c0_10 = arith.constant 0 : index
    %11 = vector.load %arg10[%c104, %c0_10] : memref<112x128xf32, #tpu.memory_space<vmem>>, vector<8x128xf32>
    tpu.vector_store %arg10[%c104, %c0_10], %0 {strides = array<i32>} : memref<112x128xf32, #tpu.memory_space<vmem>>, vector<8x128xf32>,
    %12 = tpu.iota {dimensions = array<i32: 0>} : vector<64x1xi32>
    %c16_i32 = arith.constant 16 : i32
    %c0_i32 = arith.constant 0 : i32
    %13 = arith.cmpi eq, %c16_i32, %c0_i32 : i32
    %c1_i32 = arith.constant 1 : i32
    %14 = arith.select %13, %c1_i32, %c16_i32 : i32
    %15 = vector.broadcast %14 : i32 to vector<64x1xi32>
    %16 = arith.remsi %12, %15 : vector<64x1xi32>
    %c0_i32_11 = arith.constant 0 : i32
    %17 = vector.broadcast %c0_i32_11 : i32 to vector<64x1xi32>
    %18 = arith.cmpi ne, %16, %17 : vector<64x1xi32>
    %c0_i32_12 = arith.constant 0 : i32
    %19 = vector.broadcast %c0_i32_12 : i32 to vector<64x1xi32>
    %20 = arith.cmpi slt, %16, %19 : vector<64x1xi32>
    %c0_i32_13 = arith.constant 0 : i32
    %21 = arith.cmpi slt, %14, %c0_i32_13 : i32
    %22 = vector.broadcast %21 : i1 to vector<64x1xi1>
    %23 = vector.broadcast %22 : vector<64x1xi1> to vector<64x1xi1>
    %24 = arith.xori %20, %23 : vector<64x1xi1>
    %25 = arith.andi %24, %18 : vector<64x1xi1>
    %26 = vector.broadcast %14 : i32 to vector<64x1xi32>
    %27 = arith.addi %16, %26 : vector<64x1xi32>
    %28 = arith.select %25, %27, %16 : vector<64x1xi1>, vector<64x1xi32>
    %c0_i32_14 = arith.constant 0 : i32
    %29 = arith.cmpi eq, %arg1, %c0_i32_14 : i32
    %c16_i32_15 = arith.constant 16 : i32
    %30 = vector.broadcast %c16_i32_15 : i32 to vector<64x1xi32>
    %31 = arith.cmpi slt, %12, %30 : vector<64x1xi32>
    %32 = vector.broadcast %29 : i1 to vector<64x1xi1>
    %33 = arith.andi %32, %31 : vector<64x1xi1>
    %c3_i32 = arith.constant 3 : i32
    %34 = arith.cmpi eq, %arg1, %c3_i32 : i32
    %c48_i32 = arith.constant 48 : i32
    %35 = vector.broadcast %c48_i32 : i32 to vector<64x1xi32>
    %36 = arith.cmpi sge, %12, %35 : vector<64x1xi32>
    %37 = vector.broadcast %34 : i1 to vector<64x1xi1>
    %38 = arith.andi %37, %36 : vector<64x1xi1>
    %c0_i32_16 = arith.constant 0 : i32
    %39 = vector.broadcast %c0_i32_16 : i32 to vector<64x1xi32>
    %40 = arith.cmpi eq, %28, %39 : vector<64x1xi32>
    %c15_i32 = arith.constant 15 : i32
    %41 = vector.broadcast %c15_i32 : i32 to vector<64x1xi32>
    %42 = arith.cmpi eq, %28, %41 : vector<64x1xi32>
    %cst_17 = arith.constant 0.000000e+00 : f32
    %43 = vector.broadcast %cst_17 : f32 to vector<64x128xf32>
    %c7 = arith.constant 7 : index
    %c0_18 = arith.constant 0 : index
    %44 = vector.load %arg10[%c7, %c0_18] : memref<112x128xf32, #tpu.memory_space<vmem>>, vector<64x128xf32>
    %45 = arith.ori %33, %40 : vector<64x1xi1>
    %cst_19 = arith.constant 0.000000e+00 : f32
    %46 = vector.shape_cast %45 : vector<64x1xi1> to vector<64x1xi1>
    %47 = vector.broadcast %46 : vector<64x1xi1> to vector<64x128xi1>
    %48 = vector.broadcast %cst_19 : f32 to vector<64x128xf32>
    %49 = arith.select %47, %48, %44 : vector<64x128xi1>, vector<64x128xf32>
    %50 = arith.truncf %49 : vector<64x128xf32> to vector<64x128xbf16>
    %c0_20 = arith.constant 0 : index
    %c0_21 = arith.constant 0 : index
    %51 = vector.load %arg5[%c0_20, %c0_21] : memref<1152x128xbf16, #tpu.memory_space<vmem>>, vector<128x128xbf16>
    %cst_22 = arith.constant dense<0.000000e+00> : vector<64x128xf32>
    %52 = tpu.matmul %50, %51, %cst_22 {dimension_numbers = #tpu.dot_dimension_numbers<[1], [0], [0], [1], [0, 0, 1, 1], [], []>} : vector<64x128xbf16>, vector<128x128xbf16>, vector<64x128xf32> -> vector<64x128xf32>
    %53 = arith.addf %43, %52 : vector<64x128xf32>
    %c8_23 = arith.constant 8 : index
    %c0_24 = arith.constant 0 : index
    %54 = vector.load %arg10[%c8_23, %c0_24] : memref<112x128xf32, #tpu.memory_space<vmem>>, vector<64x128xf32>
    %cst_25 = arith.constant 0.000000e+00 : f32
    %55 = vector.shape_cast %33 : vector<64x1xi1> to vector<64x1xi1>
    %56 = vector.broadcast %55 : vector<64x1xi1> to vector<64x128xi1>
    %57 = vector.broadcast %cst_25 : f32 to vector<64x128xf32>
    %58 = arith.select %56, %57, %54 : vector<64x128xi1>, vector<64x128xf32>
    %59 = arith.truncf %58 : vector<64x128xf32> to vector<64x128xbf16>
    %c128 = arith.constant 128 : index
    %c0_26 = arith.constant 0 : index
    %60 = vector.load %arg5[%c128, %c0_26] : memref<1152x128xbf16, #tpu.memory_space<vmem>>, vector<128x128xbf16>
    %cst_27 = arith.constant dense<0.000000e+00> : vector<64x128xf32>
    %61 = tpu.matmul %59, %60, %cst_27 {dimension_numbers = #tpu.dot_dimension_numbers<[1], [0], [0], [1], [0, 0, 1, 1], [], []>} : vector<64x128xbf16>, vector<128x128xbf16>, vector<64x128xf32> -> vector<64x128xf32>
    %62 = arith.addf %53, %61 : vector<64x128xf32>
    %c9 = arith.constant 9 : index
    %c0_28 = arith.constant 0 : index
    %63 = vector.load %arg10[%c9, %c0_28] : memref<112x128xf32, #tpu.memory_space<vmem>>, vector<64x128xf32>
    %64 = arith.ori %33, %42 : vector<64x1xi1>
    %cst_29 = arith.constant 0.000000e+00 : f32
    %65 = vector.shape_cast %64 : vector<64x1xi1> to vector<64x1xi1>
    %66 = vector.broadcast %65 : vector<64x1xi1> to vector<64x128xi1>
    %67 = vector.broadcast %cst_29 : f32 to vector<64x128xf32>
    %68 = arith.select %66, %67, %63 : vector<64x128xi1>, vector<64x128xf32>
    %69 = arith.truncf %68 : vector<64x128xf32> to vector<64x128xbf16>
    %c256 = arith.constant 256 : index
    %c0_30 = arith.constant 0 : index
    %70 = vector.load %arg5[%c256, %c0_30] : memref<1152x128xbf16, #tpu.memory_space<vmem>>, vector<128x128xbf16>
    %cst_31 = arith.constant dense<0.000000e+00> : vector<64x128xf32>
    %71 = tpu.matmul %69, %70, %cst_31 {dimension_numbers = #tpu.dot_dimension_numbers<[1], [0], [0], [1], [0, 0, 1, 1], [], []>} : vector<64x128xbf16>, vector<128x128xbf16>, vector<64x128xf32> -> vector<64x128xf32>
    %72 = arith.addf %62, %71 : vector<64x128xf32>
    %c23 = arith.constant 23 : index
    %c0_32 = arith.constant 0 : index
    %73 = vector.load %arg10[%c23, %c0_32] : memref<112x128xf32, #tpu.memory_space<vmem>>, vector<64x128xf32>
    %cst_33 = arith.constant 0.000000e+00 : f32
    %74 = vector.shape_cast %40 : vector<64x1xi1> to vector<64x1xi1>
    %75 = vector.broadcast %74 : vector<64x1xi1> to vector<64x128xi1>
    %76 = vector.broadcast %cst_33 : f32 to vector<64x128xf32>
    %77 = arith.select %75, %76, %73 : vector<64x128xi1>, vector<64x128xf32>
    %78 = arith.truncf %77 : vector<64x128xf32> to vector<64x128xbf16>
    %c384 = arith.constant 384 : index
    %c0_34 = arith.constant 0 : index
    %79 = vector.load %arg5[%c384, %c0_34] : memref<1152x128xbf16, #tpu.memory_space<vmem>>, vector<128x128xbf16>
    %cst_35 = arith.constant dense<0.000000e+00> : vector<64x128xf32>
    %80 = tpu.matmul %78, %79, %cst_35 {dimension_numbers = #tpu.dot_dimension_numbers<[1], [0], [0], [1], [0, 0, 1, 1], [], []>} : vector<64x128xbf16>, vector<128x128xbf16>, vector<64x128xf32> -> vector<64x128xf32>
    %81 = arith.addf %72, %80 : vector<64x128xf32>
    %c24_36 = arith.constant 24 : index
    %c0_37 = arith.constant 0 : index
    %82 = vector.load %arg10[%c24_36, %c0_37] : memref<112x128xf32, #tpu.memory_space<vmem>>, vector<64x128xf32>
    %83 = arith.truncf %82 : vector<64x128xf32> to vector<64x128xbf16>
    %c512 = arith.constant 512 : index
    %c0_38 = arith.constant 0 : index
    %84 = vector.load %arg5[%c512, %c0_38] : memref<1152x128xbf16, #tpu.memory_space<vmem>>, vector<128x128xbf16>
    %cst_39 = arith.constant dense<0.000000e+00> : vector<64x128xf32>
    %85 = tpu.matmul %83, %84, %cst_39 {dimension_numbers = #tpu.dot_dimension_numbers<[1], [0], [0], [1], [0, 0, 1, 1], [], []>} : vector<64x128xbf16>, vector<128x128xbf16>, vector<64x128xf32> -> vector<64x128xf32>
    %86 = arith.addf %81, %85 : vector<64x128xf32>
    %c25 = arith.constant 25 : index
    %c0_40 = arith.constant 0 : index
    %87 = vector.load %arg10[%c25, %c0_40] : memref<112x128xf32, #tpu.memory_space<vmem>>, vector<64x128xf32>
    %cst_41 = arith.constant 0.000000e+00 : f32
    %88 = vector.shape_cast %42 : vector<64x1xi1> to vector<64x1xi1>
    %89 = vector.broadcast %88 : vector<64x1xi1> to vector<64x128xi1>
    %90 = vector.broadcast %cst_41 : f32 to vector<64x128xf32>
    %91 = arith.select %89, %90, %87 : vector<64x128xi1>, vector<64x128xf32>
    %92 = arith.truncf %91 : vector<64x128xf32> to vector<64x128xbf16>
    %c640 = arith.constant 640 : index
    %c0_42 = arith.constant 0 : index
    %93 = vector.load %arg5[%c640, %c0_42] : memref<1152x128xbf16, #tpu.memory_space<vmem>>, vector<128x128xbf16>
    %cst_43 = arith.constant dense<0.000000e+00> : vector<64x128xf32>
    %94 = tpu.matmul %92, %93, %cst_43 {dimension_numbers = #tpu.dot_dimension_numbers<[1], [0], [0], [1], [0, 0, 1, 1], [], []>} : vector<64x128xbf16>, vector<128x128xbf16>, vector<64x128xf32> -> vector<64x128xf32>
    %95 = arith.addf %86, %94 : vector<64x128xf32>
    %c39 = arith.constant 39 : index
    %c0_44 = arith.constant 0 : index
    %96 = vector.load %arg10[%c39, %c0_44] : memref<112x128xf32, #tpu.memory_space<vmem>>, vector<64x128xf32>
    %97 = arith.ori %38, %40 : vector<64x1xi1>
    %cst_45 = arith.constant 0.000000e+00 : f32
    %98 = vector.shape_cast %97 : vector<64x1xi1> to vector<64x1xi1>
    %99 = vector.broadcast %98 : vector<64x1xi1> to vector<64x128xi1>
    %100 = vector.broadcast %cst_45 : f32 to vector<64x128xf32>
    %101 = arith.select %99, %100, %96 : vector<64x128xi1>, vector<64x128xf32>
    %102 = arith.truncf %101 : vector<64x128xf32> to vector<64x128xbf16>
    %c768 = arith.constant 768 : index
    %c0_46 = arith.constant 0 : index
    %103 = vector.load %arg5[%c768, %c0_46] : memref<1152x128xbf16, #tpu.memory_space<vmem>>, vector<128x128xbf16>
    %cst_47 = arith.constant dense<0.000000e+00> : vector<64x128xf32>
    %104 = tpu.matmul %102, %103, %cst_47 {dimension_numbers = #tpu.dot_dimension_numbers<[1], [0], [0], [1], [0, 0, 1, 1], [], []>} : vector<64x128xbf16>, vector<128x128xbf16>, vector<64x128xf32> -> vector<64x128xf32>
    %105 = arith.addf %95, %104 : vector<64x128xf32>
    %c40 = arith.constant 40 : index
    %c0_48 = arith.constant 0 : index
    %106 = vector.load %arg10[%c40, %c0_48] : memref<112x128xf32, #tpu.memory_space<vmem>>, vector<64x128xf32>
    %cst_49 = arith.constant 0.000000e+00 : f32
    %107 = vector.shape_cast %38 : vector<64x1xi1> to vector<64x1xi1>
    %108 = vector.broadcast %107 : vector<64x1xi1> to vector<64x128xi1>
    %109 = vector.broadcast %cst_49 : f32 to vector<64x128xf32>
    %110 = arith.select %108, %109, %106 : vector<64x128xi1>, vector<64x128xf32>
    %111 = arith.truncf %110 : vector<64x128xf32> to vector<64x128xbf16>
    %c896 = arith.constant 896 : index
    %c0_50 = arith.constant 0 : index
    %112 = vector.load %arg5[%c896, %c0_50] : memref<1152x128xbf16, #tpu.memory_space<vmem>>, vector<128x128xbf16>
    %cst_51 = arith.constant dense<0.000000e+00> : vector<64x128xf32>
    %113 = tpu.matmul %111, %112, %cst_51 {dimension_numbers = #tpu.dot_dimension_numbers<[1], [0], [0], [1], [0, 0, 1, 1], [], []>} : vector<64x128xbf16>, vector<128x128xbf16>, vector<64x128xf32> -> vector<64x128xf32>
    %114 = arith.addf %105, %113 : vector<64x128xf32>
    %c41 = arith.constant 41 : index
    %c0_52 = arith.constant 0 : index
    %115 = vector.load %arg10[%c41, %c0_52] : memref<112x128xf32, #tpu.memory_space<vmem>>, vector<64x128xf32>
    %116 = arith.ori %38, %42 : vector<64x1xi1>
    %cst_53 = arith.constant 0.000000e+00 : f32
    %117 = vector.shape_cast %116 : vector<64x1xi1> to vector<64x1xi1>
    %118 = vector.broadcast %117 : vector<64x1xi1> to vector<64x128xi1>
    %119 = vector.broadcast %cst_53 : f32 to vector<64x128xf32>
    %120 = arith.select %118, %119, %115 : vector<64x128xi1>, vector<64x128xf32>
    %121 = arith.truncf %120 : vector<64x128xf32> to vector<64x128xbf16>
    %c1024 = arith.constant 1024 : index
    %c0_54 = arith.constant 0 : index
    %122 = vector.load %arg5[%c1024, %c0_54] : memref<1152x128xbf16, #tpu.memory_space<vmem>>, vector<128x128xbf16>
    %cst_55 = arith.constant dense<0.000000e+00> : vector<64x128xf32>
    %123 = tpu.matmul %121, %122, %cst_55 {dimension_numbers = #tpu.dot_dimension_numbers<[1], [0], [0], [1], [0, 0, 1, 1], [], []>} : vector<64x128xbf16>, vector<128x128xbf16>, vector<64x128xf32> -> vector<64x128xf32>
    %124 = arith.addf %114, %123 : vector<64x128xf32>
    %125 = arith.truncf %124 : vector<64x128xf32> to vector<64x128xbf16>
    %c0_56 = arith.constant 0 : index
    %c0_57 = arith.constant 0 : index
    %126 = vector.load %arg7[%c0_56, %c0_57] : memref<64x128xbf16, #tpu.memory_space<vmem>>, vector<64x128xbf16>
    tpu.vector_store %arg7[%c0_56, %c0_57], %125 {strides = array<i32>} : memref<64x128xbf16, #tpu.memory_space<vmem>>, vector<64x128xbf16>,
    %c0_58 = arith.constant 0 : index
    %c0_59 = arith.constant 0 : index
    %127 = vector.load %arg6[%c0_58, %c0_59] : memref<128x128xbf16, #tpu.memory_space<vmem>>, vector<128x128xbf16>
    %cst_60 = arith.constant dense<0.000000e+00> : vector<64x128xf32>
    %128 = tpu.matmul %5, %127, %cst_60 {dimension_numbers = #tpu.dot_dimension_numbers<[1], [0], [0], [1], [0, 0, 1, 1], [], []>} : vector<64x128xbf16>, vector<128x128xbf16>, vector<64x128xf32> -> vector<64x128xf32>
    %c0_61 = arith.constant 0 : index
    %c0_62 = arith.constant 0 : index
    %129 = vector.load %arg8[%c0_61, %c0_62] : memref<64x128xf32, #tpu.memory_space<vmem>>, vector<64x128xf32>
    tpu.vector_store %arg8[%c0_61, %c0_62], %128 {strides = array<i32>} : memref<64x128xf32, #tpu.memory_space<vmem>>, vector<64x128xf32>,
    %cst_63 = arith.constant dense<0.000000e+00> : vector<128xf32>
    %130 = vector.multi_reduction <add>, %124, %cst_63 [0] : vector<64x128xf32> to vector<128xf32>
    %131 = vector.shape_cast %130 : vector<128xf32> to vector<1x128xf32>
    %132 = arith.mulf %124, %124 : vector<64x128xf32>
    %cst_64 = arith.constant dense<0.000000e+00> : vector<128xf32>
    %133 = vector.multi_reduction <add>, %132, %cst_64 [0] : vector<64x128xf32> to vector<128xf32>
    %134 = vector.shape_cast %133 : vector<128xf32> to vector<1x128xf32>
    %cst_65 = arith.constant dense<0.000000e+00> : vector<128xf32>
    %135 = vector.multi_reduction <add>, %128, %cst_65 [0] : vector<64x128xf32> to vector<128xf32>
    %136 = vector.shape_cast %135 : vector<128xf32> to vector<1x128xf32>
    %137 = arith.mulf %128, %128 : vector<64x128xf32>
    %cst_66 = arith.constant dense<0.000000e+00> : vector<128xf32>
    %138 = vector.multi_reduction <add>, %137, %cst_66 [0] : vector<64x128xf32> to vector<128xf32>
    %139 = vector.shape_cast %138 : vector<128xf32> to vector<1x128xf32>
    %140 = tpu.concatenate %131, %134, %136, %139 in 0 : vector<1x128xf32>, vector<1x128xf32>, vector<1x128xf32>, vector<1x128xf32> -> vector<4x128xf32>
    %141 = vector.shape_cast %140 : vector<4x128xf32> to vector<1x1x4x128xf32>
    %c0_67 = arith.constant 0 : index
    %c0_68 = arith.constant 0 : index
    %c0_69 = arith.constant 0 : index
    %c0_70 = arith.constant 0 : index
    %142 = vector.load %arg9[%c0_67, %c0_68, %c0_69, %c0_70] : memref<1x1x4x128xf32, #tpu.memory_space<vmem>>, vector<1x1x4x128xf32>
    tpu.vector_store %arg9[%c0_67, %c0_68, %c0_69, %c0_70], %141 {strides = array<i32>} : memref<1x1x4x128xf32, #tpu.memory_space<vmem>>, vector<1x1x4x128xf32>,
    return
  }
  func.func @transform_0(%arg0: i32, %arg1: i32) -> (i32, i32) {
    %c16_i32 = arith.constant 16 : i32
    %0 = arith.muli %arg0, %c16_i32 : i32
    %c4_i32 = arith.constant 4 : i32
    %1 = arith.muli %arg1, %c4_i32 : i32
    %2 = arith.addi %0, %1 : i32
    %c1_i32 = arith.constant 1 : i32
    %3 = arith.subi %2, %c1_i32 : i32
    %c0_i32 = arith.constant 0 : i32
    %4 = arith.maxsi %3, %c0_i32 : i32
    %c0_i32_0 = arith.constant 0 : i32
    %c0_i32_1 = arith.constant 0 : i32
    return %4, %c0_i32_0 : i32, i32
  }
  func.func @transform_1(%arg0: i32, %arg1: i32) -> (i32, i32) {
    %c4_i32 = arith.constant 4 : i32
    %0 = arith.muli %arg0, %c4_i32 : i32
    %1 = arith.addi %0, %arg1 : i32
    %c0_i32 = arith.constant 0 : i32
    %c0_i32_0 = arith.constant 0 : i32
    return %1, %c0_i32 : i32, i32
  }
  func.func @transform_2(%arg0: i32, %arg1: i32) -> (i32, i32) {
    %c16_i32 = arith.constant 16 : i32
    %0 = arith.muli %arg0, %c16_i32 : i32
    %c1_i32 = arith.constant 1 : i32
    %1 = arith.addi %arg1, %c1_i32 : i32
    %c4_i32 = arith.constant 4 : i32
    %2 = arith.muli %1, %c4_i32 : i32
    %3 = arith.addi %0, %2 : i32
    %c31_i32 = arith.constant 31 : i32
    %4 = arith.minsi %3, %c31_i32 : i32
    %c0_i32 = arith.constant 0 : i32
    %c0_i32_0 = arith.constant 0 : i32
    return %4, %c0_i32 : i32, i32
  }
  func.func @transform_3(%arg0: i32, %arg1: i32) -> (i32, i32) {
    %c0_i32 = arith.constant 0 : i32
    %c0_i32_0 = arith.constant 0 : i32
    %c0_i32_1 = arith.constant 0 : i32
    return %c0_i32, %c0_i32_0 : i32, i32
  }
  func.func @transform_4(%arg0: i32, %arg1: i32) -> (i32, i32) {
    %c0_i32 = arith.constant 0 : i32
    %c0_i32_0 = arith.constant 0 : i32
    %c0_i32_1 = arith.constant 0 : i32
    return %c0_i32, %c0_i32_0 : i32, i32
  }
  func.func @transform_5(%arg0: i32, %arg1: i32) -> (i32, i32) {
    %c4_i32 = arith.constant 4 : i32
    %0 = arith.muli %arg0, %c4_i32 : i32
    %1 = arith.addi %0, %arg1 : i32
    %c0_i32 = arith.constant 0 : i32
    %c0_i32_0 = arith.constant 0 : i32
    return %1, %c0_i32 : i32, i32
  }
  func.func @transform_6(%arg0: i32, %arg1: i32) -> (i32, i32) {
    %c4_i32 = arith.constant 4 : i32
    %0 = arith.muli %arg0, %c4_i32 : i32
    %1 = arith.addi %0, %arg1 : i32
    %c0_i32 = arith.constant 0 : i32
    %c0_i32_0 = arith.constant 0 : i32
    return %1, %c0_i32 : i32, i32
  }
  func.func @transform_7(%arg0: i32, %arg1: i32) -> (i32, i32, i32, i32) {
    %c0_i32 = arith.constant 0 : i32
    %c0_i32_0 = arith.constant 0 : i32
    %c0_i32_1 = arith.constant 0 : i32
    return %arg0, %arg1, %c0_i32, %c0_i32_0 : i32, i32, i32, i32
  }
}

module attributes {stable_mosaic.version = 11 : i64} {
  func.func @pass_b_kernel(%arg0: i32, %arg1: i32, %arg2: memref<16x128xbf16, #tpu.memory_space<vmem>>, %arg3: memref<64x128xbf16, #tpu.memory_space<vmem>>, %arg4: memref<16x128xbf16, #tpu.memory_space<vmem>>, %arg5: memref<1x128xf32, #tpu.memory_space<vmem>>, %arg6: memref<1x128xf32, #tpu.memory_space<vmem>>, %arg7: memref<1152x128xbf16, #tpu.memory_space<vmem>>, %arg8: memref<64x128xf32, #tpu.memory_space<vmem>>, %arg9: memref<1x1x2x128xf32, #tpu.memory_space<vmem>>, %arg10: memref<112x128xf32, #tpu.memory_space<vmem>>) attributes {dimension_semantics = [#tpu.dimension_semantics<parallel>, #tpu.dimension_semantics<parallel>], iteration_bounds = array<i64: 2, 4>, scalar_prefetch = 0 : i64, scratch_operands = 1 : i64, tpu.core_type = #tpu.core_type<tc>, window_params = [{transform_indices = @transform_0, window_bounds = array<i64: 16, 128>}, {transform_indices = @transform_1, window_bounds = array<i64: 64, 128>}, {transform_indices = @transform_2, window_bounds = array<i64: 16, 128>}, {pipeline_mode = #tpu.pipeline_mode<synchronous>, transform_indices = @transform_3, window_bounds = array<i64: 1, 128>}, {pipeline_mode = #tpu.pipeline_mode<synchronous>, transform_indices = @transform_4, window_bounds = array<i64: 1, 128>}, {pipeline_mode = #tpu.pipeline_mode<synchronous>, transform_indices = @transform_5, window_bounds = array<i64: 1152, 128>}, {transform_indices = @transform_6, window_bounds = array<i64: 64, 128>}, {transform_indices = @transform_7, window_bounds = array<i64: 1, 1, 2, 128>}]} {
    %c0 = arith.constant 0 : index
    %c0_0 = arith.constant 0 : index
    %0 = vector.load %arg5[%c0, %c0_0] : memref<1x128xf32, #tpu.memory_space<vmem>>, vector<1x128xf32>
    %c0_1 = arith.constant 0 : index
    %c0_2 = arith.constant 0 : index
    %1 = vector.load %arg6[%c0_1, %c0_2] : memref<1x128xf32, #tpu.memory_space<vmem>>, vector<1x128xf32>
    %cst = arith.constant 0.000000e+00 : f32
    %2 = vector.broadcast %cst : f32 to vector<8x128xf32>
    %c0_3 = arith.constant 0 : index
    %c0_4 = arith.constant 0 : index
    %3 = vector.load %arg10[%c0_3, %c0_4] : memref<112x128xf32, #tpu.memory_space<vmem>>, vector<8x128xf32>
    tpu.vector_store %arg10[%c0_3, %c0_4], %2 {strides = array<i32>} : memref<112x128xf32, #tpu.memory_space<vmem>>, vector<8x128xf32>,
    %c0_5 = arith.constant 0 : index
    %c0_6 = arith.constant 0 : index
    %4 = vector.load %arg2[%c0_5, %c0_6] : memref<16x128xbf16, #tpu.memory_space<vmem>>, vector<16x128xbf16>
    %5 = arith.extf %4 : vector<16x128xbf16> to vector<16x128xf32>
    %6 = vector.broadcast %0 : vector<1x128xf32> to vector<16x128xf32>
    %7 = arith.mulf %5, %6 : vector<16x128xf32>
    %8 = vector.broadcast %1 : vector<1x128xf32> to vector<16x128xf32>
    %9 = arith.addf %7, %8 : vector<16x128xf32>
    %cst_7 = arith.constant 0.000000e+00 : f32
    %10 = vector.broadcast %cst_7 : f32 to vector<16x128xf32>
    %11 = arith.maximumf %9, %10 : vector<16x128xf32>
    %c8 = arith.constant 8 : index
    %c0_8 = arith.constant 0 : index
    %12 = vector.load %arg10[%c8, %c0_8] : memref<112x128xf32, #tpu.memory_space<vmem>>, vector<16x128xf32>
    tpu.vector_store %arg10[%c8, %c0_8], %11 {strides = array<i32>} : memref<112x128xf32, #tpu.memory_space<vmem>>, vector<16x128xf32>,
    %c0_9 = arith.constant 0 : index
    %c0_10 = arith.constant 0 : index
    %13 = vector.load %arg3[%c0_9, %c0_10] : memref<64x128xbf16, #tpu.memory_space<vmem>>, vector<64x128xbf16>
    %14 = arith.extf %13 : vector<64x128xbf16> to vector<64x128xf32>
    %15 = vector.broadcast %0 : vector<1x128xf32> to vector<64x128xf32>
    %16 = arith.mulf %14, %15 : vector<64x128xf32>
    %17 = vector.broadcast %1 : vector<1x128xf32> to vector<64x128xf32>
    %18 = arith.addf %16, %17 : vector<64x128xf32>
    %cst_11 = arith.constant 0.000000e+00 : f32
    %19 = vector.broadcast %cst_11 : f32 to vector<64x128xf32>
    %20 = arith.maximumf %18, %19 : vector<64x128xf32>
    %c24 = arith.constant 24 : index
    %c0_12 = arith.constant 0 : index
    %21 = vector.load %arg10[%c24, %c0_12] : memref<112x128xf32, #tpu.memory_space<vmem>>, vector<64x128xf32>
    tpu.vector_store %arg10[%c24, %c0_12], %20 {strides = array<i32>} : memref<112x128xf32, #tpu.memory_space<vmem>>, vector<64x128xf32>,
    %c0_13 = arith.constant 0 : index
    %c0_14 = arith.constant 0 : index
    %22 = vector.load %arg4[%c0_13, %c0_14] : memref<16x128xbf16, #tpu.memory_space<vmem>>, vector<16x128xbf16>
    %23 = arith.extf %22 : vector<16x128xbf16> to vector<16x128xf32>
    %24 = vector.broadcast %0 : vector<1x128xf32> to vector<16x128xf32>
    %25 = arith.mulf %23, %24 : vector<16x128xf32>
    %26 = vector.broadcast %1 : vector<1x128xf32> to vector<16x128xf32>
    %27 = arith.addf %25, %26 : vector<16x128xf32>
    %cst_15 = arith.constant 0.000000e+00 : f32
    %28 = vector.broadcast %cst_15 : f32 to vector<16x128xf32>
    %29 = arith.maximumf %27, %28 : vector<16x128xf32>
    %c88 = arith.constant 88 : index
    %c0_16 = arith.constant 0 : index
    %30 = vector.load %arg10[%c88, %c0_16] : memref<112x128xf32, #tpu.memory_space<vmem>>, vector<16x128xf32>
    tpu.vector_store %arg10[%c88, %c0_16], %29 {strides = array<i32>} : memref<112x128xf32, #tpu.memory_space<vmem>>, vector<16x128xf32>,
    %c104 = arith.constant 104 : index
    %c0_17 = arith.constant 0 : index
    %31 = vector.load %arg10[%c104, %c0_17] : memref<112x128xf32, #tpu.memory_space<vmem>>, vector<8x128xf32>
    tpu.vector_store %arg10[%c104, %c0_17], %2 {strides = array<i32>} : memref<112x128xf32, #tpu.memory_space<vmem>>, vector<8x128xf32>,
    %32 = tpu.iota {dimensions = array<i32: 0>} : vector<64x1xi32>
    %c16_i32 = arith.constant 16 : i32
    %c0_i32 = arith.constant 0 : i32
    %33 = arith.cmpi eq, %c16_i32, %c0_i32 : i32
    %c1_i32 = arith.constant 1 : i32
    %34 = arith.select %33, %c1_i32, %c16_i32 : i32
    %35 = vector.broadcast %34 : i32 to vector<64x1xi32>
    %36 = arith.remsi %32, %35 : vector<64x1xi32>
    %c0_i32_18 = arith.constant 0 : i32
    %37 = vector.broadcast %c0_i32_18 : i32 to vector<64x1xi32>
    %38 = arith.cmpi ne, %36, %37 : vector<64x1xi32>
    %c0_i32_19 = arith.constant 0 : i32
    %39 = vector.broadcast %c0_i32_19 : i32 to vector<64x1xi32>
    %40 = arith.cmpi slt, %36, %39 : vector<64x1xi32>
    %c0_i32_20 = arith.constant 0 : i32
    %41 = arith.cmpi slt, %34, %c0_i32_20 : i32
    %42 = vector.broadcast %41 : i1 to vector<64x1xi1>
    %43 = vector.broadcast %42 : vector<64x1xi1> to vector<64x1xi1>
    %44 = arith.xori %40, %43 : vector<64x1xi1>
    %45 = arith.andi %44, %38 : vector<64x1xi1>
    %46 = vector.broadcast %34 : i32 to vector<64x1xi32>
    %47 = arith.addi %36, %46 : vector<64x1xi32>
    %48 = arith.select %45, %47, %36 : vector<64x1xi1>, vector<64x1xi32>
    %c0_i32_21 = arith.constant 0 : i32
    %49 = arith.cmpi eq, %arg1, %c0_i32_21 : i32
    %c16_i32_22 = arith.constant 16 : i32
    %50 = vector.broadcast %c16_i32_22 : i32 to vector<64x1xi32>
    %51 = arith.cmpi slt, %32, %50 : vector<64x1xi32>
    %52 = vector.broadcast %49 : i1 to vector<64x1xi1>
    %53 = arith.andi %52, %51 : vector<64x1xi1>
    %c3_i32 = arith.constant 3 : i32
    %54 = arith.cmpi eq, %arg1, %c3_i32 : i32
    %c48_i32 = arith.constant 48 : i32
    %55 = vector.broadcast %c48_i32 : i32 to vector<64x1xi32>
    %56 = arith.cmpi sge, %32, %55 : vector<64x1xi32>
    %57 = vector.broadcast %54 : i1 to vector<64x1xi1>
    %58 = arith.andi %57, %56 : vector<64x1xi1>
    %c0_i32_23 = arith.constant 0 : i32
    %59 = vector.broadcast %c0_i32_23 : i32 to vector<64x1xi32>
    %60 = arith.cmpi eq, %48, %59 : vector<64x1xi32>
    %c15_i32 = arith.constant 15 : i32
    %61 = vector.broadcast %c15_i32 : i32 to vector<64x1xi32>
    %62 = arith.cmpi eq, %48, %61 : vector<64x1xi32>
    %cst_24 = arith.constant 0.000000e+00 : f32
    %63 = vector.broadcast %cst_24 : f32 to vector<64x128xf32>
    %c7 = arith.constant 7 : index
    %c0_25 = arith.constant 0 : index
    %64 = vector.load %arg10[%c7, %c0_25] : memref<112x128xf32, #tpu.memory_space<vmem>>, vector<64x128xf32>
    %65 = arith.ori %53, %60 : vector<64x1xi1>
    %cst_26 = arith.constant 0.000000e+00 : f32
    %66 = vector.shape_cast %65 : vector<64x1xi1> to vector<64x1xi1>
    %67 = vector.broadcast %66 : vector<64x1xi1> to vector<64x128xi1>
    %68 = vector.broadcast %cst_26 : f32 to vector<64x128xf32>
    %69 = arith.select %67, %68, %64 : vector<64x128xi1>, vector<64x128xf32>
    %70 = arith.truncf %69 : vector<64x128xf32> to vector<64x128xbf16>
    %c0_27 = arith.constant 0 : index
    %c0_28 = arith.constant 0 : index
    %71 = vector.load %arg7[%c0_27, %c0_28] : memref<1152x128xbf16, #tpu.memory_space<vmem>>, vector<128x128xbf16>
    %cst_29 = arith.constant dense<0.000000e+00> : vector<64x128xf32>
    %72 = tpu.matmul %70, %71, %cst_29 {dimension_numbers = #tpu.dot_dimension_numbers<[1], [0], [0], [1], [0, 0, 1, 1], [], []>} : vector<64x128xbf16>, vector<128x128xbf16>, vector<64x128xf32> -> vector<64x128xf32>
    %73 = arith.addf %63, %72 : vector<64x128xf32>
    %c8_30 = arith.constant 8 : index
    %c0_31 = arith.constant 0 : index
    %74 = vector.load %arg10[%c8_30, %c0_31] : memref<112x128xf32, #tpu.memory_space<vmem>>, vector<64x128xf32>
    %cst_32 = arith.constant 0.000000e+00 : f32
    %75 = vector.shape_cast %53 : vector<64x1xi1> to vector<64x1xi1>
    %76 = vector.broadcast %75 : vector<64x1xi1> to vector<64x128xi1>
    %77 = vector.broadcast %cst_32 : f32 to vector<64x128xf32>
    %78 = arith.select %76, %77, %74 : vector<64x128xi1>, vector<64x128xf32>
    %79 = arith.truncf %78 : vector<64x128xf32> to vector<64x128xbf16>
    %c128 = arith.constant 128 : index
    %c0_33 = arith.constant 0 : index
    %80 = vector.load %arg7[%c128, %c0_33] : memref<1152x128xbf16, #tpu.memory_space<vmem>>, vector<128x128xbf16>
    %cst_34 = arith.constant dense<0.000000e+00> : vector<64x128xf32>
    %81 = tpu.matmul %79, %80, %cst_34 {dimension_numbers = #tpu.dot_dimension_numbers<[1], [0], [0], [1], [0, 0, 1, 1], [], []>} : vector<64x128xbf16>, vector<128x128xbf16>, vector<64x128xf32> -> vector<64x128xf32>
    %82 = arith.addf %73, %81 : vector<64x128xf32>
    %c9 = arith.constant 9 : index
    %c0_35 = arith.constant 0 : index
    %83 = vector.load %arg10[%c9, %c0_35] : memref<112x128xf32, #tpu.memory_space<vmem>>, vector<64x128xf32>
    %84 = arith.ori %53, %62 : vector<64x1xi1>
    %cst_36 = arith.constant 0.000000e+00 : f32
    %85 = vector.shape_cast %84 : vector<64x1xi1> to vector<64x1xi1>
    %86 = vector.broadcast %85 : vector<64x1xi1> to vector<64x128xi1>
    %87 = vector.broadcast %cst_36 : f32 to vector<64x128xf32>
    %88 = arith.select %86, %87, %83 : vector<64x128xi1>, vector<64x128xf32>
    %89 = arith.truncf %88 : vector<64x128xf32> to vector<64x128xbf16>
    %c256 = arith.constant 256 : index
    %c0_37 = arith.constant 0 : index
    %90 = vector.load %arg7[%c256, %c0_37] : memref<1152x128xbf16, #tpu.memory_space<vmem>>, vector<128x128xbf16>
    %cst_38 = arith.constant dense<0.000000e+00> : vector<64x128xf32>
    %91 = tpu.matmul %89, %90, %cst_38 {dimension_numbers = #tpu.dot_dimension_numbers<[1], [0], [0], [1], [0, 0, 1, 1], [], []>} : vector<64x128xbf16>, vector<128x128xbf16>, vector<64x128xf32> -> vector<64x128xf32>
    %92 = arith.addf %82, %91 : vector<64x128xf32>
    %c23 = arith.constant 23 : index
    %c0_39 = arith.constant 0 : index
    %93 = vector.load %arg10[%c23, %c0_39] : memref<112x128xf32, #tpu.memory_space<vmem>>, vector<64x128xf32>
    %cst_40 = arith.constant 0.000000e+00 : f32
    %94 = vector.shape_cast %60 : vector<64x1xi1> to vector<64x1xi1>
    %95 = vector.broadcast %94 : vector<64x1xi1> to vector<64x128xi1>
    %96 = vector.broadcast %cst_40 : f32 to vector<64x128xf32>
    %97 = arith.select %95, %96, %93 : vector<64x128xi1>, vector<64x128xf32>
    %98 = arith.truncf %97 : vector<64x128xf32> to vector<64x128xbf16>
    %c384 = arith.constant 384 : index
    %c0_41 = arith.constant 0 : index
    %99 = vector.load %arg7[%c384, %c0_41] : memref<1152x128xbf16, #tpu.memory_space<vmem>>, vector<128x128xbf16>
    %cst_42 = arith.constant dense<0.000000e+00> : vector<64x128xf32>
    %100 = tpu.matmul %98, %99, %cst_42 {dimension_numbers = #tpu.dot_dimension_numbers<[1], [0], [0], [1], [0, 0, 1, 1], [], []>} : vector<64x128xbf16>, vector<128x128xbf16>, vector<64x128xf32> -> vector<64x128xf32>
    %101 = arith.addf %92, %100 : vector<64x128xf32>
    %c24_43 = arith.constant 24 : index
    %c0_44 = arith.constant 0 : index
    %102 = vector.load %arg10[%c24_43, %c0_44] : memref<112x128xf32, #tpu.memory_space<vmem>>, vector<64x128xf32>
    %103 = arith.truncf %102 : vector<64x128xf32> to vector<64x128xbf16>
    %c512 = arith.constant 512 : index
    %c0_45 = arith.constant 0 : index
    %104 = vector.load %arg7[%c512, %c0_45] : memref<1152x128xbf16, #tpu.memory_space<vmem>>, vector<128x128xbf16>
    %cst_46 = arith.constant dense<0.000000e+00> : vector<64x128xf32>
    %105 = tpu.matmul %103, %104, %cst_46 {dimension_numbers = #tpu.dot_dimension_numbers<[1], [0], [0], [1], [0, 0, 1, 1], [], []>} : vector<64x128xbf16>, vector<128x128xbf16>, vector<64x128xf32> -> vector<64x128xf32>
    %106 = arith.addf %101, %105 : vector<64x128xf32>
    %c25 = arith.constant 25 : index
    %c0_47 = arith.constant 0 : index
    %107 = vector.load %arg10[%c25, %c0_47] : memref<112x128xf32, #tpu.memory_space<vmem>>, vector<64x128xf32>
    %cst_48 = arith.constant 0.000000e+00 : f32
    %108 = vector.shape_cast %62 : vector<64x1xi1> to vector<64x1xi1>
    %109 = vector.broadcast %108 : vector<64x1xi1> to vector<64x128xi1>
    %110 = vector.broadcast %cst_48 : f32 to vector<64x128xf32>
    %111 = arith.select %109, %110, %107 : vector<64x128xi1>, vector<64x128xf32>
    %112 = arith.truncf %111 : vector<64x128xf32> to vector<64x128xbf16>
    %c640 = arith.constant 640 : index
    %c0_49 = arith.constant 0 : index
    %113 = vector.load %arg7[%c640, %c0_49] : memref<1152x128xbf16, #tpu.memory_space<vmem>>, vector<128x128xbf16>
    %cst_50 = arith.constant dense<0.000000e+00> : vector<64x128xf32>
    %114 = tpu.matmul %112, %113, %cst_50 {dimension_numbers = #tpu.dot_dimension_numbers<[1], [0], [0], [1], [0, 0, 1, 1], [], []>} : vector<64x128xbf16>, vector<128x128xbf16>, vector<64x128xf32> -> vector<64x128xf32>
    %115 = arith.addf %106, %114 : vector<64x128xf32>
    %c39 = arith.constant 39 : index
    %c0_51 = arith.constant 0 : index
    %116 = vector.load %arg10[%c39, %c0_51] : memref<112x128xf32, #tpu.memory_space<vmem>>, vector<64x128xf32>
    %117 = arith.ori %58, %60 : vector<64x1xi1>
    %cst_52 = arith.constant 0.000000e+00 : f32
    %118 = vector.shape_cast %117 : vector<64x1xi1> to vector<64x1xi1>
    %119 = vector.broadcast %118 : vector<64x1xi1> to vector<64x128xi1>
    %120 = vector.broadcast %cst_52 : f32 to vector<64x128xf32>
    %121 = arith.select %119, %120, %116 : vector<64x128xi1>, vector<64x128xf32>
    %122 = arith.truncf %121 : vector<64x128xf32> to vector<64x128xbf16>
    %c768 = arith.constant 768 : index
    %c0_53 = arith.constant 0 : index
    %123 = vector.load %arg7[%c768, %c0_53] : memref<1152x128xbf16, #tpu.memory_space<vmem>>, vector<128x128xbf16>
    %cst_54 = arith.constant dense<0.000000e+00> : vector<64x128xf32>
    %124 = tpu.matmul %122, %123, %cst_54 {dimension_numbers = #tpu.dot_dimension_numbers<[1], [0], [0], [1], [0, 0, 1, 1], [], []>} : vector<64x128xbf16>, vector<128x128xbf16>, vector<64x128xf32> -> vector<64x128xf32>
    %125 = arith.addf %115, %124 : vector<64x128xf32>
    %c40 = arith.constant 40 : index
    %c0_55 = arith.constant 0 : index
    %126 = vector.load %arg10[%c40, %c0_55] : memref<112x128xf32, #tpu.memory_space<vmem>>, vector<64x128xf32>
    %cst_56 = arith.constant 0.000000e+00 : f32
    %127 = vector.shape_cast %58 : vector<64x1xi1> to vector<64x1xi1>
    %128 = vector.broadcast %127 : vector<64x1xi1> to vector<64x128xi1>
    %129 = vector.broadcast %cst_56 : f32 to vector<64x128xf32>
    %130 = arith.select %128, %129, %126 : vector<64x128xi1>, vector<64x128xf32>
    %131 = arith.truncf %130 : vector<64x128xf32> to vector<64x128xbf16>
    %c896 = arith.constant 896 : index
    %c0_57 = arith.constant 0 : index
    %132 = vector.load %arg7[%c896, %c0_57] : memref<1152x128xbf16, #tpu.memory_space<vmem>>, vector<128x128xbf16>
    %cst_58 = arith.constant dense<0.000000e+00> : vector<64x128xf32>
    %133 = tpu.matmul %131, %132, %cst_58 {dimension_numbers = #tpu.dot_dimension_numbers<[1], [0], [0], [1], [0, 0, 1, 1], [], []>} : vector<64x128xbf16>, vector<128x128xbf16>, vector<64x128xf32> -> vector<64x128xf32>
    %134 = arith.addf %125, %133 : vector<64x128xf32>
    %c41 = arith.constant 41 : index
    %c0_59 = arith.constant 0 : index
    %135 = vector.load %arg10[%c41, %c0_59] : memref<112x128xf32, #tpu.memory_space<vmem>>, vector<64x128xf32>
    %136 = arith.ori %58, %62 : vector<64x1xi1>
    %cst_60 = arith.constant 0.000000e+00 : f32
    %137 = vector.shape_cast %136 : vector<64x1xi1> to vector<64x1xi1>
    %138 = vector.broadcast %137 : vector<64x1xi1> to vector<64x128xi1>
    %139 = vector.broadcast %cst_60 : f32 to vector<64x128xf32>
    %140 = arith.select %138, %139, %135 : vector<64x128xi1>, vector<64x128xf32>
    %141 = arith.truncf %140 : vector<64x128xf32> to vector<64x128xbf16>
    %c1024 = arith.constant 1024 : index
    %c0_61 = arith.constant 0 : index
    %142 = vector.load %arg7[%c1024, %c0_61] : memref<1152x128xbf16, #tpu.memory_space<vmem>>, vector<128x128xbf16>
    %cst_62 = arith.constant dense<0.000000e+00> : vector<64x128xf32>
    %143 = tpu.matmul %141, %142, %cst_62 {dimension_numbers = #tpu.dot_dimension_numbers<[1], [0], [0], [1], [0, 0, 1, 1], [], []>} : vector<64x128xbf16>, vector<128x128xbf16>, vector<64x128xf32> -> vector<64x128xf32>
    %144 = arith.addf %134, %143 : vector<64x128xf32>
    %c0_63 = arith.constant 0 : index
    %c0_64 = arith.constant 0 : index
    %145 = vector.load %arg8[%c0_63, %c0_64] : memref<64x128xf32, #tpu.memory_space<vmem>>, vector<64x128xf32>
    tpu.vector_store %arg8[%c0_63, %c0_64], %144 {strides = array<i32>} : memref<64x128xf32, #tpu.memory_space<vmem>>, vector<64x128xf32>,
    %cst_65 = arith.constant dense<0.000000e+00> : vector<128xf32>
    %146 = vector.multi_reduction <add>, %144, %cst_65 [0] : vector<64x128xf32> to vector<128xf32>
    %147 = vector.shape_cast %146 : vector<128xf32> to vector<1x128xf32>
    %148 = arith.mulf %144, %144 : vector<64x128xf32>
    %cst_66 = arith.constant dense<0.000000e+00> : vector<128xf32>
    %149 = vector.multi_reduction <add>, %148, %cst_66 [0] : vector<64x128xf32> to vector<128xf32>
    %150 = vector.shape_cast %149 : vector<128xf32> to vector<1x128xf32>
    %151 = tpu.concatenate %147, %150 in 0 : vector<1x128xf32>, vector<1x128xf32> -> vector<2x128xf32>
    %152 = vector.shape_cast %151 : vector<2x128xf32> to vector<1x1x2x128xf32>
    %c0_67 = arith.constant 0 : index
    %c0_68 = arith.constant 0 : index
    %c0_69 = arith.constant 0 : index
    %c0_70 = arith.constant 0 : index
    %153 = vector.load %arg9[%c0_67, %c0_68, %c0_69, %c0_70] : memref<1x1x2x128xf32, #tpu.memory_space<vmem>>, vector<1x1x2x128xf32>
    tpu.vector_store %arg9[%c0_67, %c0_68, %c0_69, %c0_70], %152 {strides = array<i32>} : memref<1x1x2x128xf32, #tpu.memory_space<vmem>>, vector<1x1x2x128xf32>,
    return
  }
  func.func @transform_0(%arg0: i32, %arg1: i32) -> (i32, i32) {
    %c16_i32 = arith.constant 16 : i32
    %0 = arith.muli %arg0, %c16_i32 : i32
    %c4_i32 = arith.constant 4 : i32
    %1 = arith.muli %arg1, %c4_i32 : i32
    %2 = arith.addi %0, %1 : i32
    %c1_i32 = arith.constant 1 : i32
    %3 = arith.subi %2, %c1_i32 : i32
    %c0_i32 = arith.constant 0 : i32
    %4 = arith.maxsi %3, %c0_i32 : i32
    %c0_i32_0 = arith.constant 0 : i32
    %c0_i32_1 = arith.constant 0 : i32
    return %4, %c0_i32_0 : i32, i32
  }
  func.func @transform_1(%arg0: i32, %arg1: i32) -> (i32, i32) {
    %c4_i32 = arith.constant 4 : i32
    %0 = arith.muli %arg0, %c4_i32 : i32
    %1 = arith.addi %0, %arg1 : i32
    %c0_i32 = arith.constant 0 : i32
    %c0_i32_0 = arith.constant 0 : i32
    return %1, %c0_i32 : i32, i32
  }
  func.func @transform_2(%arg0: i32, %arg1: i32) -> (i32, i32) {
    %c16_i32 = arith.constant 16 : i32
    %0 = arith.muli %arg0, %c16_i32 : i32
    %c1_i32 = arith.constant 1 : i32
    %1 = arith.addi %arg1, %c1_i32 : i32
    %c4_i32 = arith.constant 4 : i32
    %2 = arith.muli %1, %c4_i32 : i32
    %3 = arith.addi %0, %2 : i32
    %c31_i32 = arith.constant 31 : i32
    %4 = arith.minsi %3, %c31_i32 : i32
    %c0_i32 = arith.constant 0 : i32
    %c0_i32_0 = arith.constant 0 : i32
    return %4, %c0_i32 : i32, i32
  }
  func.func @transform_3(%arg0: i32, %arg1: i32) -> (i32, i32) {
    %c0_i32 = arith.constant 0 : i32
    %c0_i32_0 = arith.constant 0 : i32
    %c0_i32_1 = arith.constant 0 : i32
    return %c0_i32, %c0_i32_0 : i32, i32
  }
  func.func @transform_4(%arg0: i32, %arg1: i32) -> (i32, i32) {
    %c0_i32 = arith.constant 0 : i32
    %c0_i32_0 = arith.constant 0 : i32
    %c0_i32_1 = arith.constant 0 : i32
    return %c0_i32, %c0_i32_0 : i32, i32
  }
  func.func @transform_5(%arg0: i32, %arg1: i32) -> (i32, i32) {
    %c0_i32 = arith.constant 0 : i32
    %c0_i32_0 = arith.constant 0 : i32
    %c0_i32_1 = arith.constant 0 : i32
    return %c0_i32, %c0_i32_0 : i32, i32
  }
  func.func @transform_6(%arg0: i32, %arg1: i32) -> (i32, i32) {
    %c4_i32 = arith.constant 4 : i32
    %0 = arith.muli %arg0, %c4_i32 : i32
    %1 = arith.addi %0, %arg1 : i32
    %c0_i32 = arith.constant 0 : i32
    %c0_i32_0 = arith.constant 0 : i32
    return %1, %c0_i32 : i32, i32
  }
  func.func @transform_7(%arg0: i32, %arg1: i32) -> (i32, i32, i32, i32) {
    %c0_i32 = arith.constant 0 : i32
    %c0_i32_0 = arith.constant 0 : i32
    %c0_i32_1 = arith.constant 0 : i32
    return %arg0, %arg1, %c0_i32, %c0_i32_0 : i32, i32, i32, i32
  }
}

module attributes {stable_mosaic.version = 11 : i64} {
  func.func @pass_c_kernel(%arg0: i32, %arg1: memref<64x128xf32, #tpu.memory_space<vmem>>, %arg2: memref<64x128xf32, #tpu.memory_space<vmem>>, %arg3: memref<1x128xf32, #tpu.memory_space<vmem>>, %arg4: memref<1x128xf32, #tpu.memory_space<vmem>>, %arg5: memref<1x128xf32, #tpu.memory_space<vmem>>, %arg6: memref<1x128xf32, #tpu.memory_space<vmem>>, %arg7: memref<64x128xf32, #tpu.memory_space<vmem>>) attributes {dimension_semantics = [#tpu.dimension_semantics<parallel>], iteration_bounds = array<i64: 8>, scalar_prefetch = 0 : i64, scratch_operands = 0 : i64, tpu.core_type = #tpu.core_type<tc>, window_params = [{transform_indices = @transform_0, window_bounds = array<i64: 64, 128>}, {transform_indices = @transform_1, window_bounds = array<i64: 64, 128>}, {pipeline_mode = #tpu.pipeline_mode<synchronous>, transform_indices = @transform_2, window_bounds = array<i64: 1, 128>}, {pipeline_mode = #tpu.pipeline_mode<synchronous>, transform_indices = @transform_3, window_bounds = array<i64: 1, 128>}, {pipeline_mode = #tpu.pipeline_mode<synchronous>, transform_indices = @transform_4, window_bounds = array<i64: 1, 128>}, {pipeline_mode = #tpu.pipeline_mode<synchronous>, transform_indices = @transform_5, window_bounds = array<i64: 1, 128>}, {transform_indices = @transform_6, window_bounds = array<i64: 64, 128>}]} {
    %c0 = arith.constant 0 : index
    %c0_0 = arith.constant 0 : index
    %0 = vector.load %arg1[%c0, %c0_0] : memref<64x128xf32, #tpu.memory_space<vmem>>, vector<64x128xf32>
    %c0_1 = arith.constant 0 : index
    %c0_2 = arith.constant 0 : index
    %1 = vector.load %arg3[%c0_1, %c0_2] : memref<1x128xf32, #tpu.memory_space<vmem>>, vector<1x128xf32>
    %2 = vector.broadcast %1 : vector<1x128xf32> to vector<64x128xf32>
    %3 = arith.mulf %0, %2 : vector<64x128xf32>
    %c0_3 = arith.constant 0 : index
    %c0_4 = arith.constant 0 : index
    %4 = vector.load %arg4[%c0_3, %c0_4] : memref<1x128xf32, #tpu.memory_space<vmem>>, vector<1x128xf32>
    %5 = vector.broadcast %4 : vector<1x128xf32> to vector<64x128xf32>
    %6 = arith.addf %3, %5 : vector<64x128xf32>
    %cst = arith.constant 0.000000e+00 : f32
    %7 = vector.broadcast %cst : f32 to vector<64x128xf32>
    %8 = arith.maximumf %6, %7 : vector<64x128xf32>
    %c0_5 = arith.constant 0 : index
    %c0_6 = arith.constant 0 : index
    %9 = vector.load %arg2[%c0_5, %c0_6] : memref<64x128xf32, #tpu.memory_space<vmem>>, vector<64x128xf32>
    %c0_7 = arith.constant 0 : index
    %c0_8 = arith.constant 0 : index
    %10 = vector.load %arg5[%c0_7, %c0_8] : memref<1x128xf32, #tpu.memory_space<vmem>>, vector<1x128xf32>
    %11 = vector.broadcast %10 : vector<1x128xf32> to vector<64x128xf32>
    %12 = arith.mulf %9, %11 : vector<64x128xf32>
    %c0_9 = arith.constant 0 : index
    %c0_10 = arith.constant 0 : index
    %13 = vector.load %arg6[%c0_9, %c0_10] : memref<1x128xf32, #tpu.memory_space<vmem>>, vector<1x128xf32>
    %14 = vector.broadcast %13 : vector<1x128xf32> to vector<64x128xf32>
    %15 = arith.addf %12, %14 : vector<64x128xf32>
    %16 = arith.addf %8, %15 : vector<64x128xf32>
    %cst_11 = arith.constant 0.000000e+00 : f32
    %17 = vector.broadcast %cst_11 : f32 to vector<64x128xf32>
    %18 = arith.maximumf %16, %17 : vector<64x128xf32>
    %c0_12 = arith.constant 0 : index
    %c0_13 = arith.constant 0 : index
    %19 = vector.load %arg7[%c0_12, %c0_13] : memref<64x128xf32, #tpu.memory_space<vmem>>, vector<64x128xf32>
    tpu.vector_store %arg7[%c0_12, %c0_13], %18 {strides = array<i32>} : memref<64x128xf32, #tpu.memory_space<vmem>>, vector<64x128xf32>,
    return
  }
  func.func @transform_0(%arg0: i32) -> (i32, i32) {
    %c0_i32 = arith.constant 0 : i32
    %c0_i32_0 = arith.constant 0 : i32
    return %arg0, %c0_i32 : i32, i32
  }
  func.func @transform_1(%arg0: i32) -> (i32, i32) {
    %c0_i32 = arith.constant 0 : i32
    %c0_i32_0 = arith.constant 0 : i32
    return %arg0, %c0_i32 : i32, i32
  }
  func.func @transform_2(%arg0: i32) -> (i32, i32) {
    %c0_i32 = arith.constant 0 : i32
    %c0_i32_0 = arith.constant 0 : i32
    %c0_i32_1 = arith.constant 0 : i32
    return %c0_i32, %c0_i32_0 : i32, i32
  }
  func.func @transform_3(%arg0: i32) -> (i32, i32) {
    %c0_i32 = arith.constant 0 : i32
    %c0_i32_0 = arith.constant 0 : i32
    %c0_i32_1 = arith.constant 0 : i32
    return %c0_i32, %c0_i32_0 : i32, i32
  }
  func.func @transform_4(%arg0: i32) -> (i32, i32) {
    %c0_i32 = arith.constant 0 : i32
    %c0_i32_0 = arith.constant 0 : i32
    %c0_i32_1 = arith.constant 0 : i32
    return %c0_i32, %c0_i32_0 : i32, i32
  }
  func.func @transform_5(%arg0: i32) -> (i32, i32) {
    %c0_i32 = arith.constant 0 : i32
    %c0_i32_0 = arith.constant 0 : i32
    %c0_i32_1 = arith.constant 0 : i32
    return %c0_i32, %c0_i32_0 : i32, i32
  }
  func.func @transform_6(%arg0: i32) -> (i32, i32) {
    %c0_i32 = arith.constant 0 : i32
    %c0_i32_0 = arith.constant 0 : i32
    return %arg0, %c0_i32 : i32, i32
  }
}

</mosaic_0001>

<bundles_post_ra>
// kernel: resblock_forward.5
= control target key start
LH: loop header
LB: loop body
LE: loop exit
PB: predicated region body
PF: predicated region fallthrough
CT: control target
= control target key end

     0   :  { %11 = vsyncpa [#allocation3], 0  ;;  %s814_s0 = inlined_call_operand.vmem [shape: f32[512,128], index: 0, kind: input, shape index: {}]   ;;  %s815_s1 = inlined_call_operand.vmem [shape: f32[512,128], index: 1, kind: input, shape index: {}]   ;;  %s816_s2 = inlined_call_operand.vmem [shape: f32[1,128], index: 2, kind: input, shape index: {}]   ;;  %s817_s3 = inlined_call_operand.vmem [shape: f32[1,128], index: 3, kind: input, shape index: {}]   ;;  %s818_s4 = inlined_call_operand.vmem [shape: f32[1,128], index: 4, kind: input, shape index: {}]   ;;  %s819_s5 = inlined_call_operand.vmem [shape: f32[1,128], index: 5, kind: input, shape index: {}]   ;;  %s820_s6 = inlined_call_operand.hbm [shape: f32[512,128], index: 6, kind: output, shape index: {}]  }
   0x1   :  { %13 = vsyncpa [#allocation3 + $0x1], 0  ;;  %s633_s21 = smov 0   ;;  %s635_s22 = smov 0  }
   0x2   :  { %s637_s23 = smov 0   ;;  %s639_s24 = smov 0  }
   0x3 LB: > { %s654_s25 = sadd.s32 4294967295, %s593_s24   ;;  %s471_s26 = sadd.s32 4294967294, %s593_s24   ;;  %s593_s24 = sphi %s639_s24, %s826_s24   ;;  %s589_s23 = sphi %s637_s23, %s825_s23   ;;  %s585_s22 = sphi %s635_s22, %s824_s22   ;;  %s581_s21 = sphi %s633_s21, %s823_s21  }
   0x4   : > { %s658_s27 = sadd.s32 1, %s593_s24   ;;  %s162_s28 = sadd.s32 1, %s589_s23 }
   0x5   : > { %s159_s29 = ssub.s32 %s593_s24, %s658_s27  ;;  %p172_p0 = scmp.ne.s32.totalorder %s589_s23, %s585_s22 }
   0x6   : > { %p160_p1 = scmp.eq.s32.totalorder %s159_s29, 0  ;;  %p173_p2 = scmp.eq.s32.totalorder %s654_s25, 7 }
   0x7   : > { %p178_p3 = scmp.ne.s32.totalorder %s585_s22, %s581_s21  ;;  %p179_p4 = scmp.eq.s32.totalorder %s471_s26, 7 }
   0x8   : > { %s669_s30 = scalar_select %p160_p1, %s589_s23, %s162_s28  }
   0x9   : > { %p671_p5 = por %p173_p2, %p172_p0  ;;  %p675_p6 = por %p179_p4, %p178_p3 }
   0xa   : > { %p474_p7 = scmp.ge.s32.totalorder %s593_s24, 1  ;;  %p227_p8 = scmp.lt.s32.totalorder %s593_s24, 9 }
   0xc   : > { %p228_p9 = pnand %p474_p7, %p227_p8 }
   0xd   : > { %s476_s9 = sshll.u32 (!%p228_p9), %s654_s25, 3  ;;  %v685_v0 = vld [vmem:[%s816_s2] ss:$0 sm:$0xff] (!%p228_p9)  ;;  %s489_s14 = sshll.u32 (!%p228_p9), %s654_s25, 10 }
   0xe   : > { %231 = sbr.rel (%p228_p9) target bundleno = 60 (0x3c), region = 44  ;;  %p263_p10 = scmp.lt.s32.totalorder (!%p228_p9), %s476_s9, 63  ;;  %v690_v1 = vld [vmem:[%s818_s4] ss:$0 sm:$0xff] (!%p228_p9) }
   0xf   : > { %v705_v2 = vld [vmem:[%s817_s3] ss:$0 sm:$0xff] (!%p228_p9)  ;;  %s595_s19 = smov (!%p228_p9), [#allocation2]  }
  0x10   : > { %v710_v3 = vld [vmem:[%s819_s5] ss:$0 sm:$0xff] (!%p228_p9) }
  0x15   : > { %s828_s9 = smov (!%p263_p10, %s476_s9), 63 }
  0x16   : > { %s477_s10 = sshll.u32 %s828_s9, 3 }
  0x17   : > { %s695_s17 = scalar_lea.vmem %s814_s0, %s477_s10  ;;  %s700_s20 = scalar_lea.vmem %s815_s1, %s477_s10 }
  0x18   : > { %v275_v4 = vld [vmem:[%s695_s17] sm:$0xff]  ;;  %v276_v6 = vld [vmem:[%s695_s17 + $0x8] sm:$0xff]  ;;  %v277_v11 = vld [vmem:[%s695_s17 + $0x10] sm:$0xff]  ;;  %s259_s10 = sand.u32 1, %s585_s22  }
  0x19   : > { %v321_v5 = vld [vmem:[%s700_s20] sm:$0xff]  ;;  %v290_v7 = vmul.f32 %v685_v0, %v275_v4  ;;  %v291_v9 = vmul.f32 %v685_v0, %v276_v6  ;;  %v322_v10 = vld [vmem:[%s700_s20 + $0x8] sm:$0xff]  ;;  %v323_v12 = vld [vmem:[%s700_s20 + $0x10] sm:$0xff]  ;;  %v292_v14 = vmul.f32 %v685_v0, %v277_v11  ;;  %s475_s11 = sshll.u32 %s259_s10, 6  ;;  %s773_s18 = scalar_lea.sflag [#allocation3], %s259_s10 }
  0x1a   : > { %v336_v8 = vmul.f32 %v690_v1, %v321_v5  ;;  %v337_v13 = vmul.f32 %v690_v1, %v322_v10  ;;  %v338_v15 = vmul.f32 %v690_v1, %v323_v12  ;;  %v278_v16 = vld [vmem:[%s695_s17 + $0x18] sm:$0xff]  ;;  %v279_v18 = vld [vmem:[%s695_s17 + $0x20] sm:$0xff]  ;;  %v280_v24 = vld [vmem:[%s695_s17 + $0x28] sm:$0xff]  ;;  %s261_s12 = scalar_lea.vmem [#allocation2], %s475_s11 }
  0x1b   : > { %v324_v17 = vld [vmem:[%s700_s20 + $0x18] sm:$0xff]  ;;  %v305_v19 = vadd.f32 %v705_v2, %v290_v7  ;;  %v306_v21 = vadd.f32 %v705_v2, %v291_v9  ;;  %v293_v22 = vmul.f32 %v685_v0, %v278_v16  ;;  %v325_v23 = vld [vmem:[%s700_s20 + $0x20] sm:$0xff]  ;;  %v307_v26 = vadd.f32 %v705_v2, %v292_v14  ;;  %v326_v33 = vld [vmem:[%s700_s20 + $0x28] sm:$0xff]  ;;  %s397_s13 = sshll.u32 %s261_s12, 4  ;;  %s764_s13 = int_to_ptr.vmem [resolvable:$true] %s397_s13 }
  0x1c   : > { %v351_v20 = vadd.f32 %v710_v3, %v336_v8  ;;  %v352_v25 = vadd.f32 %v710_v3, %v337_v13  ;;  %v353_v27 = vadd.f32 %v710_v3, %v338_v15  ;;  %v339_v28 = vmul.f32 %v690_v1, %v324_v17  ;;  %v281_v42 = vld [vmem:[%s695_s17 + $0x30] sm:$0xff]  ;;  %v282_v48 = vld [vmem:[%s695_s17 + $0x38] sm:$0xff]  ;;  %s769_s17 = scalar_lea.hbm %s820_s6, %s489_s14  ;;  %s531_s25 = scalar_lea.vmem %s764_s13, 1024 }
  0x1d   : > { %v313_v29 = vmax.f32 %v305_v19, 0.0  ;;  %v314_v30 = vmax.f32 %v306_v21, 0.0  ;;  %v308_v31 = vadd.f32 %v705_v2, %v293_v22  ;;  %v294_v32 = vmul.f32 %v685_v0, %v279_v18  ;;  %v327_v47 = vld [vmem:[%s700_s20 + $0x30] sm:$0xff]  ;;  %v328_v53 = vld [vmem:[%s700_s20 + $0x38] sm:$0xff]  ;;  %p532_p11 = scmp.ne.s32.totalorder %s764_s13, %s531_s25  ;;  %s535_s20 = sshll.u32 %s595_s19, 4  ;;  %s536_s20 = int_to_ptr.vmem [resolvable:$false] %s535_s20 }
  0x1e   : > { %v315_v34 = vmax.f32 %v307_v26, 0.0  ;;  %v354_v35 = vadd.f32 %v710_v3, %v339_v28  ;;  %v340_v36 = vmul.f32 %v690_v1, %v325_v23  ;;  %v295_v37 = vmul.f32 %v685_v0, %v280_v24  ;;  %s537_s26 = scalar_lea.vmem %s536_s20, 2048  ;;  %p538_p0 = scmp.lt.s32.totalorder %s764_s13, %s536_s20 }
  0x1f   : > { %v359_v38 = vadd.f32 %v351_v20, %v313_v29  ;;  %v360_v39 = vadd.f32 %v352_v25, %v314_v30  ;;  %v316_v40 = vmax.f32 %v308_v31, 0.0  ;;  %v309_v41 = vadd.f32 %v705_v2, %v294_v32  ;;  %p533_p12 = pnand %p532_p11, %p671_p5  ;;  %p539_p1 = scmp.lt.s32.totalorder %s537_s26, %s531_s25 }
  0x20   : > { %v361_v43 = vadd.f32 %v353_v27, %v315_v34  ;;  %v355_v44 = vadd.f32 %v710_v3, %v340_v36  ;;  %v310_v45 = vadd.f32 %v705_v2, %v295_v37  ;;  %v341_v46 = vmul.f32 %v690_v1, %v326_v33 }
  0x21   : > { %v367_v49 = vmax.f32 %v359_v38, 0.0  ;;  %v368_v50 = vmax.f32 %v360_v39, 0.0  ;;  %v362_v51 = vadd.f32 %v354_v35, %v316_v40  ;;  %v317_v52 = vmax.f32 %v309_v41, 0.0  ;;  %p534_p13 = pneg %p533_p12  ;;  %p540_p2 = por %p539_p1, %p538_p0 }
  0x22   : > { %v369_v54 = vmax.f32 %v361_v43, 0.0  ;;  %v318_v55 = vmax.f32 %v310_v45, 0.0  ;;  %v356_v56 = vadd.f32 %v710_v3, %v341_v46  ;;  %v296_v57 = vmul.f32 %v685_v0, %v281_v42 }
  0x23   : > { %375 = vst [vmem:[%s261_s12] sm:$0xff] %v367_v49  ;;  %376 = vst [vmem:[%s261_s12 + $0x8] sm:$0xff] %v368_v50  ;;  %v370_v58 = vmax.f32 %v362_v51, 0.0  ;;  %v363_v59 = vadd.f32 %v355_v44, %v317_v52  ;;  %v342_v60 = vmul.f32 %v690_v1, %v327_v47  ;;  %v297_v61 = vmul.f32 %v685_v0, %v282_v48  ;;  %p541_p3 = pnand %p540_p2, %p534_p13 }
  0x24   : > { %377 = vst [vmem:[%s261_s12 + $0x10] sm:$0xff] %v369_v54  ;;  %v364_v62 = vadd.f32 %v356_v56, %v318_v55  ;;  %v311_v63 = vadd.f32 %v705_v2, %v296_v57  ;;  %v343_v4 = vmul.f32 %v690_v1, %v328_v53 }
  0x25   : > { %378 = vst [vmem:[%s261_s12 + $0x18] sm:$0xff] %v370_v58  ;;  %v371_v5 = vmax.f32 %v363_v59, 0.0  ;;  %v357_v6 = vadd.f32 %v710_v3, %v342_v60  ;;  %v312_v7 = vadd.f32 %v705_v2, %v297_v61 }
  0x26   : > { %v372_v8 = vmax.f32 %v364_v62, 0.0  ;;  %v319_v9 = vmax.f32 %v311_v63, 0.0  ;;  %v358_v10 = vadd.f32 %v710_v3, %v343_v4 }
  0x27   : > { %379 = vst [vmem:[%s261_s12 + $0x20] sm:$0xff] %v371_v5  ;;  %v320_v0 = vmax.f32 %v312_v7, 0.0 }
  0x28   : > { %380 = vst [vmem:[%s261_s12 + $0x28] sm:$0xff] %v372_v8  ;;  %v365_v11 = vadd.f32 %v357_v6, %v319_v9 }
  0x29   : > { %v366_v12 = vadd.f32 %v358_v10, %v320_v0 }
  0x2a   : > { %v373_v1 = vmax.f32 %v365_v11, 0.0 }
  0x2b   : > { %v374_v2 = vmax.f32 %v366_v12, 0.0 }
  0x2c   : > { %381 = vst [vmem:[%s261_s12 + $0x30] sm:$0xff] %v373_v1 }
  0x2d   : > { %382 = vst [vmem:[%s261_s12 + $0x38] sm:$0xff] %v374_v2 }
  0x2e   : > { %544 = shalt.err (!%p541_p3)
}
  0x2f   : > { %s545_s28 = scalar_lea.hbm %s769_s17, 1024  ;;  %s549_s10 = scalar_lea.hbm %s820_s6, 8192 }
  0x30   : > { %p546_p4 = scmp.ne.s32.totalorder %s769_s17, %s545_s28  ;;  %p550_p9 = scmp.lt.u32.totalorder %s769_s17, %s820_s6 }
  0x31   : > { %p551_p10 = scmp.lt.u32.totalorder %s549_s10, %s545_s28  ;;  %p553_p12 = scmp.lt.u32.totalorder %s545_s28, %s769_s17 }
  0x32   : > { %p547_p7 = pnand %p546_p4, %p671_p5 }
  0x33   : > { %p552_p11 = por %p551_p10, %p550_p9 }
  0x34   : > { %p548_p8 = pneg %p547_p7 }
  0x35   : > { %p554_p13 = por %p553_p12, %p552_p11 }
  0x37   : > { %p555_p0 = pnand %p554_p13, %p548_p8 }
  0x39   : > { %558 = shalt.err (!%p555_p0)
}
  0x3a   : > { %s596_s14 = smov 128   ;;  %s597_s15 = smov 8  }
  0x3b   : > { %490 = dma.vmem_to_hbm [thread:$0]  (%p671_p5), %s764_s13, 1024, %s769_s17, %s773_s18, %s596_s14, %s596_s14, %s597_s15  }
  0x3c PF: > { %p496_p1 = scmp.ge.s32.totalorder %s593_s24, 2  ;;  %s412_s16 = sand.u32 1, %s581_s21  }
  0x3d   : > { %s413_s25 = scalar_lea.sflag [#allocation3], %s412_s16 }
  0x3e   : > { %p493_p2 = pnand %p496_p1, %p675_p6 }
  0x40   : > { %576 = dma.done.wait (!%p493_p2), %s413_s25, 1024  }
  0x41   : > { %578 = vsyncadd (!%p493_p2), %s413_s25, 4294966272  ;;  %p16_p3 = scmp.ge.s32.totalorder %s658_s27, 10   ;;  %s823_s21 = smov %s585_s22 }
  0x42   : > { %s824_s22 = smov %s589_s23  ;;  %s825_s23 = smov %s669_s30 }
  0x43   : > { %s826_s24 = smov %s658_s27  ;;  %18 = sbr.rel (!%p16_p3) target bundleno = 3 (0x3), region = 82 }
  0x4a   :  { %418 = vsyncpa [#allocation3], 1 }
  0x4b   :  { %420 = vsyncpa [#allocation3 + $0x1], 1 }

// kernel: resblock_forward.4
= control target key start
LH: loop header
LB: loop body
LE: loop exit
PB: predicated region body
PF: predicated region fallthrough
CT: control target
= control target key end

     0   :  { %s3315_s24 = smov 0   ;;  %s3317_s25 = smov 0   ;;  %s3924_s0 = inlined_call_operand.vmem [shape: bf16[512,128], index: 0, kind: input, shape index: {}, may-alias: {0,1,2}]   ;;  %s3925_s1 = inlined_call_operand.vmem [shape: bf16[512,128], index: 1, kind: input, shape index: {}, may-alias: {0,1,2}]   ;;  %s3926_s2 = inlined_call_operand.vmem [shape: bf16[512,128], index: 2, kind: input, shape index: {}, may-alias: {0,1,2}]   ;;  %s3927_s3 = inlined_call_operand.vmem [shape: f32[1,128], index: 3, kind: input, shape index: {}]   ;;  %s3928_s4 = inlined_call_operand.vmem [shape: f32[1,128], index: 4, kind: input, shape index: {}]   ;;  %s3929_s5 = inlined_call_operand.vmem [shape: bf16[1152,128], index: 5, kind: input, shape index: {}]   ;;  %s3930_s6 = inlined_call_operand.vmem [shape: f32[512,128], index: 6, kind: output, shape index: {0}]   ;;  %s3931_s7 = inlined_call_operand.vmem [shape: f32[2,4,2,128], index: 7, kind: output, shape index: {1}]  }
   0x1   :  { %s3319_s26 = smov 0   ;;  %s3321_s27 = smov 0  }
   0x2   :  { %s3323_s28 = smov 0  }
   0x3 LB: > { %s27_s29 = sadd.s32 1, %s3263_s26  ;;  %s30_s30 = sadd.s32 1, %s3267_s27  ;;  %s3271_s28 = sphi %s3323_s28, %s18_s28   ;;  %s3267_s27 = sphi %s3321_s27, %s3974_s27   ;;  %s3263_s26 = sphi %s3319_s26, %s3973_s26   ;;  %s3259_s25 = sphi %s3317_s25, %s3972_s25   ;;  %s3255_s24 = sphi %s3315_s24, %s3971_s24  }
   0x4   : > { %p28_p0 = scmp.ge.s32.totalorder %s27_s29, 4  ;;  %p2474_p1 = scmp.ge.s32.totalorder %s3271_s28, 1 }
   0x5   : > { %p337_p2 = scmp.lt.s32.totalorder %s3271_s28, 9 }
   0x6   : > { %s3976_s29 = smov (%p28_p0, %s27_s29), 0  ;;  %s3978_s30 = smov (!%p28_p0, %s30_s30), %s3267_s27 }
   0x7   : > { %p338_p3 = pnand %p2474_p1, %p337_p2  ;;  %p32_p4 = scmp.ge.s32.totalorder %s3978_s30, 2 }
   0x8   : > { %v3161_v0 = vld [vmem:[%s3929_s5 + $0x40] sm:$0xff] (!%p338_p3)   ;;  %s2475_s10 = sshll.u32 (!%p338_p3), %s3259_s25, 4  ;;  %s2476_s13 = sshll.u32 (!%p338_p3), %s3255_s24, 2  ;;  %v3163_v2 = vld [vmem:[%s3929_s5 + $0x48] sm:$0xff] (!%p338_p3)   ;;  %v3165_v4 = vld [vmem:[%s3929_s5 + $0x50] sm:$0xff] (!%p338_p3)   ;;  %v3273_v17 = vmov (!%p338_p3), 0.0   ;;  %v556_v26 = vlaneseq (!%p338_p3) }
   0x9   : > { %s3980_s30 = smov (%p32_p4, %s3978_s30), 0  ;;  %341 = sbr.rel (%p338_p3) target bundleno = 418 (0x1a2), region = 44 }
   0xa   : > { %v3162_v1 = vld [vmem:[%s3929_s5 + $0x100] sm:$0xff] (!%p338_p3)   ;;  %2823 = vmatprep.subr.bf16.mxu1 (!%p338_p3), %v3161_v0  ;;  %s405_s16 = sadd.s32 (!%p338_p3), %s2476_s13, %s2475_s10  ;;  %v3164_v3 = vld [vmem:[%s3929_s5 + $0x108] sm:$0xff] (!%p338_p3)   ;;  %v3166_v5 = vld [vmem:[%s3929_s5 + $0x110] sm:$0xff] (!%p338_p3)   ;;  %p661_p7 = scmp.eq.s32.totalorder (!%p338_p3), %s3255_s24, 0  ;;  %470 = vst [vmem:[#allocation2] sm:$0xff] (!%p338_p3), %v3273_v17  ;;  %v3449_v35 = vshrl.u32 (!%p338_p3), %v556_v26, 7 }
   0xb   : > { %2919 = vmatprep.subr.bf16.mxu0 (!%p338_p3), %v3162_v1  ;;  %2824 = vmatpush3.bf16.msra.mxu1 (!%p338_p3), %v3161_v0  ;;  %s2477_s19 = sadd.s32 (!%p338_p3), 4294967295, %s405_s16  ;;  %v3167_v6 = vld [vmem:[%s3929_s5 + $0x58] sm:$0xff] (!%p338_p3)   ;;  %v3169_v8 = vld [vmem:[%s3929_s5 + $0x60] sm:$0xff] (!%p338_p3)   ;;  %v3171_v10 = vld [vmem:[%s3929_s5 + $0x68] sm:$0xff] (!%p338_p3)   ;;  %s2480_s14 = sshll.u32 (!%p338_p3), %s3259_s25, 2  ;;  %555 = vst [vmem:[#allocation2 + $0x68] sm:$0xff] (!%p338_p3), %v3273_v17 }
   0xc   : > { %2920 = vmatpush3.bf16.msra.mxu0 (!%p338_p3), %v3162_v1  ;;  %2825 = vmatprep.subr.bf16.mxu1 (!%p338_p3), %v3163_v2  ;;  %p407_p5 = scmp.gt.s32.totalorder (!%p338_p3), %s2477_s19, 0  ;;  %v3168_v7 = vld [vmem:[%s3929_s5 + $0x118] sm:$0xff] (!%p338_p3)   ;;  %v3170_v9 = vld [vmem:[%s3929_s5 + $0x120] sm:$0xff] (!%p338_p3)   ;;  %v3172_v11 = vld [vmem:[%s3929_s5 + $0x128] sm:$0xff] (!%p338_p3)   ;;  %s422_s18 = sadd.s32 (!%p338_p3), %s3255_s24, %s2480_s14  ;;  %v558_v49 = vadd.s32 (!%p338_p3), 8, %v3449_v35  ;;  %v569_v51 = vand.u32 (!%p338_p3), 15, %v3449_v35 }
   0xd   : > { %2921 = vmatprep.subr.bf16.mxu0 (!%p338_p3), %v3164_v3  ;;  %v3399_v12 = vld [vmem:[%s3927_s3] ss:$0 sm:$0xff] (!%p338_p3)  ;;  %s2481_s20 = sshll.u32 (!%p338_p3), %s422_s18, 3  ;;  %v3173_v21 = vld [vmem:[%s3929_s5 + $0x70] sm:$0xff] (!%p338_p3)   ;;  %s2683_s9 = sadd.s32 (!%p338_p3), 4, %s2476_s13  ;;  %v3175_v27 = vld [vmem:[%s3929_s5 + $0x78] sm:$0xff] (!%p338_p3)  }
   0xe   : > { %v3404_v13 = vld [vmem:[%s3928_s4] ss:$0 sm:$0xff] (!%p338_p3)  ;;  %p424_p8 = scmp.lt.s32.totalorder (!%p338_p3), %s2481_s20, 63  ;;  %v3174_v23 = vld [vmem:[%s3929_s5 + $0x130] sm:$0xff] (!%p338_p3)   ;;  %v3176_v31 = vld [vmem:[%s3929_s5 + $0x138] sm:$0xff] (!%p338_p3)   ;;  %v576_v0 = vand.u32 (!%p338_p3), 15, %v558_v49 }
   0xf   : > { %2826 = vmatpush3.bf16.msra.mxu1 (!%p338_p3), %v3163_v2  ;;  %v3177_v40 = vld [vmem:[%s3929_s5] sm:$0xff] (!%p338_p3)   ;;  %v3179_v61 = vld [vmem:[%s3929_s5 + $0x8] sm:$0xff] (!%p338_p3)   ;;  %vm3491_vm3 = vcmp.eq.s32.totalorder (!%p338_p3), %v569_v51, 0  ;;  %v3184_v30 = vld [vmem:[%s3929_s5 + $0x158] sm:$0xff] (!%p338_p3)   ;;  %vm3274_vm9 = vmmov (!%p338_p3), 1   ;;  %p681_p11 = scmp.eq.s32.totalorder (!%p338_p3), %s3255_s24, 3 }
  0x10   : > { %s3982_s19 = smov (!%p407_p5, %s2477_s19), 0  ;;  %2922 = vmatpush3.bf16.msra.mxu0 %v3164_v3  ;;  %2827 = vmatprep.subr.bf16.mxu1 %v3165_v4  ;;  %s3986_s20 = smov (!%p424_p8, %s2481_s20), 63  ;;  %v3178_v44 = vld [vmem:[%s3929_s5 + $0x140] sm:$0xff]   ;;  %v3180_v2 = vld [vmem:[%s3929_s5 + $0x148] sm:$0xff]   ;;  %vm3513_vm5 = vcmp.eq.s32.totalorder %v576_v0, 15 }
  0x11   : > { %s2478_s11 = sshll.u32 %s3982_s19, 1  ;;  %2923 = vmatprep.subr.bf16.mxu0 %v3166_v5  ;;  %s2482_s15 = sshll.u32 %s3986_s20, 2  ;;  %vm2597_vm7 = vmneg %vm3513_vm5  ;;  %v3202_v22 = vld [vmem:[%s3929_s5 + $0x1a0] sm:$0xff]   ;;  %v3203_v49 = vld [vmem:[%s3929_s5 + $0xa8] sm:$0xff]  }
  0x12   : > { %p410_p6 = scmp.lt.s32.totalorder %s2478_s11, 63  ;;  %vm3551_vm10 = vmpackc.low %vm2597_vm7, %vm3274_vm9  ;;  %s2489_s22 = sshll.u32 %s3986_s20, 3 }
  0x13   : > { %2828 = vmatpush3.bf16.msra.mxu1 %v3165_v4  ;;  %s690_s14 = scalar_select %p681_p11, 1, 0 }
  0x14   : > { %s3984_s11 = smov (!%p410_p6, %s2478_s11), 63  ;;  %2924 = vmatpush3.bf16.msra.mxu0 %v3166_v5  ;;  %2829 = vmatprep.subr.bf16.mxu1 %v3167_v6  ;;  %p459_p12 = scmp.lt.s32.totalorder %s3259_s25, 1 }
  0x15   : > { %2925 = vmatprep.subr.bf16.mxu0 %v3168_v7  ;;  %s2479_s19 = sshll.u32 %s3984_s11, 2  ;;  %s3442_s11 = scalar_lea.vmem %s3925_s1, %s2482_s15 }
  0x16   : > { %s413_s8 = scalar_lea.vmem %s3924_s0, %s2479_s19  ;;  %v2689_v33 = vld [vmem:[%s3442_s11] sm:$0xff]   ;;  %v2708_v34 = vld [vmem:[%s3442_s11 + $0x8] sm:$0xff]   ;;  %v2709_v55 = vld [vmem:[%s3442_s11 + $0x10] sm:$0xff]   ;;  %p461_p13 = scmp.lt.s32.totalorder %s3255_s24, 3 }
  0x17   : > { %2830 = vmatpush3.bf16.msra.mxu1 %v3167_v6  ;;  %v2685_v14 = vld [vmem:[%s413_s8] sm:$0xff]   ;;  %s670_s19 = scalar_select %p661_p7, 1, 0  ;;  %v2690_v36 = vunpack.c.l.bf16 %v2689_v33  ;;  %v2691_v37 = vunpack.c.h.bf16 %v2689_v33  ;;  %v2694_v38 = vunpack.c.l.bf16 %v2708_v34  ;;  %v2695_v39 = vunpack.c.h.bf16 %v2708_v34  ;;  %v2710_v59 = vld [vmem:[%s3442_s11 + $0x18] sm:$0xff]   ;;  %v3231_v33 = vld [vmem:[%s3929_s5 + $0x230] sm:$0xff]  }
  0x18   : > { %2926 = vmatpush3.bf16.msra.mxu0 %v3168_v7  ;;  %2831 = vmatprep.subr.bf16.mxu1 %v3169_v8  ;;  %v2686_v15 = vunpack.c.l.bf16 %v2685_v14  ;;  %v2687_v16 = vunpack.c.h.bf16 %v2685_v14  ;;  %v2698_v57 = vunpack.c.l.bf16 %v2709_v55  ;;  %v2699_v58 = vunpack.c.h.bf16 %v2709_v55  ;;  %v3185_v34 = vld [vmem:[%s3929_s5 + $0x20] sm:$0xff]   ;;  %s3992_s25 = smov (!%p459_p12, %s3259_s25), 1  ;;  %s3994_s24 = smov (!%p461_p13, %s3255_s24), 3 }
  0x19   : > { %2927 = vmatprep.subr.bf16.mxu0 %v3170_v9  ;;  %v671_v20 = vstv %s670_s19  ;;  %s3453_s19 = sadd.s32 %s2683_s9, %s2475_s10  ;;  %v511_v41 = vmul.f32 %v2690_v36, %v3399_v12  ;;  %v512_v42 = vmul.f32 %v2691_v37, %v3399_v12  ;;  %v513_v43 = vmul.f32 %v2694_v38, %v3399_v12  ;;  %v3186_v36 = vld [vmem:[%s3929_s5 + $0x160] sm:$0xff]   ;;  %v3187_v38 = vld [vmem:[%s3929_s5 + $0x28] sm:$0xff]   ;;  %s2490_s20 = sshll.u32 %s3992_s25, 2 }
  0x1a   : > { %v481_v18 = vmul.f32 %v2686_v15, %v3399_v12  ;;  %v482_v19 = vmul.f32 %v2687_v16, %v3399_v12  ;;  %vm3412_vm0 = vcmp.eq.s32.totalorder %v671_v20, 1  ;;  %p435_p9 = scmp.lt.s32.totalorder %s3453_s19, 31  ;;  %v514_v45 = vmul.f32 %v2695_v39, %v3399_v12  ;;  %s464_s8 = sadd.s32 %s2490_s20, %s3994_s24 }
  0x1b   : > { %2832 = vmatpush3.bf16.msra.mxu1 %v3169_v8  ;;  %vm2502_vm1 = vmneg %vm3412_vm0  ;;  %v519_v46 = vadd.f32 %v3404_v13, %v511_v41  ;;  %v520_v47 = vadd.f32 %v3404_v13, %v512_v42  ;;  %v521_v48 = vadd.f32 %v3404_v13, %v513_v43  ;;  %v2702_v62 = vunpack.c.l.bf16 %v2710_v59  ;;  %v3181_v8 = vld [vmem:[%s3929_s5 + $0x10] sm:$0xff]   ;;  %s2491_s9 = sshll.u32 %s464_s8, 1 }
  0x1c   : > { %2928 = vmatpush3.bf16.msra.mxu0 %v3170_v9  ;;  %2833 = vmatprep.subr.bf16.mxu1 %v3171_v10  ;;  %v489_v24 = vadd.f32 %v3404_v13, %v481_v18  ;;  %v490_v25 = vadd.f32 %v3404_v13, %v482_v19  ;;  %vm3434_vm2 = vmpackc.low %vm2502_vm1, %vm2502_vm1  ;;  %v522_v50 = vadd.f32 %v3404_v13, %v514_v45  ;;  %s3988_s19 = smov (!%p435_p9, %s3453_s19), 31  ;;  %v2703_v63 = vunpack.c.h.bf16 %v2710_v59  ;;  %v3230_v59 = vld [vmem:[%s3929_s5 + $0x228] sm:$0xff]   ;;  %s466_s15 = scalar_lea.vmem %s3931_s7, %s2491_s9 }
  0x1d   : > { %2929 = vmatprep.subr.bf16.mxu0 %v3172_v11  ;;  %v527_v52 = vmax.f32 %v519_v46, 0.0  ;;  %v528_v53 = vmax.f32 %v520_v47, 0.0  ;;  %v529_v54 = vmax.f32 %v521_v48, 0.0  ;;  %v515_v3 = vmul.f32 %v2698_v57, %v3399_v12  ;;  %s2485_s16 = sshll.u32 %s3988_s19, 1  ;;  %vm725_vm4 = vmor %vm3412_vm0, %vm3491_vm3  ;;  %v3190_v47 = vld [vmem:[%s3929_s5 + $0x170] sm:$0xff]  }
  0x1e   : > { %v491_v28 = vmax.f32 %v489_v24, 0.0  ;;  %v492_v29 = vmax.f32 %v490_v25, 0.0  ;;  %v530_v56 = vmax.f32 %v522_v50, 0.0  ;;  %v516_v4 = vmul.f32 %v2699_v58, %v3399_v12  ;;  %vm3520_vm6 = vmneg %vm725_vm4  ;;  %p3533_p10 = scmp.lt.s32.totalorder %s2485_s16, 63 }
  0x1f   : > { %2834 = vmatpush3.bf16.msra.mxu1 %v3171_v10  ;;  %535 = vst [vmem:[#allocation2 + $0x18] sm:$0xff] %v527_v52  ;;  %536 = vst [vmem:[#allocation2 + $0x20] sm:$0xff] %v528_v53  ;;  %v1417_v60 = vpack.c.bf16 %v528_v53, %v527_v52  ;;  %v517_v6 = vmul.f32 %v2702_v62, %v3399_v12  ;;  %v518_v7 = vmul.f32 %v2703_v63, %v3399_v12  ;;  %v3191_v53 = vld [vmem:[%s3929_s5 + $0x38] sm:$0xff]  }
  0x20   : > { %2930 = vmatpush3.bf16.msra.mxu0 %v3172_v11  ;;  %2835 = vmatprep.subr.bf16.mxu1 %v3173_v21  ;;  %493 = vst [vmem:[#allocation2 + $0x8] sm:$0xff] %v491_v28  ;;  %494 = vst [vmem:[#allocation2 + $0x10] sm:$0xff] %v492_v29  ;;  %v2505_v32 = vpack.c.bf16 %v492_v29, %v491_v28  ;;  %v3484_v1 = vpack.c.bf16 %v530_v56, %v529_v54  ;;  %v3182_v11 = vld [vmem:[%s3929_s5 + $0x150] sm:$0xff]   ;;  %v3183_v28 = vld [vmem:[%s3929_s5 + $0x18] sm:$0xff]   ;;  %s3990_s16 = smov (!%p3533_p10, %s2485_s16), 63  ;;  %v559_v37 = vadd.s32 16, %v3449_v35 }
  0x21   : > { %2931 = vmatprep.subr.bf16.mxu0 %v3174_v23  ;;  %537 = vst [vmem:[#allocation2 + $0x28] sm:$0xff] %v529_v54  ;;  %538 = vst [vmem:[#allocation2 + $0x30] sm:$0xff] %v530_v56  ;;  %2935 = vmatprep.mubr.bf16.mxu0 %v1417_v60  ;;  %v523_v9 = vadd.f32 %v3404_v13, %v515_v3  ;;  %v524_v10 = vadd.f32 %v3404_v13, %v516_v4  ;;  %v560_v39 = vadd.s32 24, %v3449_v35  ;;  %s2486_s17 = sshll.u32 %s3990_s16, 2  ;;  %v3192_v54 = vld [vmem:[%s3929_s5 + $0x178] sm:$0xff]   ;;  %v3194_v3 = vld [vmem:[%s3929_s5 + $0x180] sm:$0xff]   ;;  %s455_s16 = scalar_lea.vmem %s3930_s6, %s2489_s22 }
  0x22   : > { %2839 = vmatprep.mubr.msk.bf16.mxu1 %vm3434_vm2, %v2505_v32  ;;  %v525_v14 = vadd.f32 %v3404_v13, %v517_v6  ;;  %v526_v15 = vadd.f32 %v3404_v13, %v518_v7  ;;  %vm2517_vm8 = vmpackc.low %vm2502_vm1, %vm3520_vm6  ;;  %v583_v41 = vand.u32 15, %v559_v37  ;;  %v561_v42 = vadd.s32 32, %v3449_v35  ;;  %s441_s23 = scalar_lea.vmem %s3926_s2, %s2486_s17 }
  0x23   : > { %2836 = vmatpush3.bf16.msra.mxu1 %v3173_v21  ;;  %v531_v17 = vmax.f32 %v523_v9, 0.0  ;;  %v532_v18 = vmax.f32 %v524_v10, 0.0  ;;  %v562_v43 = vadd.s32 40, %v3449_v35  ;;  %v590_v45 = vand.u32 15, %v560_v39  ;;  %v2705_v52 = vld [vmem:[%s441_s23] sm:$0xff]  }
  0x24   : > { %2932 = vmatpush3.bf16.msra.mxu0 %v3174_v23  ;;  %2837 = vmatprep.subr.bf16.mxu1 %v3175_v27  ;;  %v533_v21 = vmax.f32 %v525_v14, 0.0  ;;  %v534_v23 = vmax.f32 %v526_v15, 0.0  ;;  %v563_v46 = vadd.s32 48, %v3449_v35  ;;  %v564_v48 = vadd.s32 56, %v3449_v35  ;;  %v3232_v14 = vld [vmem:[%s3929_s5 + $0x238] sm:$0xff]  }
  0x25   : > { %2933 = vmatprep.subr.bf16.mxu0 %v3176_v31  ;;  %539 = vst [vmem:[#allocation2 + $0x38] sm:$0xff] %v531_v17  ;;  %540 = vst [vmem:[#allocation2 + $0x40] sm:$0xff] %v532_v18  ;;  %v3518_v24 = vpack.c.bf16 %v532_v18, %v531_v17  ;;  %vm3589_vm11 = vcmp.ne.s32.totalorder %v583_v41, 0  ;;  %v597_v50 = vand.u32 15, %v561_v42  ;;  %v604_v51 = vand.u32 15, %v562_v43  ;;  %v3199_v42 = vld [vmem:[%s3929_s5 + $0x98] sm:$0xff]  }
  0x26   : > { %v1558_v26 = vld [vmem:[#allocation2 + $0x19] sm:$0xff]  ;;  %541 = vst [vmem:[#allocation2 + $0x48] sm:$0xff] %v533_v21  ;;  %542 = vst [vmem:[#allocation2 + $0x50] sm:$0xff] %v534_v23  ;;  %v3527_v29 = vpack.c.bf16 %v534_v23, %v533_v21  ;;  %vm3599_vm12 = vcmp.ne.s32.totalorder %v590_v45, 15  ;;  %v611_v55 = vand.u32 15, %v563_v46  ;;  %v2706_v56 = vunpack.c.l.bf16 %v2705_v52 }
  0x27   : > { %2838 = vmatpush3.bf16.msra.mxu1 %v3175_v27  ;;  %v717_v19 = vld [vmem:[#allocation2 + $0x7] sm:$0xff]  ;;  %v718_v20 = vld [vmem:[#allocation2 + $0xf] sm:$0xff]  ;;  %v2707_v57 = vunpack.c.h.bf16 %v2705_v52  ;;  %v719_v58 = vld [vmem:[#allocation2 + $0x17] sm:$0xff]  ;;  %vm3613_vm14 = vcmp.ne.s32.totalorder %v597_v50, 0  ;;  %vm2714_vm2 = vcmp.ne.s32.totalorder %v604_v51, 15  ;;  %v691_v35 = vstv %s690_s14 }
  0x28   : > { %2934 = vmatpush3.bf16.msra.mxu0 %v3176_v31  ;;  %2847 = vmatprep.subr.bf16.mxu1 %v3177_v40  ;;  %v1559_v27 = vld [vmem:[#allocation2 + $0x21] sm:$0xff]  ;;  %v2518_v31 = vpack.c.bf16 %v718_v20, %v717_v19  ;;  %vm3606_vm13 = vmpackc.low %vm3274_vm9, %vm3589_vm11  ;;  %v547_v0 = vmul.f32 %v2706_v56, %v3399_v12  ;;  %v1560_v6 = vld [vmem:[#allocation2 + $0x29] sm:$0xff]  ;;  %vm3629_vm4 = vcmp.eq.s32.totalorder %v611_v55, 0 }
  0x29   : > { %2943 = vmatprep.subr.bf16.mxu0 %v3178_v44  ;;  %v3547_v32 = vpack.c.bf16 %v1559_v27, %v1558_v26  ;;  %v720_v62 = vld [vmem:[#allocation2 + $0x1f] sm:$0xff]  ;;  %vm3625_vm15 = vmpackc.low %vm3599_vm12, %vm3274_vm9  ;;  %v722_v9 = vld [vmem:[#allocation2 + $0x2f] sm:$0xff] }
  0x2a   : > { %2840 = vmatmul.mubr.bf16.vlgmr.msra.gmra.mrb[0].mxu1 %v1417_v60  ;;  %v618_v60 = vand.u32 15, %v564_v48  ;;  %v549_v10 = vadd.f32 %v3404_v13, %v547_v0  ;;  %vm3638_vm6 = vmpackc.low %vm3274_vm9, %vm3613_vm14  ;;  %v3646_v18 = vpack.c.bf16 %v720_v62, %v719_v58  ;;  %v3195_v19 = vld [vmem:[%s3929_s5 + $0x88] sm:$0xff]   ;;  %v1056_v16 = vld [vmem:[#allocation2 + $0x11] sm:$0xff] }
  0x2b   : > { %2848 = vmatpush3.bf16.msra.mxu1 %v3177_v40  ;;  %2936 = vmatmul.mubr.bf16.vlgmr.msra.gmra.mrb[0].mxu0 %v3484_v1  ;;  %v3188_v40 = vld [vmem:[%s3929_s5 + $0x168] sm:$0xff]   ;;  %vm2528_vm11 = vmneg %vm3629_vm4  ;;  %v3200_v46 = vld [vmem:[%s3929_s5 + $0x198] sm:$0xff]  }
  0x2c   : > { %2944 = vmatpush3.bf16.msra.mxu0 %v3178_v44  ;;  %2849 = vmatprep.subr.bf16.mxu1 %v3179_v61  ;;  %v3189_v44 = vld [vmem:[%s3929_s5 + $0x30] sm:$0xff]   ;;  %v1562_v15 = vld [vmem:[#allocation2 + $0x39] sm:$0xff]  ;;  %vm3642_vm7 = vcmp.eq.s32.totalorder %v618_v60, 15  ;;  %v551_v20 = vmax.f32 %v549_v10, 0.0  ;;  %v3196_v26 = vld [vmem:[%s3929_s5 + $0x188] sm:$0xff]  }
  0x2d   : > { %2945 = vmatprep.subr.bf16.mxu0 %v3180_v2  ;;  %2843 = vmatprep.mubr.bf16.mxu1 %v3484_v1  ;;  %v1561_v7 = vld [vmem:[#allocation2 + $0x31] sm:$0xff]  ;;  %v1563_v25 = vld [vmem:[#allocation2 + $0x41] sm:$0xff]  ;;  %vm2553_vm12 = vmneg %vm3642_vm7 }
  0x2e   : > { %2939 = vmatprep.mubr.bf16.mxu0 %v3518_v24  ;;  %v3656_v23 = vpack.c.bf16 %v1561_v7, %v1560_v6  ;;  %553 = vst [vmem:[#allocation2 + $0x58] sm:$0xff] %v551_v20  ;;  %vm3681_vm14 = vmpackc.low %vm3274_vm9, %vm2528_vm11  ;;  %v1055_v41 = vld [vmem:[#allocation2 + $0x9] sm:$0xff]  ;;  %v3201_v48 = vld [vmem:[%s3929_s5 + $0xa0] sm:$0xff]  }
  0x2f   : > { %2850 = vmatpush3.bf16.msra.mxu1 %v3179_v61  ;;  %v3193_v61 = vld [vmem:[%s3929_s5 + $0x80] sm:$0xff]   ;;  %vm1064_vm11 = vmor %vm3412_vm0, %vm3513_vm5  ;;  %v3204_v50 = vld [vmem:[%s3929_s5 + $0x1a8] sm:$0xff]   ;;  %vm3766_vm0 = vcmp.eq.s32.totalorder %v691_v35, 1 }
  0x30   : > { %2946 = vmatpush3.bf16.msra.mxu0 %v3180_v2  ;;  %2851 = vmatprep.subr.bf16.mxu1 %v3181_v8  ;;  %v548_v2 = vmul.f32 %v2707_v57, %v3399_v12  ;;  %vm2540_vm5 = vmneg %vm1064_vm11  ;;  %v3205_v51 = vld [vmem:[%s3929_s5 + $0xb0] sm:$0xff]   ;;  %v3209_v55 = vld [vmem:[%s3929_s5 + $0xc0] sm:$0xff]  }
  0x31   : > { %2947 = vmatprep.subr.bf16.mxu0 %v3182_v11  ;;  %vm2542_vm11 = vmpackc.low %vm2540_vm5, %vm2502_vm1  ;;  %v3206_v52 = vld [vmem:[%s3929_s5 + $0x1b0] sm:$0xff]   ;;  %v3210_v56 = vld [vmem:[%s3929_s5 + $0x1c0] sm:$0xff]  }
  0x32   : > { %2844 = vmatmul.mubr.bf16.gmra.mrb[4].mxu1 %v3518_v24  ;;  %v1735_v58 = vld [vmem:[#allocation2 + $0x47] sm:$0xff]  ;;  %v1736_v60 = vld [vmem:[#allocation2 + $0x4f] sm:$0xff]  ;;  %vm1745_vm1 = vmor %vm3766_vm0, %vm3629_vm4 }
  0x33   : > { %2852 = vmatpush3.bf16.msra.mxu1 %v3181_v8  ;;  %2940 = vmatmul.mubr.bf16.gmra.mrb[4].mxu0 %v3527_v29  ;;  %v721_v8 = vld [vmem:[#allocation2 + $0x27] sm:$0xff]  ;;  %v3779_v63 = vpack.c.bf16 %v1736_v60, %v1735_v58  ;;  %v3213_v0 = vld [vmem:[%s3929_s5 + $0xd0] sm:$0xff]   ;;  %vm2634_vm4 = vmneg %vm1745_vm1 }
  0x34   : > { %2948 = vmatpush3.bf16.msra.mxu0 %v3182_v11  ;;  %2853 = vmatprep.subr.bf16.mxu1 %v3183_v28  ;;  %v550_v11 = vadd.f32 %v3404_v13, %v548_v2  ;;  %v3212_v62 = vld [vmem:[%s3929_s5 + $0x1c8] sm:$0xff]   ;;  %v3215_v7 = vld [vmem:[%s3929_s5 + $0xd8] sm:$0xff]   ;;  %v3218_v12 = vld [vmem:[%s3929_s5 + $0x1e0] sm:$0xff]  }
  0x35   : > { %2949 = vmatprep.subr.bf16.mxu0 %v3184_v30  ;;  %2863 = vmatprep.mubr.msk.bf16.mxu1 %vm2517_vm8, %v2518_v31  ;;  %vm3652_vm8 = vmpackc.low %vm2714_vm2, %vm3274_vm9  ;;  %v724_v31 = vld [vmem:[#allocation2 + $0x3f] sm:$0xff]  ;;  %v1737_v2 = vld [vmem:[#allocation2 + $0x57] sm:$0xff] }
  0x36   : > { %2959 = vmatprep.mubr.msk.bf16.mxu0 %vm3551_vm10, %v3547_v32  ;;  %v552_v21 = vmax.f32 %v550_v11, 0.0  ;;  %vm3692_vm2 = vmpackc.low %vm2553_vm12, %vm3274_vm9  ;;  %v3219_v10 = vld [vmem:[%s3929_s5 + $0xe8] sm:$0xff]  }
  0x37   : > { %2854 = vmatpush3.bf16.msra.mxu1 %v3183_v28  ;;  %v3667_v28 = vpack.c.bf16 %v722_v9, %v721_v8  ;;  %vm2565_vm12 = vmneg %vm3491_vm3  ;;  %v3216_v8 = vld [vmem:[%s3929_s5 + $0x1d8] sm:$0xff]   ;;  %v3217_v9 = vld [vmem:[%s3929_s5 + $0xe0] sm:$0xff]  }
  0x38   : > { %2950 = vmatpush3.bf16.msra.mxu0 %v3184_v30  ;;  %2855 = vmatprep.subr.bf16.mxu1 %v3185_v34  ;;  %554 = vst [vmem:[#allocation2 + $0x60] sm:$0xff] %v552_v21  ;;  %v3665_v27 = vpack.c.bf16 %v552_v21, %v551_v20  ;;  %v723_v30 = vld [vmem:[#allocation2 + $0x37] sm:$0xff]  ;;  %vm3728_vm3 = vmpackc.low %vm3274_vm9, %vm2565_vm12  ;;  %v3220_v11 = vld [vmem:[%s3929_s5 + $0x1e8] sm:$0xff]  }
  0x39   : > { %2951 = vmatprep.subr.bf16.mxu0 %v3186_v36  ;;  %v3709_v43 = vpack.c.bf16 %v724_v31, %v723_v30  ;;  %vm2633_vm9 = vmneg %vm3766_vm0  ;;  %v3225_v20 = vld [vmem:[%s3929_s5 + $0x200] sm:$0xff]   ;;  %v3226_v21 = vld [vmem:[%s3929_s5 + $0x208] sm:$0xff]  }
  0x3a   : > { %vm2635_vm5 = vmpackc.low %vm2633_vm9, %vm2634_vm4 }
  0x3b   : > { %2856 = vmatpush3.bf16.msra.mxu1 %v3185_v34  ;;  %v3197_v34 = vld [vmem:[%s3929_s5 + $0x90] sm:$0xff]  }
  0x3c   : > { %2952 = vmatpush3.bf16.msra.mxu0 %v3186_v36  ;;  %2857 = vmatprep.subr.bf16.mxu1 %v3187_v38  ;;  %v3675_v36 = vpack.c.bf16 %v1563_v25, %v1562_v15  ;;  %v3221_v15 = vld [vmem:[%s3929_s5 + $0xf0] sm:$0xff]  }
  0x3d   : > { %2953 = vmatprep.subr.bf16.mxu0 %v3188_v40  ;;  %v3227_v25 = vld [vmem:[%s3929_s5 + $0x210] sm:$0xff]  }
  0x3f   : > { %2858 = vmatpush3.bf16.msra.mxu1 %v3187_v38  ;;  %v3198_v38 = vld [vmem:[%s3929_s5 + $0x190] sm:$0xff]   ;;  %v2091_v13 = vld [vmem:[#allocation2 + $0x59] sm:$0xff] }
  0x40   : > { %2954 = vmatpush3.bf16.msra.mxu0 %v3188_v40  ;;  %2859 = vmatprep.subr.bf16.mxu1 %v3189_v44  ;;  %v1564_v40 = vld [vmem:[#allocation2 + $0x49] sm:$0xff] }
  0x41   : > { %2955 = vmatprep.subr.bf16.mxu0 %v3190_v47 }
  0x43   : > { %2860 = vmatpush3.bf16.msra.mxu1 %v3189_v44  ;;  %v1565_v44 = vld [vmem:[#allocation2 + $0x51] sm:$0xff] }
  0x44   : > { %2956 = vmatpush3.bf16.msra.mxu0 %v3190_v47  ;;  %2861 = vmatprep.subr.bf16.mxu1 %v3191_v53  ;;  %v3711_v45 = vpack.c.bf16 %v1565_v44, %v1564_v40  ;;  %v2543_v47 = vpack.c.bf16 %v1056_v16, %v1055_v41 }
  0x45   : > { %2957 = vmatprep.subr.bf16.mxu0 %v3192_v54 }
  0x47   : > { %2862 = vmatpush3.bf16.msra.mxu1 %v3191_v53  ;;  %v3207_v53 = vld [vmem:[%s3929_s5 + $0xb8] sm:$0xff]  }
  0x48   : > { %2958 = vmatpush3.bf16.msra.mxu0 %v3192_v54  ;;  %2871 = vmatprep.subr.bf16.mxu1 %v3193_v61  ;;  %v3208_v54 = vld [vmem:[%s3929_s5 + $0x1b8] sm:$0xff]  }
  0x49   : > { %2967 = vmatprep.subr.bf16.mxu0 %v3194_v3 }
  0x4a   : > { %2864 = vmatmul.mubr.msk.bf16.vlgmr.msra.gmra.mrb[0].mxu1 %vm3606_vm13, %v3646_v18 }
  0x4b   : > { %2872 = vmatpush3.bf16.msra.mxu1 %v3193_v61  ;;  %2960 = vmatmul.mubr.msk.bf16.vlgmr.msra.gmra.mrb[0].mxu0 %vm3625_vm15, %v3656_v23  ;;  %v3211_v61 = vld [vmem:[%s3929_s5 + $0xc8] sm:$0xff]  }
  0x4c   : > { %2968 = vmatpush3.bf16.msra.mxu0 %v3194_v3  ;;  %2873 = vmatprep.subr.bf16.mxu1 %v3195_v19  ;;  %v3214_v3 = vld [vmem:[%s3929_s5 + $0x1d0] sm:$0xff]  }
  0x4d   : > { %2969 = vmatprep.subr.bf16.mxu0 %v3196_v26  ;;  %2867 = vmatprep.mubr.msk.bf16.mxu1 %vm3638_vm6, %v3667_v28 }
  0x4e   : > { %2963 = vmatprep.mubr.msk.bf16.mxu0 %vm3652_vm8, %v3675_v36 }
  0x4f   : > { %2874 = vmatpush3.bf16.msra.mxu1 %v3195_v19  ;;  %v3224_v19 = vld [vmem:[%s3929_s5 + $0x1f8] sm:$0xff]  }
  0x50   : > { %2970 = vmatpush3.bf16.msra.mxu0 %v3196_v26  ;;  %2875 = vmatprep.subr.bf16.mxu1 %v3197_v34 }
  0x51   : > { %2971 = vmatprep.subr.bf16.mxu0 %v3198_v38 }
  0x52   : > { %2868 = vmatmul.mubr.msk.bf16.gmra.mrb[4].mxu1 %vm3681_vm14, %v3709_v43 }
  0x53   : > { %2876 = vmatpush3.bf16.msra.mxu1 %v3197_v34  ;;  %2964 = vmatmul.mubr.msk.bf16.gmra.mrb[4].mxu0 %vm3692_vm2, %v3711_v45 }
  0x54   : > { %2972 = vmatpush3.bf16.msra.mxu0 %v3198_v38  ;;  %2877 = vmatprep.subr.bf16.mxu1 %v3199_v42 }
  0x55   : > { %2973 = vmatprep.subr.bf16.mxu0 %v3200_v46  ;;  %2887 = vmatprep.mubr.msk.bf16.mxu1 %vm2542_vm11, %v2543_v47 }
  0x56   : > { %2983 = vmatprep.mubr.msk.bf16.mxu0 %vm3728_vm3, %v3667_v28 }
  0x57   : > { %2878 = vmatpush3.bf16.msra.mxu1 %v3199_v42 }
  0x58   : > { %2974 = vmatpush3.bf16.msra.mxu0 %v3200_v46  ;;  %2879 = vmatprep.subr.bf16.mxu1 %v3201_v48 }
  0x59   : > { %2975 = vmatprep.subr.bf16.mxu0 %v3202_v22 }
  0x5b   : > { %2880 = vmatpush3.bf16.msra.mxu1 %v3201_v48 }
  0x5c   : > { %2976 = vmatpush3.bf16.msra.mxu0 %v3202_v22  ;;  %2881 = vmatprep.subr.bf16.mxu1 %v3203_v49 }
  0x5d   : > { %2977 = vmatprep.subr.bf16.mxu0 %v3204_v50 }
  0x5f   : > { %2882 = vmatpush3.bf16.msra.mxu1 %v3203_v49 }
  0x60   : > { %2978 = vmatpush3.bf16.msra.mxu0 %v3204_v50  ;;  %2883 = vmatprep.subr.bf16.mxu1 %v3205_v51 }
  0x61   : > { %2979 = vmatprep.subr.bf16.mxu0 %v3206_v52 }
  0x63   : > { %2884 = vmatpush3.bf16.msra.mxu1 %v3205_v51 }
  0x64   : > { %2980 = vmatpush3.bf16.msra.mxu0 %v3206_v52  ;;  %2885 = vmatprep.subr.bf16.mxu1 %v3207_v53 }
  0x65   : > { %2981 = vmatprep.subr.bf16.mxu0 %v3208_v54 }
  0x67   : > { %2886 = vmatpush3.bf16.msra.mxu1 %v3207_v53 }
  0x68   : > { %2982 = vmatpush3.bf16.msra.mxu0 %v3208_v54  ;;  %2895 = vmatprep.subr.bf16.mxu1 %v3209_v55 }
  0x69   : > { %2991 = vmatprep.subr.bf16.mxu0 %v3210_v56 }
  0x6a   : > { %2888 = vmatmul.mubr.msk.bf16.vlgmr.msra.gmra.mrb[0].mxu1 %vm3625_vm15, %v3547_v32  ;;  %v1738_v32 = vld [vmem:[#allocation2 + $0x5f] sm:$0xff] }
  0x6b   : > { %2896 = vmatpush3.bf16.msra.mxu1 %v3209_v55  ;;  %2984 = vmatmul.mubr.msk.bf16.vlgmr.msra.gmra.mrb[0].mxu0 %vm3606_vm13, %v3709_v43  ;;  %v2636_v6 = vpack.c.bf16 %v1738_v32, %v1737_v2 }
  0x6c   : > { %2992 = vmatpush3.bf16.msra.mxu0 %v3210_v56  ;;  %2897 = vmatprep.subr.bf16.mxu1 %v3211_v61 }
  0x6d   : > { %2993 = vmatprep.subr.bf16.mxu0 %v3212_v62  ;;  %2891 = vmatprep.mubr.msk.bf16.mxu1 %vm3652_vm8, %v3656_v23 }
  0x6e   : > { %2987 = vmatprep.mubr.msk.bf16.mxu0 %vm3638_vm6, %v3779_v63 }
  0x6f   : > { %2898 = vmatpush3.bf16.msra.mxu1 %v3211_v61 }
  0x70   : > { %2994 = vmatpush3.bf16.msra.mxu0 %v3212_v62  ;;  %2899 = vmatprep.subr.bf16.mxu1 %v3213_v0 }
  0x71   : > { %2995 = vmatprep.subr.bf16.mxu0 %v3214_v3 }
  0x72   : > { %2892 = vmatmul.mubr.msk.bf16.gmra.mrb[4].mxu1 %vm3692_vm2, %v3675_v36 }
  0x73   : > { %2900 = vmatpush3.bf16.msra.mxu1 %v3213_v0  ;;  %2988 = vmatmul.mubr.msk.bf16.gmra.mrb[4].mxu0 %vm2635_vm5, %v2636_v6 }
  0x74   : > { %2996 = vmatpush3.bf16.msra.mxu0 %v3214_v3  ;;  %2901 = vmatprep.subr.bf16.mxu1 %v3215_v7 }
  0x75   : > { %2997 = vmatprep.subr.bf16.mxu0 %v3216_v8  ;;  %2911 = vmatprep.mubr.msk.bf16.mxu1 %vm3728_vm3, %v3646_v18  ;;  %v3223_v18 = vld [vmem:[%s3929_s5 + $0xf8] sm:$0xff]  }
  0x76   : > { %3007 = vmatprep.mubr.bf16.mxu0 %v3484_v1  ;;  %v3222_v1 = vld [vmem:[%s3929_s5 + $0x1f0] sm:$0xff]  }
  0x77   : > { %2902 = vmatpush3.bf16.msra.mxu1 %v3215_v7 }
  0x78   : > { %2998 = vmatpush3.bf16.msra.mxu0 %v3216_v8  ;;  %2903 = vmatprep.subr.bf16.mxu1 %v3217_v9 }
  0x79   : > { %2999 = vmatprep.subr.bf16.mxu0 %v3218_v12 }
  0x7b   : > { %2904 = vmatpush3.bf16.msra.mxu1 %v3217_v9 }
  0x7c   : > { %3000 = vmatpush3.bf16.msra.mxu0 %v3218_v12  ;;  %2905 = vmatprep.subr.bf16.mxu1 %v3219_v10 }
  0x7d   : > { %3001 = vmatprep.subr.bf16.mxu0 %v3220_v11 }
  0x7f   : > { %2906 = vmatpush3.bf16.msra.mxu1 %v3219_v10 }
  0x80   : > { %3002 = vmatpush3.bf16.msra.mxu0 %v3220_v11  ;;  %2907 = vmatprep.subr.bf16.mxu1 %v3221_v15 }
  0x81   : > { %3003 = vmatprep.subr.bf16.mxu0 %v3222_v1 }
  0x83   : > { %2908 = vmatpush3.bf16.msra.mxu1 %v3221_v15 }
  0x84   : > { %3004 = vmatpush3.bf16.msra.mxu0 %v3222_v1  ;;  %2909 = vmatprep.subr.bf16.mxu1 %v3223_v18 }
  0x85   : > { %3005 = vmatprep.subr.bf16.mxu0 %v3224_v19 }
  0x87   : > { %2910 = vmatpush3.bf16.msra.mxu1 %v3223_v18 }
  0x88   : > { %3006 = vmatpush3.bf16.msra.mxu0 %v3224_v19  ;;  %3039 = vmatprep.subr.bf16.mxu1 %v3225_v20 }
  0x89   : > { %3015 = vmatprep.subr.bf16.mxu0 %v3225_v20 }
  0x8a   : > { %2912 = vmatmul.mubr.msk.bf16.vlgmr.msra.gmra.mrb[0].mxu1 %vm3606_vm13, %v3667_v28  ;;  %vm2648_vm13 = vmpackc.low %vm2633_vm9, %vm2633_vm9 }
  0x8b   : > { %3008 = vmatmul.mubr.bf16.vlgmr.msra.gmra.mrb[0].mxu0 %v3518_v24  ;;  %3047 = vmatpush3.bf16.msra.mxu1 %v3225_v20  ;;  %v3228_v24 = vld [vmem:[%s3929_s5 + $0x218] sm:$0xff]  }
  0x8c   : > { %3016 = vmatpush3.bf16.msra.mxu0 %v3225_v20  ;;  %3040 = vmatprep.subr.bf16.mxu1 %v3226_v21 }
  0x8d   : > { %3017 = vmatprep.subr.bf16.mxu0 %v3226_v21  ;;  %2915 = vmatprep.mubr.msk.bf16.mxu1 %vm3638_vm6, %v3709_v43 }
  0x8e   : > { %3011 = vmatprep.mubr.bf16.mxu0 %v3527_v29  ;;  %v3229_v29 = vld [vmem:[%s3929_s5 + $0x220] sm:$0xff]  }
  0x8f   : > { %3048 = vmatpush3.bf16.msra.mxu1 %v3226_v21 }
  0x90   : > { %3018 = vmatpush3.bf16.msra.mxu0 %v3226_v21  ;;  %3041 = vmatprep.subr.bf16.mxu1 %v3227_v25 }
  0x91   : > { %3019 = vmatprep.subr.bf16.mxu0 %v3227_v25 }
  0x92   : > { %2916 = vmatmul.mubr.msk.bf16.gmra.mrb[4].mxu1 %vm3681_vm14, %v3779_v63 }
  0x93   : > { %3012 = vmatmul.mubr.msk.bf16.gmra.mrb[4].mxu0 %vm2648_vm13, %v3665_v27  ;;  %3049 = vmatpush3.bf16.msra.mxu1 %v3227_v25 }
  0x94   : > { %3020 = vmatpush3.bf16.msra.mxu0 %v3227_v25  ;;  %3042 = vmatprep.subr.bf16.mxu1 %v3228_v24 }
  0x95   : > { %3021 = vmatprep.subr.bf16.mxu0 %v3228_v24  ;;  %3031 = vmatprep.mubr.msk.bf16.mxu0 %vm3551_vm10, %v3656_v23  ;;  %vm2100_vm10 = vmor %vm3766_vm0, %vm3642_vm7  ;;  %v2092_v23 = vld [vmem:[#allocation2 + $0x61] sm:$0xff] }
  0x96   : > { %3035 = vmatprep.mubr.msk.bf16.mxu1 %vm3652_vm8, %v3711_v45  ;;  %vm2671_vm6 = vmneg %vm2100_vm10  ;;  %v2674_v26 = vpack.c.bf16 %v2092_v23, %v2091_v13 }
  0x97   : > { %3050 = vmatpush3.bf16.msra.mxu1 %v3228_v24  ;;  %vm2673_vm8 = vmpackc.low %vm2671_vm6, %vm2633_vm9 }
  0x98   : > { %3022 = vmatpush3.bf16.msra.mxu0 %v3228_v24  ;;  %3043 = vmatprep.subr.bf16.mxu1 %v3229_v29 }
  0x99   : > { %3023 = vmatprep.subr.bf16.mxu0 %v3229_v29 }
  0x9b   : > { %3051 = vmatpush3.bf16.msra.mxu1 %v3229_v29 }
  0x9c   : > { %3024 = vmatpush3.bf16.msra.mxu0 %v3229_v29  ;;  %3044 = vmatprep.subr.bf16.mxu1 %v3230_v59 }
  0x9d   : > { %3025 = vmatprep.subr.bf16.mxu0 %v3230_v59 }
  0x9f   : > { %3052 = vmatpush3.bf16.msra.mxu1 %v3230_v59 }
  0xa0   : > { %3026 = vmatpush3.bf16.msra.mxu0 %v3230_v59  ;;  %3045 = vmatprep.subr.bf16.mxu1 %v3231_v33 }
  0xa1   : > { %3027 = vmatprep.subr.bf16.mxu0 %v3231_v33 }
  0xa3   : > { %3053 = vmatpush3.bf16.msra.mxu1 %v3231_v33 }
  0xa4   : > { %3028 = vmatpush3.bf16.msra.mxu0 %v3231_v33  ;;  %3046 = vmatprep.subr.bf16.mxu1 %v3232_v14 }
  0xa5   : > { %3029 = vmatprep.subr.bf16.mxu0 %v3232_v14 }
  0xa7   : > { %3054 = vmatpush3.bf16.msra.mxu1 %v3232_v14 }
  0xa8   : > { %3030 = vmatpush3.bf16.msra.mxu0 %v3232_v14 }
  0xaa   : > { %3036 = vmatmul.mubr.msk.bf16.vlgmr.msra.gmra.mrb[8].mxu1 %vm2673_vm8, %v2674_v26 }
  0xab   : > { %3032 = vmatmul.mubr.msk.bf16.vlgmr.msra.gmra.mrb[0].mxu0 %vm3625_vm15, %v3675_v36  ;;  %vm2308_vm15 = vcmask 1040384  }
 0x15d   : > { %v2913_v17 = vpop.f32.mrb[0].mxu1 }
 0x15e   : > { %v1370_v27 = vpop.f32.mrb[1].mxu1 }
 0x15f   : > { %v2914_v28 = vpop.f32.mrb[2].mxu1 }
 0x160   : > { %v1373_v30 = vpop.f32.mrb[3].mxu1 }
 0x165   : > { %v2917_v31 = vpop.f32.mrb[4].mxu1 }
 0x166   : > { %v3013_v34 = vpop.f32.mrb[4].mxu0  ;;  %v1386_v37 = vpop.f32.mrb[5].mxu1 }
 0x167   : > { %v3059_v38 = vadd.f32 %v3013_v34, %v2917_v31  ;;  %v2062_v39 = vpop.f32.mrb[5].mxu0  ;;  %v2918_v40 = vpop.f32.mrb[6].mxu1 }
 0x168   : > { %v3061_v41 = vadd.f32 %v2062_v39, %v1386_v37  ;;  %v3014_v42 = vpop.f32.mrb[6].mxu0  ;;  %v1389_v43 = vpop.f32.mrb[7].mxu1 }
 0x169   : > { %v3063_v16 = vadd.f32 %v3014_v42, %v2918_v40  ;;  %v2065_v44 = vpop.f32.mrb[7].mxu0 }
 0x16a   : > { %v3065_v45 = vadd.f32 %v2065_v44, %v1389_v43 }
 0x17d   : > { %v3037_v4 = vpop.f32.mrb[8].mxu1 }
 0x17e   : > { %v3033_v36 = vpop.f32.mrb[0].mxu0  ;;  %v3060_v46 = vadd.f32 %v3059_v38, %v3037_v4  ;;  %v2243_v47 = vpop.f32.mrb[9].mxu1 }
 0x17f   : > { %v3055_v5 = vadd.f32 %v3033_v36, %v2913_v17  ;;  %v2227_v48 = vpop.f32.mrb[1].mxu0  ;;  %v3062_v22 = vadd.f32 %v3061_v41, %v2243_v47  ;;  %v3038_v49 = vpop.f32.mrb[10].mxu1 }
 0x180   : > { %2272 = vst [vmem:[%s455_s16 + $0x30] sm:$0xff] %v3060_v46  ;;  %v3056_v50 = vadd.f32 %v2227_v48, %v1370_v27  ;;  %v3034_v51 = vpop.f32.mrb[2].mxu0  ;;  %v3064_v52 = vadd.f32 %v3063_v16, %v3038_v49  ;;  %v2246_v53 = vpop.f32.mrb[11].mxu1  ;;  %v2293_v10 = vmul.f32 %v3060_v46, %v3060_v46 }
 0x181   : > { %2268 = vst [vmem:[%s455_s16 + $0x10] sm:$0xff] %v3055_v5  ;;  %2270 = vst [vmem:[%s455_s16 + $0x20] sm:$0xff] %v3062_v22  ;;  %v3057_v54 = vadd.f32 %v3034_v51, %v2914_v28  ;;  %v2230_v35 = vpop.f32.mrb[3].mxu0  ;;  %v3066_v55 = vadd.f32 %v3065_v45, %v2246_v53  ;;  %v2289_v61 = vmul.f32 %v3055_v5, %v3055_v5 }
 0x182   : > { %2266 = vst [vmem:[%s455_s16] sm:$0xff] %v3056_v50  ;;  %2273 = vst [vmem:[%s455_s16 + $0x38] sm:$0xff] %v3064_v52  ;;  %v3058_v56 = vadd.f32 %v2230_v35, %v1373_v30  ;;  %v2287_v57 = vmul.f32 %v3056_v50, %v3056_v50  ;;  %v2291_v3 = vmul.f32 %v3062_v22, %v3062_v22 }
 0x183   : > { %2269 = vst [vmem:[%s455_s16 + $0x18] sm:$0xff] %v3057_v54  ;;  %2271 = vst [vmem:[%s455_s16 + $0x28] sm:$0xff] %v3066_v55  ;;  %v2290_v0 = vmul.f32 %v3057_v54, %v3057_v54  ;;  %v2292_v9 = vmul.f32 %v3066_v55, %v3066_v55  ;;  %v2294_v1 = vmul.f32 %v3064_v52, %v3064_v52 }
 0x184   : > { %2267 = vst [vmem:[%s455_s16 + $0x8] sm:$0xff] %v3058_v56  ;;  %v2274_v58 = vadd.f32 %v3058_v56, %v3056_v50  ;;  %v2288_v60 = vmul.f32 %v3058_v56, %v3058_v56 }
 0x186   : > { %v2275_v62 = vadd.f32 %v3055_v5, %v2274_v58  ;;  %v2295_v63 = vadd.f32 %v2288_v60, %v2287_v57 }
 0x188   : > { %v2296_v2 = vadd.f32 %v2295_v63, %v2289_v61  ;;  %v2276_v32 = vadd.f32 %v3057_v54, %v2275_v62 }
 0x18a   : > { %v2277_v6 = vadd.f32 %v3062_v22, %v2276_v32  ;;  %v2297_v7 = vadd.f32 %v2296_v2, %v2290_v0 }
 0x18c   : > { %v2278_v8 = vadd.f32 %v3066_v55, %v2277_v6  ;;  %v2298_v12 = vadd.f32 %v2297_v7, %v2291_v3 }
 0x18e   : > { %v2279_v11 = vadd.f32 %v3060_v46, %v2278_v8  ;;  %v2299_v15 = vadd.f32 %v2298_v12, %v2292_v9 }
 0x190   : > { %v2280_v18 = vadd.f32 %v3064_v52, %v2279_v11  ;;  %v2300_v19 = vadd.f32 %v2299_v15, %v2293_v10 }
 0x192   : > { %v2281_v20 = vrot.slane %v2280_v18, 4  ;;  %v2301_v21 = vadd.f32 %v2300_v19, %v2294_v1 }
 0x194   : > { %v2282_v25 = vadd.f32 %v2281_v20, %v2280_v18  ;;  %v2302_v24 = vrot.slane %v2301_v21, 4 }
 0x196   : > { %v2283_v29 = vrot.slane %v2282_v25, 2  ;;  %v2303_v59 = vadd.f32 %v2302_v24, %v2301_v21 }
 0x198   : > { %v2284_v33 = vadd.f32 %v2283_v29, %v2282_v25  ;;  %v2304_v14 = vrot.slane %v2303_v59, 2 }
 0x19a   : > { %v2285_v13 = vrot.slane %v2284_v33, 1  ;;  %v2305_v23 = vadd.f32 %v2304_v14, %v2303_v59 }
 0x19c   : > { %v2306_v26 = vrot.slane %v2305_v23, 1  ;;  %v2286_v17 = vadd.f32 %v2285_v13, %v2284_v33 }
 0x19e   : > { %v2307_v27 = vadd.f32 %v2306_v26, %v2305_v23 }
 0x1a0   : > { %v2309_v28 = vsel %vm2308_vm15, %v2286_v17, %v2307_v27 }
 0x1a1   : > { %2310 = vst [vmem:[%s466_s15] sm:$0x3] %v2309_v28 }
 0x1a2 PF: > { %s18_s28 = sadd.s32 1, %s3271_s28   ;;  %s3971_s24 = smov %s3263_s26 }
 0x1a3   : > { %p15_p0 = scmp.ge.s32.totalorder %s18_s28, 10   ;;  %s3972_s25 = smov %s3267_s27 }
 0x1a4   : > { %s3973_s26 = smov %s3976_s29  ;;  %s3974_s27 = smov %s3980_s30 }
 0x1a5   :  { %17 = sbr.rel (!%p15_p0) target bundleno = 3 (0x3), region = 92 }

// kernel: resblock_forward.3
= control target key start
LH: loop header
LB: loop body
LE: loop exit
PB: predicated region body
PF: predicated region fallthrough
CT: control target
= control target key end

     0   :  { %s3632_s24 = smov 0   ;;  %s3634_s25 = smov 0   ;;  %s4256_s0 = inlined_call_operand.vmem [shape: bf16[512,128], index: 0, kind: input, shape index: {}, may-alias: {0,1,2}]   ;;  %s4257_s1 = inlined_call_operand.vmem [shape: bf16[512,128], index: 1, kind: input, shape index: {}, may-alias: {0,1,2}]   ;;  %s4258_s2 = inlined_call_operand.vmem [shape: bf16[512,128], index: 2, kind: input, shape index: {}, may-alias: {0,1,2}]   ;;  %s4259_s3 = inlined_call_operand.vmem [shape: bf16[1152,128], index: 3, kind: input, shape index: {}]   ;;  %s4260_s4 = inlined_call_operand.vmem [shape: bf16[128,128], index: 4, kind: input, shape index: {}]   ;;  %s4261_s5 = inlined_call_operand.vmem [shape: bf16[512,128], index: 5, kind: output, shape index: {0}]   ;;  %s4262_s6 = inlined_call_operand.vmem [shape: f32[512,128], index: 6, kind: output, shape index: {1}]   ;;  %s4263_s7 = inlined_call_operand.vmem [shape: f32[2,4,4,128], index: 7, kind: output, shape index: {2}]  }
   0x1   :  { %s3636_s26 = smov 0   ;;  %s3638_s27 = smov 0  }
   0x2   :  { %s3640_s28 = smov 0  }
   0x3 LB: > { %s27_s29 = sadd.s32 1, %s3580_s26  ;;  %s30_s30 = sadd.s32 1, %s3584_s27  ;;  %s3588_s28 = sphi %s3640_s28, %s18_s28   ;;  %s3584_s27 = sphi %s3638_s27, %s4304_s27   ;;  %s3580_s26 = sphi %s3636_s26, %s4303_s26   ;;  %s3576_s25 = sphi %s3634_s25, %s4302_s25   ;;  %s3572_s24 = sphi %s3632_s24, %s4301_s24  }
   0x4   : > { %p28_p0 = scmp.ge.s32.totalorder %s27_s29, 4  ;;  %p2720_p1 = scmp.ge.s32.totalorder %s3588_s28, 1 }
   0x5   : > { %p343_p2 = scmp.lt.s32.totalorder %s3588_s28, 9 }
   0x6   : > { %s4306_s29 = smov (%p28_p0, %s27_s29), 0  ;;  %s4308_s30 = smov (!%p28_p0, %s30_s30), %s3584_s27 }
   0x7   : > { %p344_p3 = pnand %p2720_p1, %p343_p2  ;;  %p32_p4 = scmp.ge.s32.totalorder %s4308_s30, 2 }
   0x8   : > { %v3460_v0 = vld [vmem:[%s4259_s3 + $0x40] sm:$0xff] (!%p344_p3)   ;;  %s2721_s10 = sshll.u32 (!%p344_p3), %s3576_s25, 4  ;;  %s2722_s13 = sshll.u32 (!%p344_p3), %s3572_s24, 2  ;;  %v3462_v2 = vld [vmem:[%s4259_s3 + $0x48] sm:$0xff] (!%p344_p3)   ;;  %v3464_v4 = vld [vmem:[%s4259_s3 + $0x50] sm:$0xff] (!%p344_p3)   ;;  %v3590_v17 = vmov (!%p344_p3), 0.0   ;;  %v529_v21 = vlaneseq (!%p344_p3) }
   0x9   : > { %s4310_s30 = smov (%p32_p4, %s4308_s30), 0  ;;  %347 = sbr.rel (%p344_p3) target bundleno = 420 (0x1a4), region = 40 }
   0xa   : > { %v3461_v1 = vld [vmem:[%s4259_s3 + $0x100] sm:$0xff] (!%p344_p3)   ;;  %3114 = vmatprep.subr.bf16.mxu1 (!%p344_p3), %v3460_v0  ;;  %s418_s16 = sadd.s32 (!%p344_p3), %s2722_s13, %s2721_s10  ;;  %v3463_v3 = vld [vmem:[%s4259_s3 + $0x108] sm:$0xff] (!%p344_p3)   ;;  %v3465_v5 = vld [vmem:[%s4259_s3 + $0x110] sm:$0xff] (!%p344_p3)   ;;  %p634_p7 = scmp.eq.s32.totalorder (!%p344_p3), %s3572_s24, 0  ;;  %491 = vst [vmem:[#allocation2] sm:$0xff] (!%p344_p3), %v3590_v17  ;;  %v3754_v26 = vshrl.u32 (!%p344_p3), %v529_v21, 7 }
   0xb   : > { %3210 = vmatprep.subr.bf16.mxu0 (!%p344_p3), %v3461_v1  ;;  %3115 = vmatpush3.bf16.msra.mxu1 (!%p344_p3), %v3460_v0  ;;  %s2723_s19 = sadd.s32 (!%p344_p3), 4294967295, %s418_s16  ;;  %v3466_v6 = vld [vmem:[%s4259_s3 + $0x58] sm:$0xff] (!%p344_p3)   ;;  %v3468_v8 = vld [vmem:[%s4259_s3 + $0x60] sm:$0xff] (!%p344_p3)   ;;  %s2726_s23 = sshll.u32 (!%p344_p3), %s3576_s25, 2  ;;  %v3470_v10 = vld [vmem:[%s4259_s3 + $0x68] sm:$0xff] (!%p344_p3)   ;;  %528 = vst [vmem:[#allocation2 + $0x68] sm:$0xff] (!%p344_p3), %v3590_v17 }
   0xc   : > { %3211 = vmatpush3.bf16.msra.mxu0 (!%p344_p3), %v3461_v1  ;;  %3116 = vmatprep.subr.bf16.mxu1 (!%p344_p3), %v3462_v2  ;;  %p420_p5 = scmp.gt.s32.totalorder (!%p344_p3), %s2723_s19, 0  ;;  %v3467_v7 = vld [vmem:[%s4259_s3 + $0x118] sm:$0xff] (!%p344_p3)   ;;  %v3469_v9 = vld [vmem:[%s4259_s3 + $0x120] sm:$0xff] (!%p344_p3)   ;;  %v3471_v12 = vld [vmem:[%s4259_s3 + $0x128] sm:$0xff] (!%p344_p3)   ;;  %v542_v33 = vand.u32 (!%p344_p3), 15, %v3754_v26  ;;  %v531_v34 = vadd.s32 (!%p344_p3), 8, %v3754_v26 }
   0xd   : > { %3212 = vmatprep.subr.bf16.mxu0 (!%p344_p3), %v3463_v3  ;;  %v3472_v18 = vld [vmem:[%s4259_s3 + $0x70] sm:$0xff] (!%p344_p3)   ;;  %v3474_v22 = vld [vmem:[%s4259_s3 + $0x78] sm:$0xff] (!%p344_p3)   ;;  %v3477_v31 = vld [vmem:[%s4259_s3] sm:$0xff] (!%p344_p3)   ;;  %vm3591_vm9 = vmmov (!%p344_p3), 1   ;;  %v532_v59 = vadd.s32 (!%p344_p3), 16, %v3754_v26  ;;  %v533_v61 = vadd.s32 (!%p344_p3), 24, %v3754_v26 }
   0xe   : > { %v3473_v19 = vld [vmem:[%s4259_s3 + $0x130] sm:$0xff] (!%p344_p3)   ;;  %v3475_v23 = vld [vmem:[%s4259_s3 + $0x138] sm:$0xff] (!%p344_p3)   ;;  %v3478_v32 = vld [vmem:[%s4259_s3 + $0x140] sm:$0xff] (!%p344_p3)   ;;  %vm3787_vm3 = vcmp.eq.s32.totalorder (!%p344_p3), %v542_v33, 0  ;;  %v549_v44 = vand.u32 (!%p344_p3), 15, %v531_v34  ;;  %v534_v63 = vadd.s32 (!%p344_p3), 32, %v3754_v26 }
   0xf   : > { %3117 = vmatpush3.bf16.msra.mxu1 (!%p344_p3), %v3462_v2  ;;  %v3479_v35 = vld [vmem:[%s4259_s3 + $0x8] sm:$0xff] (!%p344_p3)   ;;  %v3481_v45 = vld [vmem:[%s4259_s3 + $0x10] sm:$0xff] (!%p344_p3)   ;;  %v3483_v52 = vld [vmem:[%s4259_s3 + $0x18] sm:$0xff] (!%p344_p3)   ;;  %v556_v0 = vand.u32 (!%p344_p3), 15, %v532_v59  ;;  %v536_v1 = vadd.s32 (!%p344_p3), 48, %v3754_v26  ;;  %p654_p11 = scmp.eq.s32.totalorder (!%p344_p3), %s3572_s24, 3 }
  0x10   : > { %s4312_s19 = smov (!%p420_p5, %s2723_s19), 0  ;;  %3213 = vmatpush3.bf16.msra.mxu0 %v3463_v3  ;;  %3118 = vmatprep.subr.bf16.mxu1 %v3464_v4  ;;  %v3480_v37 = vld [vmem:[%s4259_s3 + $0x148] sm:$0xff]   ;;  %v3482_v46 = vld [vmem:[%s4259_s3 + $0x150] sm:$0xff]   ;;  %vm3807_vm5 = vcmp.eq.s32.totalorder %v549_v44, 15  ;;  %v3484_v53 = vld [vmem:[%s4259_s3 + $0x158] sm:$0xff]   ;;  %v563_v3 = vand.u32 15, %v533_v61 }
  0x11   : > { %s2724_s11 = sshll.u32 %s4312_s19, 1  ;;  %3214 = vmatprep.subr.bf16.mxu0 %v3465_v5  ;;  %vm2844_vm7 = vmneg %vm3807_vm5  ;;  %v3485_v57 = vld [vmem:[%s4259_s3 + $0x20] sm:$0xff]   ;;  %v3487_v60 = vld [vmem:[%s4259_s3 + $0x28] sm:$0xff]   ;;  %vm3871_vm11 = vcmp.ne.s32.totalorder %v556_v0, 0  ;;  %p482_p12 = scmp.lt.s32.totalorder %s3576_s25, 1 }
  0x12   : > { %p423_p6 = scmp.lt.s32.totalorder %s2724_s11, 63  ;;  %vm3833_vm10 = vmpackc.low %vm2844_vm7, %vm3591_vm9  ;;  %v3486_v58 = vld [vmem:[%s4259_s3 + $0x160] sm:$0xff]   ;;  %v3488_v62 = vld [vmem:[%s4259_s3 + $0x168] sm:$0xff]   ;;  %vm3881_vm12 = vcmp.ne.s32.totalorder %v563_v3, 15  ;;  %p484_p13 = scmp.lt.s32.totalorder %s3572_s24, 3 }
  0x13   : > { %3119 = vmatpush3.bf16.msra.mxu1 %v3464_v4  ;;  %s643_s12 = scalar_select %p634_p7, 1, 0  ;;  %v3489_v2 = vld [vmem:[%s4259_s3 + $0x30] sm:$0xff]   ;;  %v537_v4 = vadd.s32 56, %v3754_v26  ;;  %v3493_v21 = vld [vmem:[%s4259_s3 + $0x80] sm:$0xff]   ;;  %vm3892_vm13 = vmpackc.low %vm3591_vm9, %vm3871_vm11 }
  0x14   : > { %s4314_s11 = smov (!%p423_p6, %s2724_s11), 63  ;;  %3215 = vmatpush3.bf16.msra.mxu0 %v3465_v5  ;;  %3120 = vmatprep.subr.bf16.mxu1 %v3466_v6  ;;  %v3490_v5 = vld [vmem:[%s4259_s3 + $0x170] sm:$0xff]   ;;  %vm3902_vm15 = vmpackc.low %vm3881_vm12, %vm3591_vm9  ;;  %v3500_v61 = vld [vmem:[%s4259_s3 + $0x198] sm:$0xff]   ;;  %s4322_s25 = smov (!%p482_p12, %s3576_s25), 1 }
  0x15   : > { %3216 = vmatprep.subr.bf16.mxu0 %v3467_v7  ;;  %s2725_s19 = sshll.u32 %s4314_s11, 2  ;;  %s435_s11 = sadd.s32 %s3572_s24, %s2726_s23  ;;  %v644_v15 = vstv %s643_s12  ;;  %v3502_v20 = vld [vmem:[%s4259_s3 + $0x1a0] sm:$0xff]   ;;  %v3503_v0 = vld [vmem:[%s4259_s3 + $0xa8] sm:$0xff]   ;;  %v3506_v3 = vld [vmem:[%s4259_s3 + $0x1b0] sm:$0xff]  }
  0x16   : > { %s426_s22 = scalar_lea.vmem %s4256_s0, %s2725_s19  ;;  %s2727_s16 = sshll.u32 %s435_s11, 3  ;;  %vm3720_vm0 = vcmp.eq.s32.totalorder %v644_v15, 1  ;;  %v3531_v33 = vld [vmem:[%s4259_s3 + $0x218] sm:$0xff]   ;;  %v3539_v56 = vld [vmem:[%s4260_s4 + $0x30] sm:$0xff]  }
  0x17   : > { %3121 = vmatpush3.bf16.msra.mxu1 %v3466_v6  ;;  %v2960_v11 = vld [vmem:[%s426_s22] sm:$0xff]   ;;  %p437_p8 = scmp.lt.s32.totalorder %s2727_s16, 63  ;;  %vm2749_vm1 = vmneg %vm3720_vm0  ;;  %s2950_s11 = sadd.s32 4, %s2722_s13  ;;  %v535_v6 = vadd.s32 40, %v3754_v26 }
  0x18   : > { %3217 = vmatpush3.bf16.msra.mxu0 %v3467_v7  ;;  %3122 = vmatprep.subr.bf16.mxu1 %v3468_v8  ;;  %v2961_v13 = vunpack.c.l.bf16 %v2960_v11  ;;  %v2962_v14 = vunpack.c.h.bf16 %v2960_v11  ;;  %v3476_v16 = vld [vmem:[%s426_s22] sm:$0xff]  ;;  %vm2751_vm2 = vmpackc.low %vm2749_vm1, %vm2749_vm1  ;;  %s447_s13 = sadd.s32 %s2950_s11, %s2721_s10  ;;  %v570_v7 = vand.u32 15, %v534_v63  ;;  %v3492_v11 = vld [vmem:[%s4259_s3 + $0x178] sm:$0xff]   ;;  %s4324_s24 = smov (!%p484_p13, %s3572_s24), 3 }
  0x19   : > { %3218 = vmatprep.subr.bf16.mxu0 %v3469_v9  ;;  %s4316_s16 = smov (!%p437_p8, %s2727_s16), 63  ;;  %3130 = vmatprep.mubr.msk.bf16.mxu1 %vm2751_vm2, %v3476_v16  ;;  %p448_p9 = scmp.lt.s32.totalorder %s447_s13, 31  ;;  %vm698_vm4 = vmor %vm3720_vm0, %vm3787_vm3  ;;  %v577_v17 = vand.u32 15, %v535_v6  ;;  %v3494_v26 = vld [vmem:[%s4259_s3 + $0x180] sm:$0xff]  }
  0x1a   : > { %496 = vst [vmem:[#allocation2 + $0x8] sm:$0xff] %v2961_v13  ;;  %497 = vst [vmem:[#allocation2 + $0x10] sm:$0xff] %v2962_v14  ;;  %s2728_s21 = sshll.u32 %s4316_s16, 2  ;;  %v591_v14 = vand.u32 15, %v537_v4  ;;  %vm2991_vm14 = vcmp.ne.s32.totalorder %v570_v7, 0  ;;  %v3501_v63 = vld [vmem:[%s4259_s3 + $0xa0] sm:$0xff]  }
  0x1b   : > { %3123 = vmatpush3.bf16.msra.mxu1 %v3468_v8  ;;  %s3741_s12 = scalar_lea.vmem %s4257_s1, %s2728_s21  ;;  %s4318_s13 = smov (!%p448_p9, %s447_s13), 31  ;;  %vm2763_vm6 = vmneg %vm698_vm4  ;;  %vm2993_vm7 = vcmp.ne.s32.totalorder %v577_v17, 15  ;;  %v3507_v4 = vld [vmem:[%s4259_s3 + $0xb8] sm:$0xff]   ;;  %v3509_v7 = vld [vmem:[%s4259_s3 + $0xc0] sm:$0xff]  }
  0x1c   : > { %3219 = vmatpush3.bf16.msra.mxu0 %v3469_v9  ;;  %3124 = vmatprep.subr.bf16.mxu1 %v3470_v10  ;;  %v3749_v24 = vld [vmem:[%s3741_s12] sm:$0xff]   ;;  %v3752_v25 = vld [vmem:[%s3741_s12 + $0x8] sm:$0xff]   ;;  %v3775_v36 = vld [vmem:[%s3741_s12 + $0x10] sm:$0xff]   ;;  %s2731_s11 = sshll.u32 %s4318_s13, 1  ;;  %v584_v9 = vand.u32 15, %v536_v1  ;;  %vm3910_vm4 = vcmp.eq.s32.totalorder %v591_v14, 15  ;;  %s4223_s8 = scalar_lea.vmem %s4261_s5, %s2728_s21 }
  0x1d   : > { %3220 = vmatprep.subr.bf16.mxu0 %v3471_v12  ;;  %v506_v27 = vunpack.c.l.bf16 %v3749_v24  ;;  %v507_v28 = vunpack.c.h.bf16 %v3749_v24  ;;  %v508_v29 = vunpack.c.l.bf16 %v3752_v25  ;;  %v509_v30 = vunpack.c.h.bf16 %v3752_v25  ;;  %3226 = vmatprep.mubr.bf16.mxu0 %v3749_v24  ;;  %v3783_v40 = vld [vmem:[%s3741_s12 + $0x18] sm:$0xff]   ;;  %p3821_p10 = scmp.lt.s32.totalorder %s2731_s11, 63  ;;  %vm2764_vm8 = vmpackc.low %vm2749_vm1, %vm2763_vm6  ;;  %v3504_v1 = vld [vmem:[%s4259_s3 + $0x1a8] sm:$0xff]   ;;  %s2738_s19 = sshll.u32 %s4316_s16, 3 }
  0x1e   : > { %v510_v38 = vunpack.c.l.bf16 %v3775_v36  ;;  %v511_v39 = vunpack.c.h.bf16 %v3775_v36  ;;  %v512_v41 = vunpack.c.l.bf16 %v3783_v40  ;;  %v513_v42 = vunpack.c.h.bf16 %v3783_v40  ;;  %vm3915_vm6 = vmpackc.low %vm3591_vm9, %vm2991_vm14  ;;  %s663_s9 = scalar_select %p654_p11, 1, 0 }
  0x1f   : > { %3125 = vmatpush3.bf16.msra.mxu1 %v3470_v10  ;;  %514 = vst [vmem:[#allocation2 + $0x18] sm:$0xff] %v506_v27  ;;  %515 = vst [vmem:[#allocation2 + $0x20] sm:$0xff] %v507_v28  ;;  %s4320_s11 = smov (!%p3821_p10, %s2731_s11), 63  ;;  %v3491_v10 = vld [vmem:[%s4259_s3 + $0x38] sm:$0xff]   ;;  %vm3906_vm2 = vcmp.eq.s32.totalorder %v584_v9, 0  ;;  %v3510_v9 = vld [vmem:[%s4259_s3 + $0x1c0] sm:$0xff]  }
  0x20   : > { %3221 = vmatpush3.bf16.msra.mxu0 %v3471_v12  ;;  %3126 = vmatprep.subr.bf16.mxu1 %v3472_v18  ;;  %516 = vst [vmem:[#allocation2 + $0x28] sm:$0xff] %v508_v29  ;;  %517 = vst [vmem:[#allocation2 + $0x30] sm:$0xff] %v509_v30  ;;  %s2732_s17 = sshll.u32 %s4320_s11, 2  ;;  %v664_v6 = vstv %s663_s9  ;;  %v3517_v28 = vld [vmem:[%s4259_s3 + $0xe0] sm:$0xff]   ;;  %s4212_s11 = scalar_lea.vmem %s4262_s6, %s2738_s19 }
  0x21   : > { %3222 = vmatprep.subr.bf16.mxu0 %v3473_v19  ;;  %518 = vst [vmem:[#allocation2 + $0x38] sm:$0xff] %v510_v38  ;;  %519 = vst [vmem:[#allocation2 + $0x40] sm:$0xff] %v511_v39  ;;  %v690_v47 = vld [vmem:[#allocation2 + $0x7] sm:$0xff]  ;;  %v691_v49 = vld [vmem:[#allocation2 + $0xf] sm:$0xff]  ;;  %s3869_s23 = scalar_lea.vmem %s4258_s2, %s2732_s17  ;;  %s2739_s16 = sshll.u32 %s4322_s25, 2 }
  0x22   : > { %520 = vst [vmem:[#allocation2 + $0x48] sm:$0xff] %v512_v41  ;;  %521 = vst [vmem:[#allocation2 + $0x50] sm:$0xff] %v513_v42  ;;  %v2765_v54 = vpack.c.bf16 %v691_v49, %v690_v47  ;;  %v2964_v13 = vld [vmem:[%s3869_s23] sm:$0xff]   ;;  %v3496_v39 = vld [vmem:[%s4259_s3 + $0x188] sm:$0xff]   ;;  %s487_s21 = sadd.s32 %s2739_s16, %s4324_s24 }
  0x23   : > { %3127 = vmatpush3.bf16.msra.mxu1 %v3472_v18  ;;  %v2965_v18 = vunpack.c.l.bf16 %v2964_v13  ;;  %vm2800_vm11 = vmneg %vm3910_vm4  ;;  %v3497_v49 = vld [vmem:[%s4259_s3 + $0x90] sm:$0xff]   ;;  %v3536_v47 = vld [vmem:[%s4260_s4 + $0x28] sm:$0xff]   ;;  %s2740_s12 = sshll.u32 %s487_s21, 2 }
  0x24   : > { %3223 = vmatpush3.bf16.msra.mxu0 %v3473_v19  ;;  %3128 = vmatprep.subr.bf16.mxu1 %v3474_v22  ;;  %v2966_v19 = vunpack.c.h.bf16 %v2964_v13  ;;  %vm3934_vm12 = vmpackc.low %vm2993_vm7, %vm3591_vm9  ;;  %v3512_v13 = vld [vmem:[%s4259_s3 + $0x1c8] sm:$0xff]   ;;  %s489_s9 = scalar_lea.vmem %s4263_s7, %s2740_s12 }
  0x25   : > { %3224 = vmatprep.subr.bf16.mxu0 %v3475_v23  ;;  %526 = vst [vmem:[#allocation2 + $0x58] sm:$0xff] %v2965_v18  ;;  %vm3954_vm7 = vmpackc.low %vm2800_vm11, %vm3591_vm9  ;;  %v3514_v18 = vld [vmem:[%s4259_s3 + $0x1d0] sm:$0xff]  }
  0x26   : > { %v1531_v50 = vld [vmem:[#allocation2 + $0x19] sm:$0xff]  ;;  %527 = vst [vmem:[#allocation2 + $0x60] sm:$0xff] %v2966_v19  ;;  %v1029_v59 = vld [vmem:[#allocation2 + $0x11] sm:$0xff]  ;;  %vm2812_vm11 = vmneg %vm3787_vm3 }
  0x27   : > { %3129 = vmatpush3.bf16.msra.mxu1 %v3474_v22  ;;  %v1532_v51 = vld [vmem:[#allocation2 + $0x21] sm:$0xff]  ;;  %v692_v15 = vld [vmem:[#allocation2 + $0x17] sm:$0xff]  ;;  %vm3996_vm3 = vmpackc.low %vm3591_vm9, %vm2812_vm11 }
  0x28   : > { %3225 = vmatpush3.bf16.msra.mxu0 %v3475_v23  ;;  %3138 = vmatprep.subr.bf16.mxu1 %v3477_v31  ;;  %v3829_v55 = vpack.c.bf16 %v1532_v51, %v1531_v50  ;;  %v693_v16 = vld [vmem:[#allocation2 + $0x1f] sm:$0xff]  ;;  %v1533_v23 = vld [vmem:[#allocation2 + $0x29] sm:$0xff]  ;;  %v1534_v29 = vld [vmem:[#allocation2 + $0x31] sm:$0xff] }
  0x29   : > { %3234 = vmatprep.subr.bf16.mxu0 %v3478_v32  ;;  %v694_v30 = vld [vmem:[#allocation2 + $0x27] sm:$0xff]  ;;  %v3919_v34 = vpack.c.bf16 %v693_v16, %v692_v15  ;;  %v3926_v38 = vpack.c.bf16 %v1534_v29, %v1533_v23  ;;  %v1709_v12 = vld [vmem:[#allocation2 + $0x4f] sm:$0xff]  ;;  %v3515_v23 = vld [vmem:[%s4259_s3 + $0xd8] sm:$0xff]  }
  0x2a   : > { %3131 = vmatmul.mubr.bf16.vlgmr.msra.gmra.mrb[0].mxu1 %v3749_v24  ;;  %v1536_v41 = vld [vmem:[#allocation2 + $0x41] sm:$0xff]  ;;  %v3513_v16 = vld [vmem:[%s4259_s3 + $0xd0] sm:$0xff]  }
  0x2b   : > { %3139 = vmatpush3.bf16.msra.mxu1 %v3477_v31  ;;  %3227 = vmatmul.mubr.bf16.vlgmr.msra.gmra.mrb[0].mxu0 %v3752_v25  ;;  %v695_v31 = vld [vmem:[#allocation2 + $0x2f] sm:$0xff]  ;;  %v3518_v29 = vld [vmem:[%s4259_s3 + $0x1e0] sm:$0xff]  }
  0x2c   : > { %3235 = vmatpush3.bf16.msra.mxu0 %v3478_v32  ;;  %3140 = vmatprep.subr.bf16.mxu1 %v3479_v35  ;;  %v3938_v44 = vpack.c.bf16 %v695_v31, %v694_v30  ;;  %v3519_v30 = vld [vmem:[%s4259_s3 + $0xe8] sm:$0xff]   ;;  %v3521_v32 = vld [vmem:[%s4259_s3 + $0xf0] sm:$0xff]   ;;  %v3537_v22 = vld [vmem:[%s3869_s23] sm:$0xff] }
  0x2d   : > { %3236 = vmatprep.subr.bf16.mxu0 %v3480_v37  ;;  %3134 = vmatprep.mubr.bf16.mxu1 %v3752_v25  ;;  %v1711_v17 = vld [vmem:[#allocation2 + $0x5f] sm:$0xff]  ;;  %v3520_v31 = vld [vmem:[%s4259_s3 + $0x1e8] sm:$0xff]   ;;  %v3529_v51 = vld [vmem:[%s4259_s3 + $0x210] sm:$0xff]  }
  0x2e   : > { %3230 = vmatprep.mubr.bf16.mxu0 %v3775_v36 }
  0x2f   : > { %3141 = vmatpush3.bf16.msra.mxu1 %v3479_v35  ;;  %v3495_v35 = vld [vmem:[%s4259_s3 + $0x88] sm:$0xff]  }
  0x30   : > { %3237 = vmatpush3.bf16.msra.mxu0 %v3480_v37  ;;  %3142 = vmatprep.subr.bf16.mxu1 %v3481_v45  ;;  %v1535_v37 = vld [vmem:[#allocation2 + $0x39] sm:$0xff] }
  0x31   : > { %3238 = vmatprep.subr.bf16.mxu0 %v3482_v46  ;;  %v3951_v50 = vpack.c.bf16 %v1536_v41, %v1535_v37  ;;  %v3524_v37 = vld [vmem:[%s4259_s3 + $0x1f8] sm:$0xff]   ;;  %v3525_v41 = vld [vmem:[%s4259_s3 + $0x200] sm:$0xff]  }
  0x32   : > { %3135 = vmatmul.mubr.bf16.gmra.mrb[4].mxu1 %v3775_v36 }
  0x33   : > { %3143 = vmatpush3.bf16.msra.mxu1 %v3481_v45  ;;  %3231 = vmatmul.mubr.bf16.gmra.mrb[4].mxu0 %v3783_v40  ;;  %v696_v45 = vld [vmem:[#allocation2 + $0x37] sm:$0xff] }
  0x34   : > { %3239 = vmatpush3.bf16.msra.mxu0 %v3482_v46  ;;  %3144 = vmatprep.subr.bf16.mxu1 %v3483_v52  ;;  %v697_v46 = vld [vmem:[#allocation2 + $0x3f] sm:$0xff] }
  0x35   : > { %3240 = vmatprep.subr.bf16.mxu0 %v3484_v53  ;;  %3154 = vmatprep.mubr.msk.bf16.mxu1 %vm2764_vm8, %v2765_v54  ;;  %vm2775_vm8 = vmneg %vm3906_vm2  ;;  %v1538_v54 = vld [vmem:[#allocation2 + $0x51] sm:$0xff]  ;;  %v3977_v48 = vpack.c.bf16 %v697_v46, %v696_v45  ;;  %v3528_v45 = vld [vmem:[%s4260_s4 + $0x8] sm:$0xff]  }
  0x36   : > { %3250 = vmatprep.mubr.msk.bf16.mxu0 %vm3833_vm10, %v3829_v55  ;;  %vm3941_vm14 = vmpackc.low %vm3591_vm9, %vm2775_vm8  ;;  %v3527_v46 = vld [vmem:[%s4259_s3 + $0x208] sm:$0xff]  }
  0x37   : > { %3145 = vmatpush3.bf16.msra.mxu1 %v3483_v52  ;;  %v1537_v52 = vld [vmem:[#allocation2 + $0x49] sm:$0xff]  ;;  %vm1037_vm8 = vmor %vm3720_vm0, %vm3807_vm5  ;;  %vm4031_vm0 = vcmp.eq.s32.totalorder %v664_v6, 1 }
  0x38   : > { %3241 = vmatpush3.bf16.msra.mxu0 %v3484_v53  ;;  %3146 = vmatprep.subr.bf16.mxu1 %v3485_v57  ;;  %v3498_v53 = vld [vmem:[%s4259_s3 + $0x190] sm:$0xff]   ;;  %vm2787_vm5 = vmneg %vm1037_vm8 }
  0x39   : > { %3242 = vmatprep.subr.bf16.mxu0 %v3486_v58  ;;  %vm2789_vm8 = vmpackc.low %vm2787_vm5, %vm2749_vm1 }
  0x3a   : > { %vm1718_vm1 = vmor %vm4031_vm0, %vm3906_vm2 }
  0x3b   : > { %3147 = vmatpush3.bf16.msra.mxu1 %v3485_v57  ;;  %v1028_v57 = vld [vmem:[#allocation2 + $0x9] sm:$0xff]  ;;  %vm2880_vm9 = vmneg %vm4031_vm0 }
  0x3c   : > { %3243 = vmatpush3.bf16.msra.mxu0 %v3486_v58  ;;  %3148 = vmatprep.subr.bf16.mxu1 %v3487_v60  ;;  %v3499_v58 = vld [vmem:[%s4259_s3 + $0x98] sm:$0xff]   ;;  %vm4055_vm5 = vmneg %vm1718_vm1 }
  0x3d   : > { %3244 = vmatprep.subr.bf16.mxu0 %v3488_v62  ;;  %vm2073_vm2 = vmor %vm4031_vm0, %vm3910_vm4 }
  0x3e   : > { %vm2918_vm11 = vmneg %vm2073_vm2 }
  0x3f   : > { %3149 = vmatpush3.bf16.msra.mxu1 %v3487_v60  ;;  %v3979_v60 = vpack.c.bf16 %v1538_v54, %v1537_v52  ;;  %vm2882_vm4 = vmpackc.low %vm2880_vm9, %vm4055_vm5  ;;  %v3534_v52 = vld [vmem:[%s4260_s4 + $0x20] sm:$0xff]   ;;  %v3535_v54 = vld [vmem:[%s4259_s3 + $0x228] sm:$0xff]  }
  0x40   : > { %3245 = vmatpush3.bf16.msra.mxu0 %v3488_v62  ;;  %3150 = vmatprep.subr.bf16.mxu1 %v3489_v2  ;;  %v2790_v62 = vpack.c.bf16 %v1029_v59, %v1028_v57  ;;  %v3540_v57 = vld [vmem:[%s4259_s3 + $0x238] sm:$0xff]  }
  0x41   : > { %3246 = vmatprep.subr.bf16.mxu0 %v3490_v5 }
  0x43   : > { %3151 = vmatpush3.bf16.msra.mxu1 %v3489_v2  ;;  %v3505_v2 = vld [vmem:[%s4259_s3 + $0xb0] sm:$0xff]  }
  0x44   : > { %3247 = vmatpush3.bf16.msra.mxu0 %v3490_v5  ;;  %3152 = vmatprep.subr.bf16.mxu1 %v3491_v10  ;;  %v3508_v5 = vld [vmem:[%s4259_s3 + $0x1b8] sm:$0xff]  }
  0x45   : > { %3248 = vmatprep.subr.bf16.mxu0 %v3492_v11 }
  0x47   : > { %3153 = vmatpush3.bf16.msra.mxu1 %v3491_v10  ;;  %v1708_v10 = vld [vmem:[#allocation2 + $0x47] sm:$0xff] }
  0x48   : > { %3249 = vmatpush3.bf16.msra.mxu0 %v3492_v11  ;;  %3162 = vmatprep.subr.bf16.mxu1 %v3493_v21  ;;  %v3511_v11 = vld [vmem:[%s4259_s3 + $0xc8] sm:$0xff]   ;;  %v4053_v14 = vpack.c.bf16 %v1709_v12, %v1708_v10 }
  0x49   : > { %3258 = vmatprep.subr.bf16.mxu0 %v3494_v26 }
  0x4a   : > { %3155 = vmatmul.mubr.msk.bf16.vlgmr.msra.gmra.mrb[0].mxu1 %vm3892_vm13, %v3919_v34 }
  0x4b   : > { %3163 = vmatpush3.bf16.msra.mxu1 %v3493_v21  ;;  %3251 = vmatmul.mubr.msk.bf16.vlgmr.msra.gmra.mrb[0].mxu0 %vm3902_vm15, %v3926_v38 }
  0x4c   : > { %3259 = vmatpush3.bf16.msra.mxu0 %v3494_v26  ;;  %3164 = vmatprep.subr.bf16.mxu1 %v3495_v35  ;;  %v3516_v26 = vld [vmem:[%s4259_s3 + $0x1d8] sm:$0xff]  }
  0x4d   : > { %3260 = vmatprep.subr.bf16.mxu0 %v3496_v39  ;;  %3158 = vmatprep.mubr.msk.bf16.mxu1 %vm3915_vm6, %v3938_v44 }
  0x4e   : > { %3254 = vmatprep.mubr.msk.bf16.mxu0 %vm3934_vm12, %v3951_v50 }
  0x4f   : > { %3165 = vmatpush3.bf16.msra.mxu1 %v3495_v35  ;;  %v3523_v35 = vld [vmem:[%s4259_s3 + $0xf8] sm:$0xff]  }
  0x50   : > { %3261 = vmatpush3.bf16.msra.mxu0 %v3496_v39  ;;  %3166 = vmatprep.subr.bf16.mxu1 %v3497_v49  ;;  %v3526_v39 = vld [vmem:[%s4260_s4] sm:$0xff]  }
  0x51   : > { %3262 = vmatprep.subr.bf16.mxu0 %v3498_v53 }
  0x52   : > { %3159 = vmatmul.mubr.msk.bf16.gmra.mrb[4].mxu1 %vm3941_vm14, %v3977_v48 }
  0x53   : > { %3167 = vmatpush3.bf16.msra.mxu1 %v3497_v49  ;;  %3255 = vmatmul.mubr.msk.bf16.gmra.mrb[4].mxu0 %vm3954_vm7, %v3979_v60  ;;  %v3530_v49 = vld [vmem:[%s4260_s4 + $0x10] sm:$0xff]  }
  0x54   : > { %3263 = vmatpush3.bf16.msra.mxu0 %v3498_v53  ;;  %3168 = vmatprep.subr.bf16.mxu1 %v3499_v58  ;;  %v3533_v53 = vld [vmem:[%s4259_s3 + $0x220] sm:$0xff]  }
  0x55   : > { %3264 = vmatprep.subr.bf16.mxu0 %v3500_v61  ;;  %3178 = vmatprep.mubr.msk.bf16.mxu1 %vm2789_vm8, %v2790_v62  ;;  %vm4078_vm8 = vmpackc.low %vm2918_vm11, %vm2880_vm9 }
  0x56   : > { %3274 = vmatprep.mubr.msk.bf16.mxu0 %vm3996_vm3, %v3938_v44 }
  0x57   : > { %3169 = vmatpush3.bf16.msra.mxu1 %v3499_v58  ;;  %v2064_v58 = vld [vmem:[#allocation2 + $0x59] sm:$0xff] }
  0x58   : > { %3265 = vmatpush3.bf16.msra.mxu0 %v3500_v61  ;;  %3170 = vmatprep.subr.bf16.mxu1 %v3501_v63 }
  0x59   : > { %3266 = vmatprep.subr.bf16.mxu0 %v3502_v20 }
  0x5b   : > { %3171 = vmatpush3.bf16.msra.mxu1 %v3501_v63 }
  0x5c   : > { %3267 = vmatpush3.bf16.msra.mxu0 %v3502_v20  ;;  %3172 = vmatprep.subr.bf16.mxu1 %v3503_v0 }
  0x5d   : > { %3268 = vmatprep.subr.bf16.mxu0 %v3504_v1 }
  0x5f   : > { %3173 = vmatpush3.bf16.msra.mxu1 %v3503_v0 }
  0x60   : > { %3269 = vmatpush3.bf16.msra.mxu0 %v3504_v1  ;;  %3174 = vmatprep.subr.bf16.mxu1 %v3505_v2 }
  0x61   : > { %3270 = vmatprep.subr.bf16.mxu0 %v3506_v3 }
  0x63   : > { %3175 = vmatpush3.bf16.msra.mxu1 %v3505_v2 }
  0x64   : > { %3271 = vmatpush3.bf16.msra.mxu0 %v3506_v3  ;;  %3176 = vmatprep.subr.bf16.mxu1 %v3507_v4 }
  0x65   : > { %3272 = vmatprep.subr.bf16.mxu0 %v3508_v5 }
  0x67   : > { %3177 = vmatpush3.bf16.msra.mxu1 %v3507_v4 }
  0x68   : > { %3273 = vmatpush3.bf16.msra.mxu0 %v3508_v5  ;;  %3186 = vmatprep.subr.bf16.mxu1 %v3509_v7 }
  0x69   : > { %3282 = vmatprep.subr.bf16.mxu0 %v3510_v9 }
  0x6a   : > { %3179 = vmatmul.mubr.msk.bf16.vlgmr.msra.gmra.mrb[0].mxu1 %vm3902_vm15, %v3829_v55  ;;  %v1710_v55 = vld [vmem:[#allocation2 + $0x57] sm:$0xff] }
  0x6b   : > { %3187 = vmatpush3.bf16.msra.mxu1 %v3509_v7  ;;  %3275 = vmatmul.mubr.msk.bf16.vlgmr.msra.gmra.mrb[0].mxu0 %vm3892_vm13, %v3977_v48  ;;  %v2883_v21 = vpack.c.bf16 %v1711_v17, %v1710_v55 }
  0x6c   : > { %3283 = vmatpush3.bf16.msra.mxu0 %v3510_v9  ;;  %3188 = vmatprep.subr.bf16.mxu1 %v3511_v11 }
  0x6d   : > { %3284 = vmatprep.subr.bf16.mxu0 %v3512_v13  ;;  %3182 = vmatprep.mubr.msk.bf16.mxu1 %vm3934_vm12, %v3926_v38 }
  0x6e   : > { %3278 = vmatprep.mubr.msk.bf16.mxu0 %vm3915_vm6, %v4053_v14 }
  0x6f   : > { %3189 = vmatpush3.bf16.msra.mxu1 %v3511_v11 }
  0x70   : > { %3285 = vmatpush3.bf16.msra.mxu0 %v3512_v13  ;;  %3190 = vmatprep.subr.bf16.mxu1 %v3513_v16 }
  0x71   : > { %3286 = vmatprep.subr.bf16.mxu0 %v3514_v18 }
  0x72   : > { %3183 = vmatmul.mubr.msk.bf16.gmra.mrb[4].mxu1 %vm3954_vm7, %v3951_v50 }
  0x73   : > { %3191 = vmatpush3.bf16.msra.mxu1 %v3513_v16  ;;  %3279 = vmatmul.mubr.msk.bf16.gmra.mrb[4].mxu0 %vm2882_vm4, %v2883_v21 }
  0x74   : > { %3287 = vmatpush3.bf16.msra.mxu0 %v3514_v18  ;;  %3192 = vmatprep.subr.bf16.mxu1 %v3515_v23 }
  0x75   : > { %3288 = vmatprep.subr.bf16.mxu0 %v3516_v26  ;;  %3202 = vmatprep.mubr.msk.bf16.mxu1 %vm3996_vm3, %v3919_v34  ;;  %v3522_v34 = vld [vmem:[%s4259_s3 + $0x1f0] sm:$0xff]  }
  0x76   : > { %3298 = vmatprep.mubr.bf16.mxu0 %v3752_v25 }
  0x77   : > { %3193 = vmatpush3.bf16.msra.mxu1 %v3515_v23 }
  0x78   : > { %3289 = vmatpush3.bf16.msra.mxu0 %v3516_v26  ;;  %3194 = vmatprep.subr.bf16.mxu1 %v3517_v28 }
  0x79   : > { %3290 = vmatprep.subr.bf16.mxu0 %v3518_v29 }
  0x7b   : > { %3195 = vmatpush3.bf16.msra.mxu1 %v3517_v28 }
  0x7c   : > { %3291 = vmatpush3.bf16.msra.mxu0 %v3518_v29  ;;  %3196 = vmatprep.subr.bf16.mxu1 %v3519_v30 }
  0x7d   : > { %3292 = vmatprep.subr.bf16.mxu0 %v3520_v31 }
  0x7f   : > { %3197 = vmatpush3.bf16.msra.mxu1 %v3519_v30 }
  0x80   : > { %3293 = vmatpush3.bf16.msra.mxu0 %v3520_v31  ;;  %3198 = vmatprep.subr.bf16.mxu1 %v3521_v32 }
  0x81   : > { %3294 = vmatprep.subr.bf16.mxu0 %v3522_v34 }
  0x83   : > { %3199 = vmatpush3.bf16.msra.mxu1 %v3521_v32 }
  0x84   : > { %3295 = vmatpush3.bf16.msra.mxu0 %v3522_v34  ;;  %3200 = vmatprep.subr.bf16.mxu1 %v3523_v35 }
  0x85   : > { %3296 = vmatprep.subr.bf16.mxu0 %v3524_v37 }
  0x87   : > { %3201 = vmatpush3.bf16.msra.mxu1 %v3523_v35 }
  0x88   : > { %3297 = vmatpush3.bf16.msra.mxu0 %v3524_v37  ;;  %3330 = vmatprep.subr.bf16.mxu1 %v3526_v39 }
  0x89   : > { %3306 = vmatprep.subr.bf16.mxu0 %v3525_v41 }
  0x8a   : > { %3203 = vmatmul.mubr.msk.bf16.vlgmr.msra.gmra.mrb[0].mxu1 %vm3892_vm13, %v3938_v44  ;;  %v3532_v44 = vld [vmem:[%s4260_s4 + $0x18] sm:$0xff]   ;;  %vm2895_vm13 = vmpackc.low %vm2880_vm9, %vm2880_vm9 }
  0x8b   : > { %3299 = vmatmul.mubr.bf16.vlgmr.msra.gmra.mrb[0].mxu0 %v3775_v36  ;;  %3331 = vmatpush3.bf16.msra.mxu1 %v3526_v39 }
  0x8c   : > { %3307 = vmatpush3.bf16.msra.mxu0 %v3525_v41  ;;  %3332 = vmatprep.subr.bf16.mxu1 %v3528_v45 }
  0x8d   : > { %3308 = vmatprep.subr.bf16.mxu0 %v3527_v46  ;;  %3206 = vmatprep.mubr.msk.bf16.mxu1 %vm3915_vm6, %v3977_v48  ;;  %v2065_v48 = vld [vmem:[#allocation2 + $0x61] sm:$0xff]  ;;  %vm2512_vm6 = vcmask 1042432  }
  0x8e   : > { %3302 = vmatprep.mubr.bf16.mxu0 %v3783_v40  ;;  %v2921_v59 = vpack.c.bf16 %v2065_v48, %v2064_v58 }
  0x8f   : > { %3333 = vmatpush3.bf16.msra.mxu1 %v3528_v45 }
  0x90   : > { %3309 = vmatpush3.bf16.msra.mxu0 %v3527_v46  ;;  %3334 = vmatprep.subr.bf16.mxu1 %v3530_v49 }
  0x91   : > { %3310 = vmatprep.subr.bf16.mxu0 %v3529_v51 }
  0x92   : > { %3207 = vmatmul.mubr.msk.bf16.gmra.mrb[4].mxu1 %vm3941_vm14, %v4053_v14 }
  0x93   : > { %3335 = vmatpush3.bf16.msra.mxu1 %v3530_v49  ;;  %3303 = vmatmul.mubr.msk.bf16.gmra.mrb[4].mxu0 %vm2895_vm13, %v3537_v22 }
  0x94   : > { %3311 = vmatpush3.bf16.msra.mxu0 %v3529_v51  ;;  %3336 = vmatprep.subr.bf16.mxu1 %v3532_v44 }
  0x95   : > { %3312 = vmatprep.subr.bf16.mxu0 %v3531_v33  ;;  %3322 = vmatprep.mubr.msk.bf16.mxu0 %vm3833_vm10, %v3926_v38  ;;  %v3541_v38 = vld [vmem:[%s4260_s4 + $0x38] sm:$0xff]   ;;  %vm2508_vm10 = vcmask 1040384  }
  0x96   : > { %3346 = vmatprep.mubr.bf16.mxu1 %v3749_v24  ;;  %v3538_v24 = vld [vmem:[%s4259_s3 + $0x230] sm:$0xff]  }
  0x97   : > { %3337 = vmatpush3.bf16.msra.mxu1 %v3532_v44 }
  0x98   : > { %3313 = vmatpush3.bf16.msra.mxu0 %v3531_v33  ;;  %3338 = vmatprep.subr.bf16.mxu1 %v3534_v52 }
  0x99   : > { %3314 = vmatprep.subr.bf16.mxu0 %v3533_v53 }
  0x9b   : > { %3339 = vmatpush3.bf16.msra.mxu1 %v3534_v52 }
  0x9c   : > { %3315 = vmatpush3.bf16.msra.mxu0 %v3533_v53  ;;  %3340 = vmatprep.subr.bf16.mxu1 %v3536_v47 }
  0x9d   : > { %3316 = vmatprep.subr.bf16.mxu0 %v3535_v54 }
  0x9f   : > { %3341 = vmatpush3.bf16.msra.mxu1 %v3536_v47 }
  0xa0   : > { %3317 = vmatpush3.bf16.msra.mxu0 %v3535_v54  ;;  %3342 = vmatprep.subr.bf16.mxu1 %v3539_v56 }
  0xa1   : > { %3318 = vmatprep.subr.bf16.mxu0 %v3538_v24 }
  0xa3   : > { %3343 = vmatpush3.bf16.msra.mxu1 %v3539_v56 }
  0xa4   : > { %3319 = vmatpush3.bf16.msra.mxu0 %v3538_v24  ;;  %3344 = vmatprep.subr.bf16.mxu1 %v3541_v38 }
  0xa5   : > { %3320 = vmatprep.subr.bf16.mxu0 %v3540_v57 }
  0xa7   : > { %3345 = vmatpush3.bf16.msra.mxu1 %v3541_v38 }
  0xa8   : > { %3321 = vmatpush3.bf16.msra.mxu0 %v3540_v57 }
  0xaa   : > { %3347 = vmatmul.mubr.bf16.vlgmr.msra.gmra.mrb[8].mxu1 %v3752_v25 }
  0xab   : > { %3323 = vmatmul.mubr.msk.bf16.vlgmr.msra.gmra.mrb[0].mxu0 %vm3902_vm15, %v3951_v50  ;;  %3350 = vmatprep.mubr.bf16.mxu1 %v3775_v36  ;;  %vm2510_vm15 = vcmask 1041408  }
  0xac   : > { %3326 = vmatprep.mubr.msk.bf16.mxu0 %vm3934_vm12, %v3979_v60 }
  0xb2   : > { %3351 = vmatmul.mubr.bf16.gmra.mrb[12].mxu1 %v3783_v40 }
  0xb3   : > { %3327 = vmatmul.mubr.msk.bf16.gmra.mrb[4].mxu0 %vm4078_vm8, %v2921_v59 }
 0x15d   : > { %v3204_v25 = vpop.f32.mrb[0].mxu1 }
 0x15e   : > { %v1343_v61 = vpop.f32.mrb[1].mxu1 }
 0x15f   : > { %v3205_v62 = vpop.f32.mrb[2].mxu1 }
 0x160   : > { %v1346_v27 = vpop.f32.mrb[3].mxu1 }
 0x165   : > { %v3208_v50 = vpop.f32.mrb[4].mxu1 }
 0x166   : > { %v1359_v43 = vpop.f32.mrb[5].mxu1 }
 0x167   : > { %v3209_v63 = vpop.f32.mrb[6].mxu1 }
 0x168   : > { %v4206_v36 = vpop.f32.mrb[7].mxu1 }
 0x17d   : > { %v3348_v40 = vpop.f32.mrb[8].mxu1 }
 0x17e   : > { %v3324_v42 = vpop.f32.mrb[0].mxu0  ;;  %2434 = vst [vmem:[%s4212_s11 + $0x10] sm:$0xff] %v3348_v40  ;;  %v2401_v60 = vpop.f32.mrb[9].mxu1  ;;  %v2489_v6 = vmul.f32 %v3348_v40, %v3348_v40 }
 0x17f   : > { %v3354_v20 = vadd.f32 %v3324_v42, %v3204_v25  ;;  %v2200_v0 = vpop.f32.mrb[1].mxu0  ;;  %2432 = vst [vmem:[%s4212_s11] sm:$0xff] %v2401_v60  ;;  %v2487_v1 = vmul.f32 %v2401_v60, %v2401_v60  ;;  %v3349_v2 = vpop.f32.mrb[10].mxu1 }
 0x180   : > { %v3355_v3 = vadd.f32 %v2200_v0, %v1343_v61  ;;  %v3325_v4 = vpop.f32.mrb[2].mxu0  ;;  %2435 = vst [vmem:[%s4212_s11 + $0x18] sm:$0xff] %v3349_v2  ;;  %v2404_v5 = vpop.f32.mrb[11].mxu1  ;;  %v2490_v18 = vmul.f32 %v3349_v2, %v3349_v2 }
 0x181   : > { %v3356_v7 = vadd.f32 %v3325_v4, %v3205_v62  ;;  %v2203_v8 = vpop.f32.mrb[3].mxu0  ;;  %2433 = vst [vmem:[%s4212_s11 + $0x8] sm:$0xff] %v2404_v5  ;;  %v2474_v9 = vadd.f32 %v2404_v5, %v2401_v60  ;;  %v2488_v10 = vmul.f32 %v2404_v5, %v2404_v5  ;;  %v2455_v26 = vmul.f32 %v3354_v20, %v3354_v20 }
 0x182   : > { %v3357_v11 = vadd.f32 %v2203_v8, %v1346_v27  ;;  %v2453_v15 = vmul.f32 %v3355_v3, %v3355_v3 }
 0x183   : > { %v2975_v12 = vpack.c.bf16 %v3356_v7, %v3354_v20  ;;  %v2475_v13 = vadd.f32 %v3348_v40, %v2474_v9  ;;  %v2495_v14 = vadd.f32 %v2488_v10, %v2487_v1  ;;  %v2456_v45 = vmul.f32 %v3356_v7, %v3356_v7 }
 0x184   : > { %v2970_v16 = vpack.c.bf16 %v3357_v11, %v3355_v3  ;;  %v2440_v55 = vadd.f32 %v3357_v11, %v3355_v3  ;;  %v2454_v17 = vmul.f32 %v3357_v11, %v3357_v11 }
 0x185   : > { %2987 = vst [vmem:[%s4223_s8 + $0x8] sm:$0xff] %v2975_v12   ;;  %v2496_v19 = vadd.f32 %v2495_v14, %v2489_v6  ;;  %v3352_v21 = vpop.f32.mrb[12].mxu1  ;;  %v2476_v23 = vadd.f32 %v3349_v2, %v2475_v13 }
 0x186   : > { %2971 = vst [vmem:[%s4223_s8] sm:$0xff] %v2970_v16   ;;  %v2441_v28 = vadd.f32 %v3354_v20, %v2440_v55  ;;  %v2461_v29 = vadd.f32 %v2454_v17, %v2453_v15  ;;  %v3328_v30 = vpop.f32.mrb[4].mxu0  ;;  %2438 = vst [vmem:[%s4212_s11 + $0x30] sm:$0xff] %v3352_v21  ;;  %v2417_v31 = vpop.f32.mrb[13].mxu1  ;;  %v2493_v57 = vmul.f32 %v3352_v21, %v3352_v21 }
 0x187   : > { %v3358_v32 = vadd.f32 %v3328_v30, %v3208_v50  ;;  %v2216_v34 = vpop.f32.mrb[5].mxu0  ;;  %2436 = vst [vmem:[%s4212_s11 + $0x20] sm:$0xff] %v2417_v31  ;;  %v2477_v35 = vadd.f32 %v2476_v23, %v2417_v31  ;;  %v2491_v37 = vmul.f32 %v2417_v31, %v2417_v31  ;;  %v2497_v39 = vadd.f32 %v2496_v19, %v2490_v18  ;;  %v3353_v41 = vpop.f32.mrb[14].mxu1 }
 0x188   : > { %v2462_v46 = vadd.f32 %v2461_v29, %v2455_v26  ;;  %v3359_v49 = vadd.f32 %v2216_v34, %v1359_v43  ;;  %v2442_v51 = vadd.f32 %v3356_v7, %v2441_v28  ;;  %v3329_v22 = vpop.f32.mrb[6].mxu0  ;;  %2439 = vst [vmem:[%s4212_s11 + $0x38] sm:$0xff] %v3353_v41  ;;  %v2420_v44 = vpop.f32.mrb[15].mxu1  ;;  %v2494_v60 = vmul.f32 %v3353_v41, %v3353_v41 }
 0x189   : > { %v2498_v33 = vadd.f32 %v2497_v39, %v2491_v37  ;;  %v3360_v52 = vadd.f32 %v3329_v22, %v3209_v63  ;;  %v2219_v53 = vpop.f32.mrb[7].mxu0  ;;  %2437 = vst [vmem:[%s4212_s11 + $0x28] sm:$0xff] %v2420_v44  ;;  %v2478_v47 = vadd.f32 %v2477_v35, %v2420_v44  ;;  %v2492_v59 = vmul.f32 %v2420_v44, %v2420_v44 }
 0x18a   : > { %v2443_v54 = vadd.f32 %v3359_v49, %v2442_v51  ;;  %v2457_v56 = vmul.f32 %v3359_v49, %v3359_v49  ;;  %v2463_v24 = vadd.f32 %v2462_v46, %v2456_v45  ;;  %v3361_v38 = vadd.f32 %v2219_v53, %v4206_v36 }
 0x18b   : > { %v2985_v58 = vpack.c.bf16 %v3360_v52, %v3358_v32  ;;  %v2479_v48 = vadd.f32 %v3352_v21, %v2478_v47  ;;  %v2499_v43 = vadd.f32 %v2498_v33, %v2492_v59  ;;  %v2459_v63 = vmul.f32 %v3358_v32, %v3358_v32 }
 0x18c   : > { %v2464_v25 = vadd.f32 %v2463_v24, %v2457_v56  ;;  %v2980_v61 = vpack.c.bf16 %v3361_v38, %v3359_v49  ;;  %v2444_v62 = vadd.f32 %v3361_v38, %v2443_v54  ;;  %v2458_v27 = vmul.f32 %v3361_v38, %v3361_v38 }
 0x18d   : > { %2989 = vst [vmem:[%s4223_s8 + $0x18] sm:$0xff] %v2985_v58   ;;  %v2480_v50 = vadd.f32 %v3353_v41, %v2479_v48  ;;  %v2500_v20 = vadd.f32 %v2499_v43, %v2493_v57  ;;  %v2460_v0 = vmul.f32 %v3360_v52, %v3360_v52 }
 0x18e   : > { %2988 = vst [vmem:[%s4223_s8 + $0x10] sm:$0xff] %v2980_v61   ;;  %v2445_v40 = vadd.f32 %v3358_v32, %v2444_v62  ;;  %v2465_v42 = vadd.f32 %v2464_v25, %v2458_v27 }
 0x18f   : > { %v2481_v36 = vrot.slane %v2480_v50, 4  ;;  %v2501_v4 = vadd.f32 %v2500_v20, %v2494_v60 }
 0x190   : > { %v2446_v1 = vadd.f32 %v3360_v52, %v2445_v40  ;;  %v2466_v2 = vadd.f32 %v2465_v42, %v2459_v63 }
 0x191   : > { %v2482_v3 = vadd.f32 %v2481_v36, %v2480_v50  ;;  %v2502_v8 = vrot.slane %v2501_v4, 4 }
 0x192   : > { %v2447_v5 = vrot.slane %v2446_v1, 4  ;;  %v2467_v6 = vadd.f32 %v2466_v2, %v2460_v0 }
 0x193   : > { %v2483_v7 = vrot.slane %v2482_v3, 2  ;;  %v2503_v11 = vadd.f32 %v2502_v8, %v2501_v4 }
 0x194   : > { %v2448_v9 = vadd.f32 %v2447_v5, %v2446_v1  ;;  %v2468_v10 = vrot.slane %v2467_v6, 4 }
 0x195   : > { %v2484_v14 = vadd.f32 %v2483_v7, %v2482_v3  ;;  %v2504_v15 = vrot.slane %v2503_v11, 2 }
 0x196   : > { %v2449_v12 = vrot.slane %v2448_v9, 2  ;;  %v2469_v13 = vadd.f32 %v2468_v10, %v2467_v6 }
 0x197   : > { %v2505_v17 = vadd.f32 %v2504_v15, %v2503_v11  ;;  %v2485_v21 = vrot.slane %v2484_v14, 1 }
 0x198   : > { %v2450_v16 = vadd.f32 %v2449_v12, %v2448_v9  ;;  %v2470_v55 = vrot.slane %v2469_v13, 2 }
 0x199   : > { %v2506_v26 = vrot.slane %v2505_v17, 1  ;;  %v2486_v30 = vadd.f32 %v2485_v21, %v2484_v14 }
 0x19a   : > { %v2451_v18 = vrot.slane %v2450_v16, 1  ;;  %v2471_v19 = vadd.f32 %v2470_v55, %v2469_v13 }
 0x19b   : > { %v2507_v31 = vadd.f32 %v2506_v26, %v2505_v17 }
 0x19c   : > { %v2472_v23 = vrot.slane %v2471_v19, 1  ;;  %v2452_v28 = vadd.f32 %v2451_v18, %v2450_v16 }
 0x19e   : > { %v2473_v29 = vadd.f32 %v2472_v23, %v2471_v19 }
 0x1a0   : > { %v2509_v32 = vsel %vm2508_vm10, %v2452_v28, %v2473_v29 }
 0x1a1   : > { %v2511_v34 = vsel %vm2510_vm15, %v2509_v32, %v2486_v30 }
 0x1a2   : > { %v2513_v35 = vsel %vm2512_vm6, %v2511_v34, %v2507_v31 }
 0x1a3   : > { %2514 = vst [vmem:[%s489_s9] sm:$0xf] %v2513_v35 }
 0x1a4 PF: > { %s18_s28 = sadd.s32 1, %s3588_s28   ;;  %s4301_s24 = smov %s3580_s26 }
 0x1a5   : > { %p15_p0 = scmp.ge.s32.totalorder %s18_s28, 10   ;;  %s4302_s25 = smov %s3584_s27 }
 0x1a6   : > { %s4303_s26 = smov %s4306_s29  ;;  %s4304_s27 = smov %s4310_s30 }
 0x1a7   :  { %17 = sbr.rel (!%p15_p0) target bundleno = 3 (0x3), region = 100 }

</bundles_post_ra>
